<compile_context>
chip_gen: v5e
topology: v5e:2x2
jax: 0.10.0
libtpu: 0.0.40
codegen_flags: <defaults>
</compile_context>

<pallas_src>
import functools
import math

import jax
import jax.numpy as jnp
from jax.experimental import pallas as pl
from jax.experimental.pallas import tpu as pltpu

EPS = 1e-7                      # matches LayerNorm.forward(epsilon=1e-07)
_GELU_C = math.sqrt(2.0 / math.pi)
_SAFE_VMEM = 48 * 1024 * 1024   # safe everywhere (v7x has 64 MiB physical)


# ---------------------------------------------------------------------------
# per-generation tuning (VMEM budget, tile targets)
# ---------------------------------------------------------------------------
def _tpu_vmem_limit():
    """~3/4 of physical VMEM: ~96 MiB on v5e/v6e (128 MiB), 48 MiB on v7x."""
    try:
        cap = int(pltpu.get_tpu_info().vmem_capacity_bytes)
        return max(min(cap * 3 // 4, 100 * 1024 * 1024), 32 * 1024 * 1024)
    except Exception:
        return _SAFE_VMEM


VMEM_LIMIT = _tpu_vmem_limit()
SEQ_TILE_TARGET = 256 if VMEM_LIMIT >= 72 * 1024 * 1024 else 128
VOCAB_TILE_TARGET = 2048 if VMEM_LIMIT >= 72 * 1024 * 1024 else 1024


def _pick_tile(dim, target, align):
    """Largest tile <= target that divides dim and is `align`-aligned.
    Falls back to the full dim (block == array dim is always legal)."""
    if dim <= target:
        return dim
    t = (min(target, dim) // align) * align
    while t >= align:
        if dim % t == 0:
            return t
        t -= align
    return dim


# ---------------------------------------------------------------------------
# single-buffered weight specs (pl.Buffered(1)) with a capability probe
# ---------------------------------------------------------------------------
def _probe_single_buffer():
    """Verify pipeline_mode=pl.Buffered(1) lowers on this jax/TPU combo."""
    try:
        spec = pl.BlockSpec((8, 128), lambda i: (0, 0),
                            pipeline_mode=pl.Buffered(1))

        def k(x_ref, o_ref):
            o_ref[...] = x_ref[...] + 1.0

        out = pl.pallas_call(
            k,
            out_shape=jax.ShapeDtypeStruct((8, 128), jnp.float32),
            grid=(2,),
            in_specs=[spec],
            out_specs=pl.BlockSpec((8, 128), lambda i: (0, 0)),
        )(jnp.zeros((8, 128), jnp.float32))
        jax.block_until_ready(out)
        return True
    except Exception:
        return False


_SINGLE_BUFFER_OK = _probe_single_buffer()


def _const_spec(shape):
    """BlockSpec for a weight whose block index never changes.

    Single-buffered when supported: constant-index operands gain nothing from
    double buffering and it halves their VMEM footprint."""
    nd = len(shape)
    index_map = lambda *_: (0,) * nd
    if _SINGLE_BUFFER_OK:
        return pl.BlockSpec(shape, index_map, pipeline_mode=pl.Buffered(1))
    return pl.BlockSpec(shape, index_map)


# ---------------------------------------------------------------------------
# in-kernel helpers (f32 math)
# ---------------------------------------------------------------------------
def _layernorm(x, scale, shift):
    # PyTorch ref: ((x - mean) / sqrt(var_biased + eps) + shift) * scale
    mean = jnp.mean(x, axis=-1, keepdims=True)
    var = jnp.mean((x - mean) ** 2, axis=-1, keepdims=True)
    x_norm = (x - mean) * jax.lax.rsqrt(var + EPS)
    return (x_norm + shift) * scale


def _gelu(x):
    return 0.5 * x * (1.0 + jnp.tanh(_GELU_C * (x + 0.044715 * (x * x * x))))


# ---------------------------------------------------------------------------
# Pallas kernels
# ---------------------------------------------------------------------------
def qkv_kernel(x_ref, ln_s_ref, ln_b_ref, wqkv_ref, q_ref, kv_ref, *, n_heads):
    """LayerNorm1 + fused Q|K|V projection for one (batch, seq-tile)."""
    x = x_ref[0]                                        # (TL, D) f32
    d = x.shape[-1]
    inv_sqrt_dh = 1.0 / math.sqrt(d // n_heads)

    h = _layernorm(x, ln_s_ref[0], ln_b_ref[0]).astype(jnp.bfloat16)
    qkv = jnp.dot(h, wqkv_ref[...],
                  preferred_element_type=jnp.float32)   # (TL, 3D), one MXU pass

    q_ref[0] = (qkv[:, :d] * inv_sqrt_dh).astype(q_ref.dtype)   # fold 1/sqrt(dh)
    kv_ref[0] = qkv[:, d:].astype(kv_ref.dtype)                 # [K | V]


def attn_mlp_kernel(x_ref, q_ref, kv_ref, wo_ref, bo_ref,
                    ln2_s_ref, ln2_b_ref, w1_ref, b1_ref, w2_ref, b2_ref,
                    o_ref, ctx_ref, *, n_heads):
    """Causal MHA + Wo + residual + LN2 + MLP + residual for one (b, q-tile)."""
    x = x_ref[0]                                        # (TQ, D) f32 residual
    d = x.shape[-1]
    dh = d // n_heads
    tq = x.shape[0]
    seq_len = kv_ref.shape[1]

    q0 = pl.program_id(1) * tq
    row = jax.lax.broadcasted_iota(jnp.int32, (tq, seq_len), 0) + q0
    col = jax.lax.broadcasted_iota(jnp.int32, (tq, seq_len), 1)
    causal = row >= col

    # --- multi-head attention, one head at a time; only one (TQ, L) f32 score
    #     tile is live, and Q/K/V stay in lane-dense (., D)/(., 2D) layout.
    nt_dims = (((1,), (1,)), ((), ()))          # A @ B.T without materializing B.T
    for hi in range(n_heads):
        q_h = q_ref[0, :, pl.ds(hi * dh, dh)]           # (TQ, dh) bf16 (pre-scaled)
        k_h = kv_ref[0, :, pl.ds(hi * dh, dh)]          # (L, dh)  bf16
        v_h = kv_ref[0, :, pl.ds(d + hi * dh, dh)]      # (L, dh)  bf16
        s = jax.lax.dot_general(q_h, k_h, nt_dims,
                                preferred_element_type=jnp.float32)   # (TQ, L)
        s = jnp.where(causal, s, -jnp.inf)
        m = jnp.max(s, axis=-1, keepdims=True)
        p = jnp.exp(s - m)
        # approx reciprocal (EUP slot); use exact divide if bit parity is needed
        p = p * pl.reciprocal(jnp.sum(p, axis=-1, keepdims=True), approx=True)
        ctx_h = jnp.dot(p.astype(jnp.bfloat16), v_h,
                        preferred_element_type=jnp.float32)           # (TQ, dh)
        ctx_ref[:, pl.ds(hi * dh, dh)] = ctx_h.astype(ctx_ref.dtype)

    # --- output projection: one (TQ, D) x (D, D) dot, full-depth contraction
    attn = jnp.dot(ctx_ref[...], wo_ref[...],
                   preferred_element_type=jnp.float32) + bo_ref[0]
    y = x + attn                                        # dropout -> identity

    # --- LayerNorm2 + MLP + residual (fused: no HBM round trip for y)
    h2 = _layernorm(y, ln2_s_ref[0], ln2_b_ref[0]).astype(jnp.bfloat16)
    ff = jnp.dot(h2, w1_ref[...], preferred_element_type=jnp.float32) + b1_ref[0]
    ff = _gelu(ff)
    ff = jnp.dot(ff.astype(jnp.bfloat16), w2_ref[...],
                 preferred_element_type=jnp.float32) + b2_ref[0]
    o_ref[0] = (y + ff).astype(o_ref.dtype)             # dropout -> identity


def final_norm_kernel(x_ref, s_ref, b_ref, o_ref):
    """Final LayerNorm, hoisted out of the vocab loop (done once per tile)."""
    o_ref[0] = _layernorm(x_ref[0], s_ref[0], b_ref[0]).astype(o_ref.dtype)


def lm_head_kernel(xn_ref, w_ref, b_ref, o_ref):
    """Vocab-tiled LM head (normalized activations already in bf16)."""
    logits = jnp.dot(xn_ref[0], w_ref[...],
                     preferred_element_type=jnp.float32) + b_ref[0]
    o_ref[0] = logits.astype(o_ref.dtype)


# ---------------------------------------------------------------------------
# pallas_call wrappers
# ---------------------------------------------------------------------------
def _cparams(n_axes):
    return pltpu.CompilerParams(
        dimension_semantics=("parallel",) * n_axes,
        vmem_limit_bytes=VMEM_LIMIT)


def qkv_project(x, blk, n_heads, tl):
    B, L, D = x.shape
    act = pl.BlockSpec((1, tl, D), lambda b, i: (b, i, 0))
    return pl.pallas_call(
        functools.partial(qkv_kernel, n_heads=n_heads),
        out_shape=(jax.ShapeDtypeStruct((B, L, D), jnp.bfloat16),
                   jax.ShapeDtypeStruct((B, L, 2 * D), jnp.bfloat16)),
        grid=(B, L // tl),
        in_specs=[act,
                  _const_spec((1, D)),            # ln1 scale
                  _const_spec((1, D)),            # ln1 shift
                  _const_spec((D, 3 * D))],       # fused Wq|Wk|Wv
        out_specs=(pl.BlockSpec((1, tl, D), lambda b, i: (b, i, 0)),
                   pl.BlockSpec((1, tl, 2 * D), lambda b, i: (b, i, 0))),
        compiler_params=_cparams(2),
    )(x, blk["ln1_scale"], blk["ln1_shift"], blk["wqkv"])


def attn_mlp(x, q, kv, blk, n_heads, tl):
    B, L, D = x.shape
    H4 = blk["w1"].shape[1]
    act = pl.BlockSpec((1, tl, D), lambda b, i: (b, i, 0))
    return pl.pallas_call(
        functools.partial(attn_mlp_kernel, n_heads=n_heads),
        out_shape=jax.ShapeDtypeStruct((B, L, D), x.dtype),
        grid=(B, L // tl),
        in_specs=[
            act,                                                   # residual x
            pl.BlockSpec((1, tl, D), lambda b, i: (b, i, 0)),      # Q tile
            pl.BlockSpec((1, L, 2 * D), lambda b, i: (b, 0, 0)),   # full K|V
            _const_spec((D, D)),                                   # Wo
            _const_spec((1, D)),                                   # bo
            _const_spec((1, D)),                                   # ln2 scale
            _const_spec((1, D)),                                   # ln2 shift
            _const_spec((D, H4)),                                  # W1
            _const_spec((1, H4)),                                  # b1
            _const_spec((H4, D)),                                  # W2
            _const_spec((1, D)),                                   # b2
        ],
        out_specs=act,
        scratch_shapes=[pltpu.VMEM((tl, D), jnp.bfloat16)],        # ctx buffer
        compiler_params=_cparams(2),
    )(x, q, kv, blk["wo"], blk["bo"], blk["ln2_scale"], blk["ln2_shift"],
      blk["w1"], blk["b1"], blk["w2"], blk["b2"])


def final_norm(x, p, tl):
    B, L, D = x.shape
    act = pl.BlockSpec((1, tl, D), lambda b, i: (b, i, 0))
    return pl.pallas_call(
        final_norm_kernel,
        out_shape=jax.ShapeDtypeStruct((B, L, D), jnp.bfloat16),
        grid=(B, L // tl),
        in_specs=[act, _const_spec((1, D)), _const_spec((1, D))],
        out_specs=act,
        compiler_params=_cparams(2),
    )(x, p["f_scale"], p["f_shift"])


def lm_head(xn, p, tl, tv):
    B, L, D = xn.shape
    V = p["w_out"].shape[1]
    assert L % tl == 0 and V % tv == 0
    return pl.pallas_call(
        lm_head_kernel,
        out_shape=jax.ShapeDtypeStruct((B, L, V), jnp.float32),
        # vocab axis OUTERMOST: the (D, TV) weight block index is constant over
        # the inner (b, seq-tile) sweep, so the pipeline does not refetch it.
        grid=(V // tv, B, L // tl),
        in_specs=[
            pl.BlockSpec((1, tl, D), lambda j, b, i: (b, i, 0)),
            pl.BlockSpec((D, tv), lambda j, b, i: (0, j)),
            pl.BlockSpec((1, tv), lambda j, b, i: (0, j)),
        ],
        out_specs=pl.BlockSpec((1, tl, tv), lambda j, b, i: (b, i, j)),
        compiler_params=_cparams(3),
    )(xn, p["w_out"], p["b_out"])


def gpt_forward(tokens, params, n_heads, tl, tv):
    # TODO(synk): token-embedding gather could be a DMA-gather Pallas kernel.
    B, L = tokens.shape
    tok = jnp.take(params["token_emb"], tokens, axis=0)      # (B, L, D) f32
    pos = params["pos_emb"][:L]                              # (L, D)
    x = (tok + pos).astype(jnp.float32)                      # dropout -> id

    for blk in params["blocks"]:
        q, kv = qkv_project(x, blk, n_heads, tl)             # lane-dense layouts
        x = attn_mlp(x, q, kv, blk, n_heads, tl)             # attn+MLP fused

    xn = final_norm(x, params["final"], tl)                  # LN once, bf16
    return lm_head(xn, params["final"], tl, tv)


# ---------------------------------------------------------------------------
# deterministic parameter init (matmul weights bf16; norms/biases/emb f32)
# ---------------------------------------------------------------------------
def init_params(key, *, vocab_size, context_length, emb_dim, n_layers):
    D, H4, V = emb_dim, 4 * emb_dim, vocab_size
    bf = jnp.bfloat16

    def nrm(k, shape, std=0.02, dtype=jnp.float32):
        return (std * jax.random.normal(k, shape)).astype(dtype)

    keys = jax.random.split(key, 3 + n_layers)
    params = {
        "token_emb": nrm(keys[0], (V, D)),
        "pos_emb": nrm(keys[1], (context_length, D)),
        "blocks": [],
    }
    for i in range(n_layers):
        ks = jax.random.split(keys[3 + i], 6)
        params["blocks"].append({
            "ln1_scale": jnp.ones((1, D), jnp.float32),
            "ln1_shift": jnp.zeros((1, D), jnp.float32),
            "wqkv": nrm(ks[0], (D, 3 * D), dtype=bf),     # fused [Wq | Wk | Wv]
            "wo": nrm(ks[1], (D, D), dtype=bf),
            "bo": nrm(ks[2], (1, D)),
            "ln2_scale": jnp.ones((1, D), jnp.float32),
            "ln2_shift": jnp.zeros((1, D), jnp.float32),
            "w1": nrm(ks[3], (D, H4), dtype=bf),
            "b1": nrm(ks[4], (1, H4)),
            "w2": nrm(ks[5], (H4, D), dtype=bf),
            "b2": jnp.zeros((1, D), jnp.float32),
        })
    kf = jax.random.split(keys[2], 2)
    params["final"] = {
        "f_scale": jnp.ones((1, D), jnp.float32),
        "f_shift": jnp.zeros((1, D), jnp.float32),
        "w_out": nrm(kf[0], (D, V), dtype=bf),
        "b_out": nrm(kf[1], (1, V)),
    }
    return params


# ---------------------------------------------------------------------------
if __name__ == "__main__":
    # small synthetic config consistent with the module structure
    cfg = dict(vocab_size=512, context_length=64, emb_dim=128,
               n_heads=4, n_layers=2)
    B, L = 2, 32

    seq_tile = _pick_tile(L, SEQ_TILE_TARGET, 8)            # -> 32 (== L) here
    vocab_tile = _pick_tile(cfg["vocab_size"], VOCAB_TILE_TARGET, 128)

    key = jax.random.PRNGKey(0)
    k_params, k_tokens = jax.random.split(key)
    params = init_params(k_params, vocab_size=cfg["vocab_size"],
                         context_length=cfg["context_length"],
                         emb_dim=cfg["emb_dim"], n_layers=cfg["n_layers"])
    tokens = jax.random.randint(k_tokens, (B, L), 0, cfg["vocab_size"],
                                dtype=jnp.int32)

    fwd = jax.jit(functools.partial(gpt_forward, n_heads=cfg["n_heads"],
                                    tl=seq_tile, tv=vocab_tile))
    logits = fwd(tokens, params)
    jax.block_until_ready(logits)
    assert logits.shape == (B, L, cfg["vocab_size"]), logits.shape
    assert bool(jnp.all(jnp.isfinite(logits)))
    print("KERNEL_OK")
</pallas_src>

<mosaic_0001>
module attributes {stable_mosaic.version = 11 : i64} {
  func.func @k(%arg0: i32, %arg1: memref<8x128xf32, #tpu.memory_space<vmem>>, %arg2: memref<8x128xf32, #tpu.memory_space<vmem>>) attributes {dimension_semantics = [#tpu.dimension_semantics<arbitrary>], iteration_bounds = array<i64: 2>, scalar_prefetch = 0 : i64, scratch_operands = 0 : i64, tpu.core_type = #tpu.core_type<tc>, window_params = [{pipeline_mode = #tpu.pipeline_mode<synchronous>, transform_indices = @transform_0, window_bounds = array<i64: 8, 128>}, {pipeline_mode = #tpu.pipeline_mode<synchronous>, transform_indices = @transform_1, window_bounds = array<i64: 8, 128>}]} {
    %c0 = arith.constant 0 : index
    %c0_0 = arith.constant 0 : index
    %0 = vector.load %arg1[%c0, %c0_0] : memref<8x128xf32, #tpu.memory_space<vmem>>, vector<8x128xf32>
    %cst = arith.constant 1.000000e+00 : f32
    %1 = vector.broadcast %cst : f32 to vector<8x128xf32>
    %2 = arith.addf %0, %1 : vector<8x128xf32>
    %c0_1 = arith.constant 0 : index
    %c0_2 = arith.constant 0 : index
    %3 = vector.load %arg2[%c0_1, %c0_2] : memref<8x128xf32, #tpu.memory_space<vmem>>, vector<8x128xf32>
    tpu.vector_store %arg2[%c0_1, %c0_2], %2 {strides = array<i32>} : memref<8x128xf32, #tpu.memory_space<vmem>>, vector<8x128xf32>,
    return
  }
  func.func @transform_0(%arg0: i32) -> (i32, i32) {
    %c0_i32 = arith.constant 0 : i32
    %c0_i32_0 = arith.constant 0 : i32
    %c0_i32_1 = arith.constant 0 : i32
    return %c0_i32, %c0_i32_0 : i32, i32
  }
  func.func @transform_1(%arg0: i32) -> (i32, i32) {
    %c0_i32 = arith.constant 0 : i32
    %c0_i32_0 = arith.constant 0 : i32
    %c0_i32_1 = arith.constant 0 : i32
    return %c0_i32, %c0_i32_0 : i32, i32
  }
}

module attributes {stable_mosaic.version = 11 : i64} {
  func.func @final_norm_kernel(%arg0: i32, %arg1: i32, %arg2: memref<1x32x128xf32, #tpu.memory_space<vmem>>, %arg3: memref<1x128xf32, #tpu.memory_space<vmem>>, %arg4: memref<1x128xf32, #tpu.memory_space<vmem>>, %arg5: memref<1x32x128xbf16, #tpu.memory_space<vmem>>) attributes {dimension_semantics = [#tpu.dimension_semantics<parallel>, #tpu.dimension_semantics<parallel>], iteration_bounds = array<i64: 2, 1>, scalar_prefetch = 0 : i64, scratch_operands = 0 : i64, tpu.core_type = #tpu.core_type<tc>, window_params = [{transform_indices = @transform_0, window_bounds = array<i64: 1, 32, 128>}, {pipeline_mode = #tpu.pipeline_mode<synchronous>, transform_indices = @transform_1, window_bounds = array<i64: 1, 128>}, {pipeline_mode = #tpu.pipeline_mode<synchronous>, transform_indices = @transform_2, window_bounds = array<i64: 1, 128>}, {transform_indices = @transform_3, window_bounds = array<i64: 1, 32, 128>}]} {
    %c0 = arith.constant 0 : index
    %c0_0 = arith.constant 0 : index
    %c0_1 = arith.constant 0 : index
    %0 = vector.load %arg2[%c0, %c0_0, %c0_1] : memref<1x32x128xf32, #tpu.memory_space<vmem>>, vector<1x32x128xf32>
    %1 = vector.shape_cast %0 : vector<1x32x128xf32> to vector<32x128xf32>
    %c0_2 = arith.constant 0 : index
    %c0_3 = arith.constant 0 : index
    %2 = vector.load %arg3[%c0_2, %c0_3] : memref<1x128xf32, #tpu.memory_space<vmem>>, vector<1x128xf32>
    %3 = vector.shape_cast %2 : vector<1x128xf32> to vector<128xf32>
    %c0_4 = arith.constant 0 : index
    %c0_5 = arith.constant 0 : index
    %4 = vector.load %arg4[%c0_4, %c0_5] : memref<1x128xf32, #tpu.memory_space<vmem>>, vector<1x128xf32>
    %5 = vector.shape_cast %4 : vector<1x128xf32> to vector<128xf32>
    %cst = arith.constant dense<0.000000e+00> : vector<32xf32>
    %6 = vector.multi_reduction <add>, %1, %cst [1] : vector<32x128xf32> to vector<32xf32>
    %7 = vector.shape_cast %6 : vector<32xf32> to vector<32x1xf32>
    %cst_6 = arith.constant 1.280000e+02 : f32
    %8 = vector.broadcast %cst_6 : f32 to vector<32x1xf32>
    %9 = arith.divf %7, %8 : vector<32x1xf32>
    %10 = vector.broadcast %9 : vector<32x1xf32> to vector<32x128xf32>
    %11 = arith.subf %1, %10 : vector<32x128xf32>
    %12 = arith.mulf %11, %11 : vector<32x128xf32>
    %cst_7 = arith.constant dense<0.000000e+00> : vector<32xf32>
    %13 = vector.multi_reduction <add>, %12, %cst_7 [1] : vector<32x128xf32> to vector<32xf32>
    %14 = vector.shape_cast %13 : vector<32xf32> to vector<32x1xf32>
    %cst_8 = arith.constant 1.280000e+02 : f32
    %15 = vector.broadcast %cst_8 : f32 to vector<32x1xf32>
    %16 = arith.divf %14, %15 : vector<32x1xf32>
    %17 = vector.broadcast %9 : vector<32x1xf32> to vector<32x128xf32>
    %18 = arith.subf %1, %17 : vector<32x128xf32>
    %cst_9 = arith.constant 1.000000e-07 : f32
    %19 = vector.broadcast %cst_9 : f32 to vector<32x1xf32>
    %20 = arith.addf %16, %19 : vector<32x1xf32>
    %21 = math.rsqrt %20 : vector<32x1xf32>
    %22 = vector.broadcast %21 : vector<32x1xf32> to vector<32x128xf32>
    %23 = arith.mulf %18, %22 : vector<32x128xf32>
    %24 = vector.shape_cast %5 : vector<128xf32> to vector<1x128xf32>
    %25 = vector.broadcast %24 : vector<1x128xf32> to vector<32x128xf32>
    %26 = arith.addf %23, %25 : vector<32x128xf32>
    %27 = vector.shape_cast %3 : vector<128xf32> to vector<1x128xf32>
    %28 = vector.broadcast %27 : vector<1x128xf32> to vector<32x128xf32>
    %29 = arith.mulf %26, %28 : vector<32x128xf32>
    %30 = arith.truncf %29 : vector<32x128xf32> to vector<32x128xbf16>
    %c0_10 = arith.constant 0 : index
    %c0_11 = arith.constant 0 : index
    %c0_12 = arith.constant 0 : index
    %31 = vector.load %arg5[%c0_10, %c0_11, %c0_12] : memref<1x32x128xbf16, #tpu.memory_space<vmem>>, vector<1x32x128xbf16>
    %32 = vector.shape_cast %31 : vector<1x32x128xbf16> to vector<32x128xbf16>
    %33 = vector.shape_cast %30 : vector<32x128xbf16> to vector<1x32x128xbf16>
    tpu.vector_store %arg5[%c0_10, %c0_11, %c0_12], %33 {strides = array<i32>} : memref<1x32x128xbf16, #tpu.memory_space<vmem>>, vector<1x32x128xbf16>,
    return
  }
  func.func @transform_0(%arg0: i32, %arg1: i32) -> (i32, i32, i32) {
    %c0_i32 = arith.constant 0 : i32
    %c0_i32_0 = arith.constant 0 : i32
    return %arg0, %arg1, %c0_i32 : i32, i32, i32
  }
  func.func @transform_1(%arg0: i32, %arg1: i32) -> (i32, i32) {
    %c0_i32 = arith.constant 0 : i32
    %c0_i32_0 = arith.constant 0 : i32
    %c0_i32_1 = arith.constant 0 : i32
    return %c0_i32, %c0_i32_0 : i32, i32
  }
  func.func @transform_2(%arg0: i32, %arg1: i32) -> (i32, i32) {
    %c0_i32 = arith.constant 0 : i32
    %c0_i32_0 = arith.constant 0 : i32
    %c0_i32_1 = arith.constant 0 : i32
    return %c0_i32, %c0_i32_0 : i32, i32
  }
  func.func @transform_3(%arg0: i32, %arg1: i32) -> (i32, i32, i32) {
    %c0_i32 = arith.constant 0 : i32
    %c0_i32_0 = arith.constant 0 : i32
    return %arg0, %arg1, %c0_i32 : i32, i32, i32
  }
}

module attributes {stable_mosaic.version = 11 : i64} {
  func.func @qkv_kernel(%arg0: i32, %arg1: i32, %arg2: memref<1x32x128xf32, #tpu.memory_space<vmem>>, %arg3: memref<1x128xf32, #tpu.memory_space<vmem>>, %arg4: memref<1x128xf32, #tpu.memory_space<vmem>>, %arg5: memref<128x384xbf16, #tpu.memory_space<vmem>>, %arg6: memref<1x32x128xbf16, #tpu.memory_space<vmem>>, %arg7: memref<1x32x256xbf16, #tpu.memory_space<vmem>>) attributes {dimension_semantics = [#tpu.dimension_semantics<parallel>, #tpu.dimension_semantics<parallel>], iteration_bounds = array<i64: 2, 1>, scalar_prefetch = 0 : i64, scratch_operands = 0 : i64, tpu.core_type = #tpu.core_type<tc>, window_params = [{transform_indices = @transform_0, window_bounds = array<i64: 1, 32, 128>}, {pipeline_mode = #tpu.pipeline_mode<synchronous>, transform_indices = @transform_1, window_bounds = array<i64: 1, 128>}, {pipeline_mode = #tpu.pipeline_mode<synchronous>, transform_indices = @transform_2, window_bounds = array<i64: 1, 128>}, {pipeline_mode = #tpu.pipeline_mode<synchronous>, transform_indices = @transform_3, window_bounds = array<i64: 128, 384>}, {transform_indices = @transform_4, window_bounds = array<i64: 1, 32, 128>}, {transform_indices = @transform_5, window_bounds = array<i64: 1, 32, 256>}]} {
    %c0 = arith.constant 0 : index
    %c0_0 = arith.constant 0 : index
    %c0_1 = arith.constant 0 : index
    %0 = vector.load %arg2[%c0, %c0_0, %c0_1] : memref<1x32x128xf32, #tpu.memory_space<vmem>>, vector<1x32x128xf32>
    %1 = vector.shape_cast %0 : vector<1x32x128xf32> to vector<32x128xf32>
    %c0_2 = arith.constant 0 : index
    %c0_3 = arith.constant 0 : index
    %2 = vector.load %arg3[%c0_2, %c0_3] : memref<1x128xf32, #tpu.memory_space<vmem>>, vector<1x128xf32>
    %3 = vector.shape_cast %2 : vector<1x128xf32> to vector<128xf32>
    %c0_4 = arith.constant 0 : index
    %c0_5 = arith.constant 0 : index
    %4 = vector.load %arg4[%c0_4, %c0_5] : memref<1x128xf32, #tpu.memory_space<vmem>>, vector<1x128xf32>
    %5 = vector.shape_cast %4 : vector<1x128xf32> to vector<128xf32>
    %cst = arith.constant dense<0.000000e+00> : vector<32xf32>
    %6 = vector.multi_reduction <add>, %1, %cst [1] : vector<32x128xf32> to vector<32xf32>
    %7 = vector.shape_cast %6 : vector<32xf32> to vector<32x1xf32>
    %cst_6 = arith.constant 1.280000e+02 : f32
    %8 = vector.broadcast %cst_6 : f32 to vector<32x1xf32>
    %9 = arith.divf %7, %8 : vector<32x1xf32>
    %10 = vector.broadcast %9 : vector<32x1xf32> to vector<32x128xf32>
    %11 = arith.subf %1, %10 : vector<32x128xf32>
    %12 = arith.mulf %11, %11 : vector<32x128xf32>
    %cst_7 = arith.constant dense<0.000000e+00> : vector<32xf32>
    %13 = vector.multi_reduction <add>, %12, %cst_7 [1] : vector<32x128xf32> to vector<32xf32>
    %14 = vector.shape_cast %13 : vector<32xf32> to vector<32x1xf32>
    %cst_8 = arith.constant 1.280000e+02 : f32
    %15 = vector.broadcast %cst_8 : f32 to vector<32x1xf32>
    %16 = arith.divf %14, %15 : vector<32x1xf32>
    %17 = vector.broadcast %9 : vector<32x1xf32> to vector<32x128xf32>
    %18 = arith.subf %1, %17 : vector<32x128xf32>
    %cst_9 = arith.constant 1.000000e-07 : f32
    %19 = vector.broadcast %cst_9 : f32 to vector<32x1xf32>
    %20 = arith.addf %16, %19 : vector<32x1xf32>
    %21 = math.rsqrt %20 : vector<32x1xf32>
    %22 = vector.broadcast %21 : vector<32x1xf32> to vector<32x128xf32>
    %23 = arith.mulf %18, %22 : vector<32x128xf32>
    %24 = vector.shape_cast %5 : vector<128xf32> to vector<1x128xf32>
    %25 = vector.broadcast %24 : vector<1x128xf32> to vector<32x128xf32>
    %26 = arith.addf %23, %25 : vector<32x128xf32>
    %27 = vector.shape_cast %3 : vector<128xf32> to vector<1x128xf32>
    %28 = vector.broadcast %27 : vector<1x128xf32> to vector<32x128xf32>
    %29 = arith.mulf %26, %28 : vector<32x128xf32>
    %30 = arith.truncf %29 : vector<32x128xf32> to vector<32x128xbf16>
    %c0_10 = arith.constant 0 : index
    %c0_11 = arith.constant 0 : index
    %31 = vector.load %arg5[%c0_10, %c0_11] : memref<128x384xbf16, #tpu.memory_space<vmem>>, vector<128x384xbf16>
    %cst_12 = arith.constant dense<0.000000e+00> : vector<32x384xf32>
    %32 = tpu.matmul %30, %31, %cst_12 {dimension_numbers = #tpu.dot_dimension_numbers<[1], [0], [0], [1], [0, 0, 1, 1], [], []>} : vector<32x128xbf16>, vector<128x384xbf16>, vector<32x384xf32> -> vector<32x384xf32>
    %33 = vector.extract_strided_slice %32 {offsets = [0, 0], sizes = [32, 128], strides = [1, 1]} : vector<32x384xf32> to vector<32x128xf32>
    %cst_13 = arith.constant 0.176776692 : f32
    %34 = vector.broadcast %cst_13 : f32 to vector<32x128xf32>
    %35 = arith.mulf %33, %34 : vector<32x128xf32>
    %36 = arith.truncf %35 : vector<32x128xf32> to vector<32x128xbf16>
    %c0_14 = arith.constant 0 : index
    %c0_15 = arith.constant 0 : index
    %c0_16 = arith.constant 0 : index
    %37 = vector.load %arg6[%c0_14, %c0_15, %c0_16] : memref<1x32x128xbf16, #tpu.memory_space<vmem>>, vector<1x32x128xbf16>
    %38 = vector.shape_cast %37 : vector<1x32x128xbf16> to vector<32x128xbf16>
    %39 = vector.shape_cast %36 : vector<32x128xbf16> to vector<1x32x128xbf16>
    tpu.vector_store %arg6[%c0_14, %c0_15, %c0_16], %39 {strides = array<i32>} : memref<1x32x128xbf16, #tpu.memory_space<vmem>>, vector<1x32x128xbf16>,
    %40 = vector.extract_strided_slice %32 {offsets = [0, 128], sizes = [32, 256], strides = [1, 1]} : vector<32x384xf32> to vector<32x256xf32>
    %41 = arith.truncf %40 : vector<32x256xf32> to vector<32x256xbf16>
    %c0_17 = arith.constant 0 : index
    %c0_18 = arith.constant 0 : index
    %c0_19 = arith.constant 0 : index
    %42 = vector.load %arg7[%c0_17, %c0_18, %c0_19] : memref<1x32x256xbf16, #tpu.memory_space<vmem>>, vector<1x32x256xbf16>
    %43 = vector.shape_cast %42 : vector<1x32x256xbf16> to vector<32x256xbf16>
    %44 = vector.shape_cast %41 : vector<32x256xbf16> to vector<1x32x256xbf16>
    tpu.vector_store %arg7[%c0_17, %c0_18, %c0_19], %44 {strides = array<i32>} : memref<1x32x256xbf16, #tpu.memory_space<vmem>>, vector<1x32x256xbf16>,
    return
  }
  func.func @transform_0(%arg0: i32, %arg1: i32) -> (i32, i32, i32) {
    %c0_i32 = arith.constant 0 : i32
    %c0_i32_0 = arith.constant 0 : i32
    return %arg0, %arg1, %c0_i32 : i32, i32, i32
  }
  func.func @transform_1(%arg0: i32, %arg1: i32) -> (i32, i32) {
    %c0_i32 = arith.constant 0 : i32
    %c0_i32_0 = arith.constant 0 : i32
    %c0_i32_1 = arith.constant 0 : i32
    return %c0_i32, %c0_i32_0 : i32, i32
  }
  func.func @transform_2(%arg0: i32, %arg1: i32) -> (i32, i32) {
    %c0_i32 = arith.constant 0 : i32
    %c0_i32_0 = arith.constant 0 : i32
    %c0_i32_1 = arith.constant 0 : i32
    return %c0_i32, %c0_i32_0 : i32, i32
  }
  func.func @transform_3(%arg0: i32, %arg1: i32) -> (i32, i32) {
    %c0_i32 = arith.constant 0 : i32
    %c0_i32_0 = arith.constant 0 : i32
    %c0_i32_1 = arith.constant 0 : i32
    return %c0_i32, %c0_i32_0 : i32, i32
  }
  func.func @transform_4(%arg0: i32, %arg1: i32) -> (i32, i32, i32) {
    %c0_i32 = arith.constant 0 : i32
    %c0_i32_0 = arith.constant 0 : i32
    return %arg0, %arg1, %c0_i32 : i32, i32, i32
  }
  func.func @transform_5(%arg0: i32, %arg1: i32) -> (i32, i32, i32) {
    %c0_i32 = arith.constant 0 : i32
    %c0_i32_0 = arith.constant 0 : i32
    return %arg0, %arg1, %c0_i32 : i32, i32, i32
  }
}

module attributes {stable_mosaic.version = 11 : i64} {
  func.func @attn_mlp_kernel(%arg0: i32, %arg1: i32, %arg2: memref<1x32x128xf32, #tpu.memory_space<vmem>>, %arg3: memref<1x32x128xbf16, #tpu.memory_space<vmem>>, %arg4: memref<1x32x256xbf16, #tpu.memory_space<vmem>>, %arg5: memref<128x128xbf16, #tpu.memory_space<vmem>>, %arg6: memref<1x128xf32, #tpu.memory_space<vmem>>, %arg7: memref<1x128xf32, #tpu.memory_space<vmem>>, %arg8: memref<1x128xf32, #tpu.memory_space<vmem>>, %arg9: memref<128x512xbf16, #tpu.memory_space<vmem>>, %arg10: memref<1x512xf32, #tpu.memory_space<vmem>>, %arg11: memref<512x128xbf16, #tpu.memory_space<vmem>>, %arg12: memref<1x128xf32, #tpu.memory_space<vmem>>, %arg13: memref<1x32x128xf32, #tpu.memory_space<vmem>>, %arg14: memref<32x128xbf16, #tpu.memory_space<vmem>>) attributes {dimension_semantics = [#tpu.dimension_semantics<parallel>, #tpu.dimension_semantics<parallel>], iteration_bounds = array<i64: 2, 1>, scalar_prefetch = 0 : i64, scratch_operands = 1 : i64, tpu.core_type = #tpu.core_type<tc>, window_params = [{transform_indices = @transform_0, window_bounds = array<i64: 1, 32, 128>}, {transform_indices = @transform_1, window_bounds = array<i64: 1, 32, 128>}, {transform_indices = @transform_2, window_bounds = array<i64: 1, 32, 256>}, {pipeline_mode = #tpu.pipeline_mode<synchronous>, transform_indices = @transform_3, window_bounds = array<i64: 128, 128>}, {pipeline_mode = #tpu.pipeline_mode<synchronous>, transform_indices = @transform_4, window_bounds = array<i64: 1, 128>}, {pipeline_mode = #tpu.pipeline_mode<synchronous>, transform_indices = @transform_5, window_bounds = array<i64: 1, 128>}, {pipeline_mode = #tpu.pipeline_mode<synchronous>, transform_indices = @transform_6, window_bounds = array<i64: 1, 128>}, {pipeline_mode = #tpu.pipeline_mode<synchronous>, transform_indices = @transform_7, window_bounds = array<i64: 128, 512>}, {pipeline_mode = #tpu.pipeline_mode<synchronous>, transform_indices = @transform_8, window_bounds = array<i64: 1, 512>}, {pipeline_mode = #tpu.pipeline_mode<synchronous>, transform_indices = @transform_9, window_bounds = array<i64: 512, 128>}, {pipeline_mode = #tpu.pipeline_mode<synchronous>, transform_indices = @transform_10, window_bounds = array<i64: 1, 128>}, {transform_indices = @transform_11, window_bounds = array<i64: 1, 32, 128>}]} {
    %c0 = arith.constant 0 : index
    %c0_0 = arith.constant 0 : index
    %c0_1 = arith.constant 0 : index
    %0 = vector.load %arg2[%c0, %c0_0, %c0_1] : memref<1x32x128xf32, #tpu.memory_space<vmem>>, vector<1x32x128xf32>
    %1 = vector.shape_cast %0 : vector<1x32x128xf32> to vector<32x128xf32>
    %c32_i32 = arith.constant 32 : i32
    %2 = arith.muli %arg1, %c32_i32 : i32
    %3 = tpu.iota {dimensions = array<i32: 0>} : vector<32x32xi32>
    %4 = vector.broadcast %2 : i32 to vector<32x32xi32>
    %5 = arith.addi %3, %4 : vector<32x32xi32>
    %6 = tpu.iota {dimensions = array<i32: 1>} : vector<32x32xi32>
    %7 = arith.cmpi sge, %5, %6 : vector<32x32xi32>
    %c0_2 = arith.constant 0 : index
    %c0_3 = arith.constant 0 : index
    %c0_4 = arith.constant 0 : index
    %8 = vector.load %arg3[%c0_2, %c0_3, %c0_4] : memref<1x32x128xbf16, #tpu.memory_space<vmem>>, vector<1x32x32xbf16>
    %9 = vector.shape_cast %8 : vector<1x32x32xbf16> to vector<32x32xbf16>
    %c0_5 = arith.constant 0 : index
    %c0_6 = arith.constant 0 : index
    %c0_7 = arith.constant 0 : index
    %10 = vector.load %arg4[%c0_5, %c0_6, %c0_7] : memref<1x32x256xbf16, #tpu.memory_space<vmem>>, vector<1x32x32xbf16>
    %11 = vector.shape_cast %10 : vector<1x32x32xbf16> to vector<32x32xbf16>
    %c0_8 = arith.constant 0 : index
    %c0_9 = arith.constant 0 : index
    %c128 = arith.constant 128 : index
    %12 = vector.load %arg4[%c0_8, %c0_9, %c128] : memref<1x32x256xbf16, #tpu.memory_space<vmem>>, vector<1x32x32xbf16>
    %13 = vector.shape_cast %12 : vector<1x32x32xbf16> to vector<32x32xbf16>
    %cst = arith.constant dense<0.000000e+00> : vector<32x32xf32>
    %14 = tpu.matmul %9, %11, %cst {dimension_numbers = #tpu.dot_dimension_numbers<[1], [1], [0], [0], [0, 0, 1, 0], [], []>} : vector<32x32xbf16>, vector<32x32xbf16>, vector<32x32xf32> -> vector<32x32xf32>
    %cst_10 = arith.constant 0xFF800000 : f32
    %15 = vector.broadcast %cst_10 : f32 to vector<32x32xf32>
    %16 = arith.select %7, %14, %15 : vector<32x32xi1>, vector<32x32xf32>
    %cst_11 = arith.constant dense<0xFF800000> : vector<32xf32>
    %17 = vector.multi_reduction <maximumf>, %16, %cst_11 [1] : vector<32x32xf32> to vector<32xf32>
    %18 = vector.shape_cast %17 : vector<32xf32> to vector<32x1xf32>
    %19 = vector.broadcast %18 : vector<32x1xf32> to vector<32x32xf32>
    %20 = arith.subf %16, %19 : vector<32x32xf32>
    %21 = math.exp %20 : vector<32x32xf32>
    %cst_12 = arith.constant dense<0.000000e+00> : vector<32xf32>
    %22 = vector.multi_reduction <add>, %21, %cst_12 [1] : vector<32x32xf32> to vector<32xf32>
    %23 = vector.shape_cast %22 : vector<32xf32> to vector<32x1xf32>
    %24 = tpu.reciprocal %23 {approx = true} : vector<32x1xf32> -> vector<32x1xf32>
    %25 = vector.broadcast %24 : vector<32x1xf32> to vector<32x32xf32>
    %26 = arith.mulf %21, %25 : vector<32x32xf32>
    %27 = arith.truncf %26 : vector<32x32xf32> to vector<32x32xbf16>
    %cst_13 = arith.constant dense<0.000000e+00> : vector<32x32xf32>
    %28 = tpu.matmul %27, %13, %cst_13 {dimension_numbers = #tpu.dot_dimension_numbers<[1], [0], [0], [1], [0, 0, 1, 1], [], []>} : vector<32x32xbf16>, vector<32x32xbf16>, vector<32x32xf32> -> vector<32x32xf32>
    %29 = arith.truncf %28 : vector<32x32xf32> to vector<32x32xbf16>
    %c0_14 = arith.constant 0 : index
    %c0_15 = arith.constant 0 : index
    %30 = vector.load %arg14[%c0_14, %c0_15] : memref<32x128xbf16, #tpu.memory_space<vmem>>, vector<32x32xbf16>
    tpu.vector_store %arg14[%c0_14, %c0_15], %29 {strides = array<i32>} : memref<32x128xbf16, #tpu.memory_space<vmem>>, vector<32x32xbf16>,
    %c0_16 = arith.constant 0 : index
    %c0_17 = arith.constant 0 : index
    %c32 = arith.constant 32 : index
    %31 = vector.load %arg3[%c0_16, %c0_17, %c32] : memref<1x32x128xbf16, #tpu.memory_space<vmem>>, vector<1x32x32xbf16>
    %32 = vector.shape_cast %31 : vector<1x32x32xbf16> to vector<32x32xbf16>
    %c0_18 = arith.constant 0 : index
    %c0_19 = arith.constant 0 : index
    %c32_20 = arith.constant 32 : index
    %33 = vector.load %arg4[%c0_18, %c0_19, %c32_20] : memref<1x32x256xbf16, #tpu.memory_space<vmem>>, vector<1x32x32xbf16>
    %34 = vector.shape_cast %33 : vector<1x32x32xbf16> to vector<32x32xbf16>
    %c0_21 = arith.constant 0 : index
    %c0_22 = arith.constant 0 : index
    %c160 = arith.constant 160 : index
    %35 = vector.load %arg4[%c0_21, %c0_22, %c160] : memref<1x32x256xbf16, #tpu.memory_space<vmem>>, vector<1x32x32xbf16>
    %36 = vector.shape_cast %35 : vector<1x32x32xbf16> to vector<32x32xbf16>
    %cst_23 = arith.constant dense<0.000000e+00> : vector<32x32xf32>
    %37 = tpu.matmul %32, %34, %cst_23 {dimension_numbers = #tpu.dot_dimension_numbers<[1], [1], [0], [0], [0, 0, 1, 0], [], []>} : vector<32x32xbf16>, vector<32x32xbf16>, vector<32x32xf32> -> vector<32x32xf32>
    %cst_24 = arith.constant 0xFF800000 : f32
    %38 = vector.broadcast %cst_24 : f32 to vector<32x32xf32>
    %39 = arith.select %7, %37, %38 : vector<32x32xi1>, vector<32x32xf32>
    %cst_25 = arith.constant dense<0xFF800000> : vector<32xf32>
    %40 = vector.multi_reduction <maximumf>, %39, %cst_25 [1] : vector<32x32xf32> to vector<32xf32>
    %41 = vector.shape_cast %40 : vector<32xf32> to vector<32x1xf32>
    %42 = vector.broadcast %41 : vector<32x1xf32> to vector<32x32xf32>
    %43 = arith.subf %39, %42 : vector<32x32xf32>
    %44 = math.exp %43 : vector<32x32xf32>
    %cst_26 = arith.constant dense<0.000000e+00> : vector<32xf32>
    %45 = vector.multi_reduction <add>, %44, %cst_26 [1] : vector<32x32xf32> to vector<32xf32>
    %46 = vector.shape_cast %45 : vector<32xf32> to vector<32x1xf32>
    %47 = tpu.reciprocal %46 {approx = true} : vector<32x1xf32> -> vector<32x1xf32>
    %48 = vector.broadcast %47 : vector<32x1xf32> to vector<32x32xf32>
    %49 = arith.mulf %44, %48 : vector<32x32xf32>
    %50 = arith.truncf %49 : vector<32x32xf32> to vector<32x32xbf16>
    %cst_27 = arith.constant dense<0.000000e+00> : vector<32x32xf32>
    %51 = tpu.matmul %50, %36, %cst_27 {dimension_numbers = #tpu.dot_dimension_numbers<[1], [0], [0], [1], [0, 0, 1, 1], [], []>} : vector<32x32xbf16>, vector<32x32xbf16>, vector<32x32xf32> -> vector<32x32xf32>
    %52 = arith.truncf %51 : vector<32x32xf32> to vector<32x32xbf16>
    %c0_28 = arith.constant 0 : index
    %c32_29 = arith.constant 32 : index
    %53 = vector.load %arg14[%c0_28, %c32_29] : memref<32x128xbf16, #tpu.memory_space<vmem>>, vector<32x32xbf16>
    tpu.vector_store %arg14[%c0_28, %c32_29], %52 {strides = array<i32>} : memref<32x128xbf16, #tpu.memory_space<vmem>>, vector<32x32xbf16>,
    %c0_30 = arith.constant 0 : index
    %c0_31 = arith.constant 0 : index
    %c64 = arith.constant 64 : index
    %54 = vector.load %arg3[%c0_30, %c0_31, %c64] : memref<1x32x128xbf16, #tpu.memory_space<vmem>>, vector<1x32x32xbf16>
    %55 = vector.shape_cast %54 : vector<1x32x32xbf16> to vector<32x32xbf16>
    %c0_32 = arith.constant 0 : index
    %c0_33 = arith.constant 0 : index
    %c64_34 = arith.constant 64 : index
    %56 = vector.load %arg4[%c0_32, %c0_33, %c64_34] : memref<1x32x256xbf16, #tpu.memory_space<vmem>>, vector<1x32x32xbf16>
    %57 = vector.shape_cast %56 : vector<1x32x32xbf16> to vector<32x32xbf16>
    %c0_35 = arith.constant 0 : index
    %c0_36 = arith.constant 0 : index
    %c192 = arith.constant 192 : index
    %58 = vector.load %arg4[%c0_35, %c0_36, %c192] : memref<1x32x256xbf16, #tpu.memory_space<vmem>>, vector<1x32x32xbf16>
    %59 = vector.shape_cast %58 : vector<1x32x32xbf16> to vector<32x32xbf16>
    %cst_37 = arith.constant dense<0.000000e+00> : vector<32x32xf32>
    %60 = tpu.matmul %55, %57, %cst_37 {dimension_numbers = #tpu.dot_dimension_numbers<[1], [1], [0], [0], [0, 0, 1, 0], [], []>} : vector<32x32xbf16>, vector<32x32xbf16>, vector<32x32xf32> -> vector<32x32xf32>
    %cst_38 = arith.constant 0xFF800000 : f32
    %61 = vector.broadcast %cst_38 : f32 to vector<32x32xf32>
    %62 = arith.select %7, %60, %61 : vector<32x32xi1>, vector<32x32xf32>
    %cst_39 = arith.constant dense<0xFF800000> : vector<32xf32>
    %63 = vector.multi_reduction <maximumf>, %62, %cst_39 [1] : vector<32x32xf32> to vector<32xf32>
    %64 = vector.shape_cast %63 : vector<32xf32> to vector<32x1xf32>
    %65 = vector.broadcast %64 : vector<32x1xf32> to vector<32x32xf32>
    %66 = arith.subf %62, %65 : vector<32x32xf32>
    %67 = math.exp %66 : vector<32x32xf32>
    %cst_40 = arith.constant dense<0.000000e+00> : vector<32xf32>
    %68 = vector.multi_reduction <add>, %67, %cst_40 [1] : vector<32x32xf32> to vector<32xf32>
    %69 = vector.shape_cast %68 : vector<32xf32> to vector<32x1xf32>
    %70 = tpu.reciprocal %69 {approx = true} : vector<32x1xf32> -> vector<32x1xf32>
    %71 = vector.broadcast %70 : vector<32x1xf32> to vector<32x32xf32>
    %72 = arith.mulf %67, %71 : vector<32x32xf32>
    %73 = arith.truncf %72 : vector<32x32xf32> to vector<32x32xbf16>
    %cst_41 = arith.constant dense<0.000000e+00> : vector<32x32xf32>
    %74 = tpu.matmul %73, %59, %cst_41 {dimension_numbers = #tpu.dot_dimension_numbers<[1], [0], [0], [1], [0, 0, 1, 1], [], []>} : vector<32x32xbf16>, vector<32x32xbf16>, vector<32x32xf32> -> vector<32x32xf32>
    %75 = arith.truncf %74 : vector<32x32xf32> to vector<32x32xbf16>
    %c0_42 = arith.constant 0 : index
    %c64_43 = arith.constant 64 : index
    %76 = vector.load %arg14[%c0_42, %c64_43] : memref<32x128xbf16, #tpu.memory_space<vmem>>, vector<32x32xbf16>
    tpu.vector_store %arg14[%c0_42, %c64_43], %75 {strides = array<i32>} : memref<32x128xbf16, #tpu.memory_space<vmem>>, vector<32x32xbf16>,
    %c0_44 = arith.constant 0 : index
    %c0_45 = arith.constant 0 : index
    %c96 = arith.constant 96 : index
    %77 = vector.load %arg3[%c0_44, %c0_45, %c96] : memref<1x32x128xbf16, #tpu.memory_space<vmem>>, vector<1x32x32xbf16>
    %78 = vector.shape_cast %77 : vector<1x32x32xbf16> to vector<32x32xbf16>
    %c0_46 = arith.constant 0 : index
    %c0_47 = arith.constant 0 : index
    %c96_48 = arith.constant 96 : index
    %79 = vector.load %arg4[%c0_46, %c0_47, %c96_48] : memref<1x32x256xbf16, #tpu.memory_space<vmem>>, vector<1x32x32xbf16>
    %80 = vector.shape_cast %79 : vector<1x32x32xbf16> to vector<32x32xbf16>
    %c0_49 = arith.constant 0 : index
    %c0_50 = arith.constant 0 : index
    %c224 = arith.constant 224 : index
    %81 = vector.load %arg4[%c0_49, %c0_50, %c224] : memref<1x32x256xbf16, #tpu.memory_space<vmem>>, vector<1x32x32xbf16>
    %82 = vector.shape_cast %81 : vector<1x32x32xbf16> to vector<32x32xbf16>
    %cst_51 = arith.constant dense<0.000000e+00> : vector<32x32xf32>
    %83 = tpu.matmul %78, %80, %cst_51 {dimension_numbers = #tpu.dot_dimension_numbers<[1], [1], [0], [0], [0, 0, 1, 0], [], []>} : vector<32x32xbf16>, vector<32x32xbf16>, vector<32x32xf32> -> vector<32x32xf32>
    %cst_52 = arith.constant 0xFF800000 : f32
    %84 = vector.broadcast %cst_52 : f32 to vector<32x32xf32>
    %85 = arith.select %7, %83, %84 : vector<32x32xi1>, vector<32x32xf32>
    %cst_53 = arith.constant dense<0xFF800000> : vector<32xf32>
    %86 = vector.multi_reduction <maximumf>, %85, %cst_53 [1] : vector<32x32xf32> to vector<32xf32>
    %87 = vector.shape_cast %86 : vector<32xf32> to vector<32x1xf32>
    %88 = vector.broadcast %87 : vector<32x1xf32> to vector<32x32xf32>
    %89 = arith.subf %85, %88 : vector<32x32xf32>
    %90 = math.exp %89 : vector<32x32xf32>
    %cst_54 = arith.constant dense<0.000000e+00> : vector<32xf32>
    %91 = vector.multi_reduction <add>, %90, %cst_54 [1] : vector<32x32xf32> to vector<32xf32>
    %92 = vector.shape_cast %91 : vector<32xf32> to vector<32x1xf32>
    %93 = tpu.reciprocal %92 {approx = true} : vector<32x1xf32> -> vector<32x1xf32>
    %94 = vector.broadcast %93 : vector<32x1xf32> to vector<32x32xf32>
    %95 = arith.mulf %90, %94 : vector<32x32xf32>
    %96 = arith.truncf %95 : vector<32x32xf32> to vector<32x32xbf16>
    %cst_55 = arith.constant dense<0.000000e+00> : vector<32x32xf32>
    %97 = tpu.matmul %96, %82, %cst_55 {dimension_numbers = #tpu.dot_dimension_numbers<[1], [0], [0], [1], [0, 0, 1, 1], [], []>} : vector<32x32xbf16>, vector<32x32xbf16>, vector<32x32xf32> -> vector<32x32xf32>
    %98 = arith.truncf %97 : vector<32x32xf32> to vector<32x32xbf16>
    %c0_56 = arith.constant 0 : index
    %c96_57 = arith.constant 96 : index
    %99 = vector.load %arg14[%c0_56, %c96_57] : memref<32x128xbf16, #tpu.memory_space<vmem>>, vector<32x32xbf16>
    tpu.vector_store %arg14[%c0_56, %c96_57], %98 {strides = array<i32>} : memref<32x128xbf16, #tpu.memory_space<vmem>>, vector<32x32xbf16>,
    %c0_58 = arith.constant 0 : index
    %c0_59 = arith.constant 0 : index
    %100 = vector.load %arg14[%c0_58, %c0_59] : memref<32x128xbf16, #tpu.memory_space<vmem>>, vector<32x128xbf16>
    %c0_60 = arith.constant 0 : index
    %c0_61 = arith.constant 0 : index
    %101 = vector.load %arg5[%c0_60, %c0_61] : memref<128x128xbf16, #tpu.memory_space<vmem>>, vector<128x128xbf16>
    %cst_62 = arith.constant dense<0.000000e+00> : vector<32x128xf32>
    %102 = tpu.matmul %100, %101, %cst_62 {dimension_numbers = #tpu.dot_dimension_numbers<[1], [0], [0], [1], [0, 0, 1, 1], [], []>} : vector<32x128xbf16>, vector<128x128xbf16>, vector<32x128xf32> -> vector<32x128xf32>
    %c0_63 = arith.constant 0 : index
    %c0_64 = arith.constant 0 : index
    %103 = vector.load %arg6[%c0_63, %c0_64] : memref<1x128xf32, #tpu.memory_space<vmem>>, vector<1x128xf32>
    %104 = vector.shape_cast %103 : vector<1x128xf32> to vector<128xf32>
    %105 = vector.shape_cast %104 : vector<128xf32> to vector<1x128xf32>
    %106 = vector.broadcast %105 : vector<1x128xf32> to vector<32x128xf32>
    %107 = arith.addf %102, %106 : vector<32x128xf32>
    %108 = arith.addf %1, %107 : vector<32x128xf32>
    %c0_65 = arith.constant 0 : index
    %c0_66 = arith.constant 0 : index
    %109 = vector.load %arg7[%c0_65, %c0_66] : memref<1x128xf32, #tpu.memory_space<vmem>>, vector<1x128xf32>
    %110 = vector.shape_cast %109 : vector<1x128xf32> to vector<128xf32>
    %c0_67 = arith.constant 0 : index
    %c0_68 = arith.constant 0 : index
    %111 = vector.load %arg8[%c0_67, %c0_68] : memref<1x128xf32, #tpu.memory_space<vmem>>, vector<1x128xf32>
    %112 = vector.shape_cast %111 : vector<1x128xf32> to vector<128xf32>
    %cst_69 = arith.constant dense<0.000000e+00> : vector<32xf32>
    %113 = vector.multi_reduction <add>, %108, %cst_69 [1] : vector<32x128xf32> to vector<32xf32>
    %114 = vector.shape_cast %113 : vector<32xf32> to vector<32x1xf32>
    %cst_70 = arith.constant 1.280000e+02 : f32
    %115 = vector.broadcast %cst_70 : f32 to vector<32x1xf32>
    %116 = arith.divf %114, %115 : vector<32x1xf32>
    %117 = vector.broadcast %116 : vector<32x1xf32> to vector<32x128xf32>
    %118 = arith.subf %108, %117 : vector<32x128xf32>
    %119 = arith.mulf %118, %118 : vector<32x128xf32>
    %cst_71 = arith.constant dense<0.000000e+00> : vector<32xf32>
    %120 = vector.multi_reduction <add>, %119, %cst_71 [1] : vector<32x128xf32> to vector<32xf32>
    %121 = vector.shape_cast %120 : vector<32xf32> to vector<32x1xf32>
    %cst_72 = arith.constant 1.280000e+02 : f32
    %122 = vector.broadcast %cst_72 : f32 to vector<32x1xf32>
    %123 = arith.divf %121, %122 : vector<32x1xf32>
    %124 = vector.broadcast %116 : vector<32x1xf32> to vector<32x128xf32>
    %125 = arith.subf %108, %124 : vector<32x128xf32>
    %cst_73 = arith.constant 1.000000e-07 : f32
    %126 = vector.broadcast %cst_73 : f32 to vector<32x1xf32>
    %127 = arith.addf %123, %126 : vector<32x1xf32>
    %128 = math.rsqrt %127 : vector<32x1xf32>
    %129 = vector.broadcast %128 : vector<32x1xf32> to vector<32x128xf32>
    %130 = arith.mulf %125, %129 : vector<32x128xf32>
    %131 = vector.shape_cast %112 : vector<128xf32> to vector<1x128xf32>
    %132 = vector.broadcast %131 : vector<1x128xf32> to vector<32x128xf32>
    %133 = arith.addf %130, %132 : vector<32x128xf32>
    %134 = vector.shape_cast %110 : vector<128xf32> to vector<1x128xf32>
    %135 = vector.broadcast %134 : vector<1x128xf32> to vector<32x128xf32>
    %136 = arith.mulf %133, %135 : vector<32x128xf32>
    %137 = arith.truncf %136 : vector<32x128xf32> to vector<32x128xbf16>
    %c0_74 = arith.constant 0 : index
    %c0_75 = arith.constant 0 : index
    %138 = vector.load %arg9[%c0_74, %c0_75] : memref<128x512xbf16, #tpu.memory_space<vmem>>, vector<128x512xbf16>
    %cst_76 = arith.constant dense<0.000000e+00> : vector<32x512xf32>
    %139 = tpu.matmul %137, %138, %cst_76 {dimension_numbers = #tpu.dot_dimension_numbers<[1], [0], [0], [1], [0, 0, 1, 1], [], []>} : vector<32x128xbf16>, vector<128x512xbf16>, vector<32x512xf32> -> vector<32x512xf32>
    %c0_77 = arith.constant 0 : index
    %c0_78 = arith.constant 0 : index
    %140 = vector.load %arg10[%c0_77, %c0_78] : memref<1x512xf32, #tpu.memory_space<vmem>>, vector<1x512xf32>
    %141 = vector.shape_cast %140 : vector<1x512xf32> to vector<512xf32>
    %142 = vector.shape_cast %141 : vector<512xf32> to vector<1x512xf32>
    %143 = vector.broadcast %142 : vector<1x512xf32> to vector<32x512xf32>
    %144 = arith.addf %139, %143 : vector<32x512xf32>
    %cst_79 = arith.constant 5.000000e-01 : f32
    %145 = vector.broadcast %cst_79 : f32 to vector<32x512xf32>
    %146 = arith.mulf %145, %144 : vector<32x512xf32>
    %147 = arith.mulf %144, %144 : vector<32x512xf32>
    %148 = arith.mulf %147, %144 : vector<32x512xf32>
    %cst_80 = arith.constant 4.471500e-02 : f32
    %149 = vector.broadcast %cst_80 : f32 to vector<32x512xf32>
    %150 = arith.mulf %149, %148 : vector<32x512xf32>
    %151 = arith.addf %144, %150 : vector<32x512xf32>
    %cst_81 = arith.constant 0.797884583 : f32
    %152 = vector.broadcast %cst_81 : f32 to vector<32x512xf32>
    %153 = arith.mulf %152, %151 : vector<32x512xf32>
    %154 = math.tanh %153 : vector<32x512xf32>
    %cst_82 = arith.constant 1.000000e+00 : f32
    %155 = vector.broadcast %cst_82 : f32 to vector<32x512xf32>
    %156 = arith.addf %155, %154 : vector<32x512xf32>
    %157 = arith.mulf %146, %156 : vector<32x512xf32>
    %158 = arith.truncf %157 : vector<32x512xf32> to vector<32x512xbf16>
    %c0_83 = arith.constant 0 : index
    %c0_84 = arith.constant 0 : index
    %159 = vector.load %arg11[%c0_83, %c0_84] : memref<512x128xbf16, #tpu.memory_space<vmem>>, vector<512x128xbf16>
    %cst_85 = arith.constant dense<0.000000e+00> : vector<32x128xf32>
    %160 = tpu.matmul %158, %159, %cst_85 {dimension_numbers = #tpu.dot_dimension_numbers<[1], [0], [0], [1], [0, 0, 1, 1], [], []>} : vector<32x512xbf16>, vector<512x128xbf16>, vector<32x128xf32> -> vector<32x128xf32>
    %c0_86 = arith.constant 0 : index
    %c0_87 = arith.constant 0 : index
    %161 = vector.load %arg12[%c0_86, %c0_87] : memref<1x128xf32, #tpu.memory_space<vmem>>, vector<1x128xf32>
    %162 = vector.shape_cast %161 : vector<1x128xf32> to vector<128xf32>
    %163 = vector.shape_cast %162 : vector<128xf32> to vector<1x128xf32>
    %164 = vector.broadcast %163 : vector<1x128xf32> to vector<32x128xf32>
    %165 = arith.addf %160, %164 : vector<32x128xf32>
    %166 = arith.addf %108, %165 : vector<32x128xf32>
    %c0_88 = arith.constant 0 : index
    %c0_89 = arith.constant 0 : index
    %c0_90 = arith.constant 0 : index
    %167 = vector.load %arg13[%c0_88, %c0_89, %c0_90] : memref<1x32x128xf32, #tpu.memory_space<vmem>>, vector<1x32x128xf32>
    %168 = vector.shape_cast %167 : vector<1x32x128xf32> to vector<32x128xf32>
    %169 = vector.shape_cast %166 : vector<32x128xf32> to vector<1x32x128xf32>
    tpu.vector_store %arg13[%c0_88, %c0_89, %c0_90], %169 {strides = array<i32>} : memref<1x32x128xf32, #tpu.memory_space<vmem>>, vector<1x32x128xf32>,
    return
  }
  func.func @transform_0(%arg0: i32, %arg1: i32) -> (i32, i32, i32) {
    %c0_i32 = arith.constant 0 : i32
    %c0_i32_0 = arith.constant 0 : i32
    return %arg0, %arg1, %c0_i32 : i32, i32, i32
  }
  func.func @transform_1(%arg0: i32, %arg1: i32) -> (i32, i32, i32) {
    %c0_i32 = arith.constant 0 : i32
    %c0_i32_0 = arith.constant 0 : i32
    return %arg0, %arg1, %c0_i32 : i32, i32, i32
  }
  func.func @transform_2(%arg0: i32, %arg1: i32) -> (i32, i32, i32) {
    %c0_i32 = arith.constant 0 : i32
    %c0_i32_0 = arith.constant 0 : i32
    %c0_i32_1 = arith.constant 0 : i32
    return %arg0, %c0_i32, %c0_i32_0 : i32, i32, i32
  }
  func.func @transform_3(%arg0: i32, %arg1: i32) -> (i32, i32) {
    %c0_i32 = arith.constant 0 : i32
    %c0_i32_0 = arith.constant 0 : i32
    %c0_i32_1 = arith.constant 0 : i32
    return %c0_i32, %c0_i32_0 : i32, i32
  }
  func.func @transform_4(%arg0: i32, %arg1: i32) -> (i32, i32) {
    %c0_i32 = arith.constant 0 : i32
    %c0_i32_0 = arith.constant 0 : i32
    %c0_i32_1 = arith.constant 0 : i32
    return %c0_i32, %c0_i32_0 : i32, i32
  }
  func.func @transform_5(%arg0: i32, %arg1: i32) -> (i32, i32) {
    %c0_i32 = arith.constant 0 : i32
    %c0_i32_0 = arith.constant 0 : i32
    %c0_i32_1 = arith.constant 0 : i32
    return %c0_i32, %c0_i32_0 : i32, i32
  }
  func.func @transform_6(%arg0: i32, %arg1: i32) -> (i32, i32) {
    %c0_i32 = arith.constant 0 : i32
    %c0_i32_0 = arith.constant 0 : i32
    %c0_i32_1 = arith.constant 0 : i32
    return %c0_i32, %c0_i32_0 : i32, i32
  }
  func.func @transform_7(%arg0: i32, %arg1: i32) -> (i32, i32) {
    %c0_i32 = arith.constant 0 : i32
    %c0_i32_0 = arith.constant 0 : i32
    %c0_i32_1 = arith.constant 0 : i32
    return %c0_i32, %c0_i32_0 : i32, i32
  }
  func.func @transform_8(%arg0: i32, %arg1: i32) -> (i32, i32) {
    %c0_i32 = arith.constant 0 : i32
    %c0_i32_0 = arith.constant 0 : i32
    %c0_i32_1 = arith.constant 0 : i32
    return %c0_i32, %c0_i32_0 : i32, i32
  }
  func.func @transform_9(%arg0: i32, %arg1: i32) -> (i32, i32) {
    %c0_i32 = arith.constant 0 : i32
    %c0_i32_0 = arith.constant 0 : i32
    %c0_i32_1 = arith.constant 0 : i32
    return %c0_i32, %c0_i32_0 : i32, i32
  }
  func.func @transform_10(%arg0: i32, %arg1: i32) -> (i32, i32) {
    %c0_i32 = arith.constant 0 : i32
    %c0_i32_0 = arith.constant 0 : i32
    %c0_i32_1 = arith.constant 0 : i32
    return %c0_i32, %c0_i32_0 : i32, i32
  }
  func.func @transform_11(%arg0: i32, %arg1: i32) -> (i32, i32, i32) {
    %c0_i32 = arith.constant 0 : i32
    %c0_i32_0 = arith.constant 0 : i32
    return %arg0, %arg1, %c0_i32 : i32, i32, i32
  }
}

module attributes {stable_mosaic.version = 11 : i64} {
  func.func @attn_mlp_kernel(%arg0: i32, %arg1: i32, %arg2: memref<1x32x128xf32, #tpu.memory_space<vmem>>, %arg3: memref<1x32x128xbf16, #tpu.memory_space<vmem>>, %arg4: memref<1x32x256xbf16, #tpu.memory_space<vmem>>, %arg5: memref<128x128xbf16, #tpu.memory_space<vmem>>, %arg6: memref<1x128xf32, #tpu.memory_space<vmem>>, %arg7: memref<1x128xf32, #tpu.memory_space<vmem>>, %arg8: memref<1x128xf32, #tpu.memory_space<vmem>>, %arg9: memref<128x512xbf16, #tpu.memory_space<vmem>>, %arg10: memref<1x512xf32, #tpu.memory_space<vmem>>, %arg11: memref<512x128xbf16, #tpu.memory_space<vmem>>, %arg12: memref<1x128xf32, #tpu.memory_space<vmem>>, %arg13: memref<1x32x128xf32, #tpu.memory_space<vmem>>, %arg14: memref<32x128xbf16, #tpu.memory_space<vmem>>) attributes {dimension_semantics = [#tpu.dimension_semantics<parallel>, #tpu.dimension_semantics<parallel>], iteration_bounds = array<i64: 2, 1>, scalar_prefetch = 0 : i64, scratch_operands = 1 : i64, tpu.core_type = #tpu.core_type<tc>, window_params = [{transform_indices = @transform_0, window_bounds = array<i64: 1, 32, 128>}, {transform_indices = @transform_1, window_bounds = array<i64: 1, 32, 128>}, {transform_indices = @transform_2, window_bounds = array<i64: 1, 32, 256>}, {pipeline_mode = #tpu.pipeline_mode<synchronous>, transform_indices = @transform_3, window_bounds = array<i64: 128, 128>}, {pipeline_mode = #tpu.pipeline_mode<synchronous>, transform_indices = @transform_4, window_bounds = array<i64: 1, 128>}, {pipeline_mode = #tpu.pipeline_mode<synchronous>, transform_indices = @transform_5, window_bounds = array<i64: 1, 128>}, {pipeline_mode = #tpu.pipeline_mode<synchronous>, transform_indices = @transform_6, window_bounds = array<i64: 1, 128>}, {pipeline_mode = #tpu.pipeline_mode<synchronous>, transform_indices = @transform_7, window_bounds = array<i64: 128, 512>}, {pipeline_mode = #tpu.pipeline_mode<synchronous>, transform_indices = @transform_8, window_bounds = array<i64: 1, 512>}, {pipeline_mode = #tpu.pipeline_mode<synchronous>, transform_indices = @transform_9, window_bounds = array<i64: 512, 128>}, {pipeline_mode = #tpu.pipeline_mode<synchronous>, transform_indices = @transform_10, window_bounds = array<i64: 1, 128>}, {transform_indices = @transform_11, window_bounds = array<i64: 1, 32, 128>}]} {
    %c0 = arith.constant 0 : index
    %c0_0 = arith.constant 0 : index
    %c0_1 = arith.constant 0 : index
    %0 = vector.load %arg2[%c0, %c0_0, %c0_1] : memref<1x32x128xf32, #tpu.memory_space<vmem>>, vector<1x32x128xf32>
    %1 = vector.shape_cast %0 : vector<1x32x128xf32> to vector<32x128xf32>
    %c32_i32 = arith.constant 32 : i32
    %2 = arith.muli %arg1, %c32_i32 : i32
    %3 = tpu.iota {dimensions = array<i32: 0>} : vector<32x32xi32>
    %4 = vector.broadcast %2 : i32 to vector<32x32xi32>
    %5 = arith.addi %3, %4 : vector<32x32xi32>
    %6 = tpu.iota {dimensions = array<i32: 1>} : vector<32x32xi32>
    %7 = arith.cmpi sge, %5, %6 : vector<32x32xi32>
    %c0_2 = arith.constant 0 : index
    %c0_3 = arith.constant 0 : index
    %c0_4 = arith.constant 0 : index
    %8 = vector.load %arg3[%c0_2, %c0_3, %c0_4] : memref<1x32x128xbf16, #tpu.memory_space<vmem>>, vector<1x32x32xbf16>
    %9 = vector.shape_cast %8 : vector<1x32x32xbf16> to vector<32x32xbf16>
    %c0_5 = arith.constant 0 : index
    %c0_6 = arith.constant 0 : index
    %c0_7 = arith.constant 0 : index
    %10 = vector.load %arg4[%c0_5, %c0_6, %c0_7] : memref<1x32x256xbf16, #tpu.memory_space<vmem>>, vector<1x32x32xbf16>
    %11 = vector.shape_cast %10 : vector<1x32x32xbf16> to vector<32x32xbf16>
    %c0_8 = arith.constant 0 : index
    %c0_9 = arith.constant 0 : index
    %c128 = arith.constant 128 : index
    %12 = vector.load %arg4[%c0_8, %c0_9, %c128] : memref<1x32x256xbf16, #tpu.memory_space<vmem>>, vector<1x32x32xbf16>
    %13 = vector.shape_cast %12 : vector<1x32x32xbf16> to vector<32x32xbf16>
    %cst = arith.constant dense<0.000000e+00> : vector<32x32xf32>
    %14 = tpu.matmul %9, %11, %cst {dimension_numbers = #tpu.dot_dimension_numbers<[1], [1], [0], [0], [0, 0, 1, 0], [], []>} : vector<32x32xbf16>, vector<32x32xbf16>, vector<32x32xf32> -> vector<32x32xf32>
    %cst_10 = arith.constant 0xFF800000 : f32
    %15 = vector.broadcast %cst_10 : f32 to vector<32x32xf32>
    %16 = arith.select %7, %14, %15 : vector<32x32xi1>, vector<32x32xf32>
    %cst_11 = arith.constant dense<0xFF800000> : vector<32xf32>
    %17 = vector.multi_reduction <maximumf>, %16, %cst_11 [1] : vector<32x32xf32> to vector<32xf32>
    %18 = vector.shape_cast %17 : vector<32xf32> to vector<32x1xf32>
    %19 = vector.broadcast %18 : vector<32x1xf32> to vector<32x32xf32>
    %20 = arith.subf %16, %19 : vector<32x32xf32>
    %21 = math.exp %20 : vector<32x32xf32>
    %cst_12 = arith.constant dense<0.000000e+00> : vector<32xf32>
    %22 = vector.multi_reduction <add>, %21, %cst_12 [1] : vector<32x32xf32> to vector<32xf32>
    %23 = vector.shape_cast %22 : vector<32xf32> to vector<32x1xf32>
    %24 = tpu.reciprocal %23 {approx = true} : vector<32x1xf32> -> vector<32x1xf32>
    %25 = vector.broadcast %24 : vector<32x1xf32> to vector<32x32xf32>
    %26 = arith.mulf %21, %25 : vector<32x32xf32>
    %27 = arith.truncf %26 : vector<32x32xf32> to vector<32x32xbf16>
    %cst_13 = arith.constant dense<0.000000e+00> : vector<32x32xf32>
    %28 = tpu.matmul %27, %13, %cst_13 {dimension_numbers = #tpu.dot_dimension_numbers<[1], [0], [0], [1], [0, 0, 1, 1], [], []>} : vector<32x32xbf16>, vector<32x32xbf16>, vector<32x32xf32> -> vector<32x32xf32>
    %29 = arith.truncf %28 : vector<32x32xf32> to vector<32x32xbf16>
    %c0_14 = arith.constant 0 : index
    %c0_15 = arith.constant 0 : index
    %30 = vector.load %arg14[%c0_14, %c0_15] : memref<32x128xbf16, #tpu.memory_space<vmem>>, vector<32x32xbf16>
    tpu.vector_store %arg14[%c0_14, %c0_15], %29 {strides = array<i32>} : memref<32x128xbf16, #tpu.memory_space<vmem>>, vector<32x32xbf16>,
    %c0_16 = arith.constant 0 : index
    %c0_17 = arith.constant 0 : index
    %c32 = arith.constant 32 : index
    %31 = vector.load %arg3[%c0_16, %c0_17, %c32] : memref<1x32x128xbf16, #tpu.memory_space<vmem>>, vector<1x32x32xbf16>
    %32 = vector.shape_cast %31 : vector<1x32x32xbf16> to vector<32x32xbf16>
    %c0_18 = arith.constant 0 : index
    %c0_19 = arith.constant 0 : index
    %c32_20 = arith.constant 32 : index
    %33 = vector.load %arg4[%c0_18, %c0_19, %c32_20] : memref<1x32x256xbf16, #tpu.memory_space<vmem>>, vector<1x32x32xbf16>
    %34 = vector.shape_cast %33 : vector<1x32x32xbf16> to vector<32x32xbf16>
    %c0_21 = arith.constant 0 : index
    %c0_22 = arith.constant 0 : index
    %c160 = arith.constant 160 : index
    %35 = vector.load %arg4[%c0_21, %c0_22, %c160] : memref<1x32x256xbf16, #tpu.memory_space<vmem>>, vector<1x32x32xbf16>
    %36 = vector.shape_cast %35 : vector<1x32x32xbf16> to vector<32x32xbf16>
    %cst_23 = arith.constant dense<0.000000e+00> : vector<32x32xf32>
    %37 = tpu.matmul %32, %34, %cst_23 {dimension_numbers = #tpu.dot_dimension_numbers<[1], [1], [0], [0], [0, 0, 1, 0], [], []>} : vector<32x32xbf16>, vector<32x32xbf16>, vector<32x32xf32> -> vector<32x32xf32>
    %cst_24 = arith.constant 0xFF800000 : f32
    %38 = vector.broadcast %cst_24 : f32 to vector<32x32xf32>
    %39 = arith.select %7, %37, %38 : vector<32x32xi1>, vector<32x32xf32>
    %cst_25 = arith.constant dense<0xFF800000> : vector<32xf32>
    %40 = vector.multi_reduction <maximumf>, %39, %cst_25 [1] : vector<32x32xf32> to vector<32xf32>
    %41 = vector.shape_cast %40 : vector<32xf32> to vector<32x1xf32>
    %42 = vector.broadcast %41 : vector<32x1xf32> to vector<32x32xf32>
    %43 = arith.subf %39, %42 : vector<32x32xf32>
    %44 = math.exp %43 : vector<32x32xf32>
    %cst_26 = arith.constant dense<0.000000e+00> : vector<32xf32>
    %45 = vector.multi_reduction <add>, %44, %cst_26 [1] : vector<32x32xf32> to vector<32xf32>
    %46 = vector.shape_cast %45 : vector<32xf32> to vector<32x1xf32>
    %47 = tpu.reciprocal %46 {approx = true} : vector<32x1xf32> -> vector<32x1xf32>
    %48 = vector.broadcast %47 : vector<32x1xf32> to vector<32x32xf32>
    %49 = arith.mulf %44, %48 : vector<32x32xf32>
    %50 = arith.truncf %49 : vector<32x32xf32> to vector<32x32xbf16>
    %cst_27 = arith.constant dense<0.000000e+00> : vector<32x32xf32>
    %51 = tpu.matmul %50, %36, %cst_27 {dimension_numbers = #tpu.dot_dimension_numbers<[1], [0], [0], [1], [0, 0, 1, 1], [], []>} : vector<32x32xbf16>, vector<32x32xbf16>, vector<32x32xf32> -> vector<32x32xf32>
    %52 = arith.truncf %51 : vector<32x32xf32> to vector<32x32xbf16>
    %c0_28 = arith.constant 0 : index
    %c32_29 = arith.constant 32 : index
    %53 = vector.load %arg14[%c0_28, %c32_29] : memref<32x128xbf16, #tpu.memory_space<vmem>>, vector<32x32xbf16>
    tpu.vector_store %arg14[%c0_28, %c32_29], %52 {strides = array<i32>} : memref<32x128xbf16, #tpu.memory_space<vmem>>, vector<32x32xbf16>,
    %c0_30 = arith.constant 0 : index
    %c0_31 = arith.constant 0 : index
    %c64 = arith.constant 64 : index
    %54 = vector.load %arg3[%c0_30, %c0_31, %c64] : memref<1x32x128xbf16, #tpu.memory_space<vmem>>, vector<1x32x32xbf16>
    %55 = vector.shape_cast %54 : vector<1x32x32xbf16> to vector<32x32xbf16>
    %c0_32 = arith.constant 0 : index
    %c0_33 = arith.constant 0 : index
    %c64_34 = arith.constant 64 : index
    %56 = vector.load %arg4[%c0_32, %c0_33, %c64_34] : memref<1x32x256xbf16, #tpu.memory_space<vmem>>, vector<1x32x32xbf16>
    %57 = vector.shape_cast %56 : vector<1x32x32xbf16> to vector<32x32xbf16>
    %c0_35 = arith.constant 0 : index
    %c0_36 = arith.constant 0 : index
    %c192 = arith.constant 192 : index
    %58 = vector.load %arg4[%c0_35, %c0_36, %c192] : memref<1x32x256xbf16, #tpu.memory_space<vmem>>, vector<1x32x32xbf16>
    %59 = vector.shape_cast %58 : vector<1x32x32xbf16> to vector<32x32xbf16>
    %cst_37 = arith.constant dense<0.000000e+00> : vector<32x32xf32>
    %60 = tpu.matmul %55, %57, %cst_37 {dimension_numbers = #tpu.dot_dimension_numbers<[1], [1], [0], [0], [0, 0, 1, 0], [], []>} : vector<32x32xbf16>, vector<32x32xbf16>, vector<32x32xf32> -> vector<32x32xf32>
    %cst_38 = arith.constant 0xFF800000 : f32
    %61 = vector.broadcast %cst_38 : f32 to vector<32x32xf32>
    %62 = arith.select %7, %60, %61 : vector<32x32xi1>, vector<32x32xf32>
    %cst_39 = arith.constant dense<0xFF800000> : vector<32xf32>
    %63 = vector.multi_reduction <maximumf>, %62, %cst_39 [1] : vector<32x32xf32> to vector<32xf32>
    %64 = vector.shape_cast %63 : vector<32xf32> to vector<32x1xf32>
    %65 = vector.broadcast %64 : vector<32x1xf32> to vector<32x32xf32>
    %66 = arith.subf %62, %65 : vector<32x32xf32>
    %67 = math.exp %66 : vector<32x32xf32>
    %cst_40 = arith.constant dense<0.000000e+00> : vector<32xf32>
    %68 = vector.multi_reduction <add>, %67, %cst_40 [1] : vector<32x32xf32> to vector<32xf32>
    %69 = vector.shape_cast %68 : vector<32xf32> to vector<32x1xf32>
    %70 = tpu.reciprocal %69 {approx = true} : vector<32x1xf32> -> vector<32x1xf32>
    %71 = vector.broadcast %70 : vector<32x1xf32> to vector<32x32xf32>
    %72 = arith.mulf %67, %71 : vector<32x32xf32>
    %73 = arith.truncf %72 : vector<32x32xf32> to vector<32x32xbf16>
    %cst_41 = arith.constant dense<0.000000e+00> : vector<32x32xf32>
    %74 = tpu.matmul %73, %59, %cst_41 {dimension_numbers = #tpu.dot_dimension_numbers<[1], [0], [0], [1], [0, 0, 1, 1], [], []>} : vector<32x32xbf16>, vector<32x32xbf16>, vector<32x32xf32> -> vector<32x32xf32>
    %75 = arith.truncf %74 : vector<32x32xf32> to vector<32x32xbf16>
    %c0_42 = arith.constant 0 : index
    %c64_43 = arith.constant 64 : index
    %76 = vector.load %arg14[%c0_42, %c64_43] : memref<32x128xbf16, #tpu.memory_space<vmem>>, vector<32x32xbf16>
    tpu.vector_store %arg14[%c0_42, %c64_43], %75 {strides = array<i32>} : memref<32x128xbf16, #tpu.memory_space<vmem>>, vector<32x32xbf16>,
    %c0_44 = arith.constant 0 : index
    %c0_45 = arith.constant 0 : index
    %c96 = arith.constant 96 : index
    %77 = vector.load %arg3[%c0_44, %c0_45, %c96] : memref<1x32x128xbf16, #tpu.memory_space<vmem>>, vector<1x32x32xbf16>
    %78 = vector.shape_cast %77 : vector<1x32x32xbf16> to vector<32x32xbf16>
    %c0_46 = arith.constant 0 : index
    %c0_47 = arith.constant 0 : index
    %c96_48 = arith.constant 96 : index
    %79 = vector.load %arg4[%c0_46, %c0_47, %c96_48] : memref<1x32x256xbf16, #tpu.memory_space<vmem>>, vector<1x32x32xbf16>
    %80 = vector.shape_cast %79 : vector<1x32x32xbf16> to vector<32x32xbf16>
    %c0_49 = arith.constant 0 : index
    %c0_50 = arith.constant 0 : index
    %c224 = arith.constant 224 : index
    %81 = vector.load %arg4[%c0_49, %c0_50, %c224] : memref<1x32x256xbf16, #tpu.memory_space<vmem>>, vector<1x32x32xbf16>
    %82 = vector.shape_cast %81 : vector<1x32x32xbf16> to vector<32x32xbf16>
    %cst_51 = arith.constant dense<0.000000e+00> : vector<32x32xf32>
    %83 = tpu.matmul %78, %80, %cst_51 {dimension_numbers = #tpu.dot_dimension_numbers<[1], [1], [0], [0], [0, 0, 1, 0], [], []>} : vector<32x32xbf16>, vector<32x32xbf16>, vector<32x32xf32> -> vector<32x32xf32>
    %cst_52 = arith.constant 0xFF800000 : f32
    %84 = vector.broadcast %cst_52 : f32 to vector<32x32xf32>
    %85 = arith.select %7, %83, %84 : vector<32x32xi1>, vector<32x32xf32>
    %cst_53 = arith.constant dense<0xFF800000> : vector<32xf32>
    %86 = vector.multi_reduction <maximumf>, %85, %cst_53 [1] : vector<32x32xf32> to vector<32xf32>
    %87 = vector.shape_cast %86 : vector<32xf32> to vector<32x1xf32>
    %88 = vector.broadcast %87 : vector<32x1xf32> to vector<32x32xf32>
    %89 = arith.subf %85, %88 : vector<32x32xf32>
    %90 = math.exp %89 : vector<32x32xf32>
    %cst_54 = arith.constant dense<0.000000e+00> : vector<32xf32>
    %91 = vector.multi_reduction <add>, %90, %cst_54 [1] : vector<32x32xf32> to vector<32xf32>
    %92 = vector.shape_cast %91 : vector<32xf32> to vector<32x1xf32>
    %93 = tpu.reciprocal %92 {approx = true} : vector<32x1xf32> -> vector<32x1xf32>
    %94 = vector.broadcast %93 : vector<32x1xf32> to vector<32x32xf32>
    %95 = arith.mulf %90, %94 : vector<32x32xf32>
    %96 = arith.truncf %95 : vector<32x32xf32> to vector<32x32xbf16>
    %cst_55 = arith.constant dense<0.000000e+00> : vector<32x32xf32>
    %97 = tpu.matmul %96, %82, %cst_55 {dimension_numbers = #tpu.dot_dimension_numbers<[1], [0], [0], [1], [0, 0, 1, 1], [], []>} : vector<32x32xbf16>, vector<32x32xbf16>, vector<32x32xf32> -> vector<32x32xf32>
    %98 = arith.truncf %97 : vector<32x32xf32> to vector<32x32xbf16>
    %c0_56 = arith.constant 0 : index
    %c96_57 = arith.constant 96 : index
    %99 = vector.load %arg14[%c0_56, %c96_57] : memref<32x128xbf16, #tpu.memory_space<vmem>>, vector<32x32xbf16>
    tpu.vector_store %arg14[%c0_56, %c96_57], %98 {strides = array<i32>} : memref<32x128xbf16, #tpu.memory_space<vmem>>, vector<32x32xbf16>,
    %c0_58 = arith.constant 0 : index
    %c0_59 = arith.constant 0 : index
    %100 = vector.load %arg14[%c0_58, %c0_59] : memref<32x128xbf16, #tpu.memory_space<vmem>>, vector<32x128xbf16>
    %c0_60 = arith.constant 0 : index
    %c0_61 = arith.constant 0 : index
    %101 = vector.load %arg5[%c0_60, %c0_61] : memref<128x128xbf16, #tpu.memory_space<vmem>>, vector<128x128xbf16>
    %cst_62 = arith.constant dense<0.000000e+00> : vector<32x128xf32>
    %102 = tpu.matmul %100, %101, %cst_62 {dimension_numbers = #tpu.dot_dimension_numbers<[1], [0], [0], [1], [0, 0, 1, 1], [], []>} : vector<32x128xbf16>, vector<128x128xbf16>, vector<32x128xf32> -> vector<32x128xf32>
    %c0_63 = arith.constant 0 : index
    %c0_64 = arith.constant 0 : index
    %103 = vector.load %arg6[%c0_63, %c0_64] : memref<1x128xf32, #tpu.memory_space<vmem>>, vector<1x128xf32>
    %104 = vector.shape_cast %103 : vector<1x128xf32> to vector<128xf32>
    %105 = vector.shape_cast %104 : vector<128xf32> to vector<1x128xf32>
    %106 = vector.broadcast %105 : vector<1x128xf32> to vector<32x128xf32>
    %107 = arith.addf %102, %106 : vector<32x128xf32>
    %108 = arith.addf %1, %107 : vector<32x128xf32>
    %c0_65 = arith.constant 0 : index
    %c0_66 = arith.constant 0 : index
    %109 = vector.load %arg7[%c0_65, %c0_66] : memref<1x128xf32, #tpu.memory_space<vmem>>, vector<1x128xf32>
    %110 = vector.shape_cast %109 : vector<1x128xf32> to vector<128xf32>
    %c0_67 = arith.constant 0 : index
    %c0_68 = arith.constant 0 : index
    %111 = vector.load %arg8[%c0_67, %c0_68] : memref<1x128xf32, #tpu.memory_space<vmem>>, vector<1x128xf32>
    %112 = vector.shape_cast %111 : vector<1x128xf32> to vector<128xf32>
    %cst_69 = arith.constant dense<0.000000e+00> : vector<32xf32>
    %113 = vector.multi_reduction <add>, %108, %cst_69 [1] : vector<32x128xf32> to vector<32xf32>
    %114 = vector.shape_cast %113 : vector<32xf32> to vector<32x1xf32>
    %cst_70 = arith.constant 1.280000e+02 : f32
    %115 = vector.broadcast %cst_70 : f32 to vector<32x1xf32>
    %116 = arith.divf %114, %115 : vector<32x1xf32>
    %117 = vector.broadcast %116 : vector<32x1xf32> to vector<32x128xf32>
    %118 = arith.subf %108, %117 : vector<32x128xf32>
    %119 = arith.mulf %118, %118 : vector<32x128xf32>
    %cst_71 = arith.constant dense<0.000000e+00> : vector<32xf32>
    %120 = vector.multi_reduction <add>, %119, %cst_71 [1] : vector<32x128xf32> to vector<32xf32>
    %121 = vector.shape_cast %120 : vector<32xf32> to vector<32x1xf32>
    %cst_72 = arith.constant 1.280000e+02 : f32
    %122 = vector.broadcast %cst_72 : f32 to vector<32x1xf32>
    %123 = arith.divf %121, %122 : vector<32x1xf32>
    %124 = vector.broadcast %116 : vector<32x1xf32> to vector<32x128xf32>
    %125 = arith.subf %108, %124 : vector<32x128xf32>
    %cst_73 = arith.constant 1.000000e-07 : f32
    %126 = vector.broadcast %cst_73 : f32 to vector<32x1xf32>
    %127 = arith.addf %123, %126 : vector<32x1xf32>
    %128 = math.rsqrt %127 : vector<32x1xf32>
    %129 = vector.broadcast %128 : vector<32x1xf32> to vector<32x128xf32>
    %130 = arith.mulf %125, %129 : vector<32x128xf32>
    %131 = vector.shape_cast %112 : vector<128xf32> to vector<1x128xf32>
    %132 = vector.broadcast %131 : vector<1x128xf32> to vector<32x128xf32>
    %133 = arith.addf %130, %132 : vector<32x128xf32>
    %134 = vector.shape_cast %110 : vector<128xf32> to vector<1x128xf32>
    %135 = vector.broadcast %134 : vector<1x128xf32> to vector<32x128xf32>
    %136 = arith.mulf %133, %135 : vector<32x128xf32>
    %137 = arith.truncf %136 : vector<32x128xf32> to vector<32x128xbf16>
    %c0_74 = arith.constant 0 : index
    %c0_75 = arith.constant 0 : index
    %138 = vector.load %arg9[%c0_74, %c0_75] : memref<128x512xbf16, #tpu.memory_space<vmem>>, vector<128x512xbf16>
    %cst_76 = arith.constant dense<0.000000e+00> : vector<32x512xf32>
    %139 = tpu.matmul %137, %138, %cst_76 {dimension_numbers = #tpu.dot_dimension_numbers<[1], [0], [0], [1], [0, 0, 1, 1], [], []>} : vector<32x128xbf16>, vector<128x512xbf16>, vector<32x512xf32> -> vector<32x512xf32>
    %c0_77 = arith.constant 0 : index
    %c0_78 = arith.constant 0 : index
    %140 = vector.load %arg10[%c0_77, %c0_78] : memref<1x512xf32, #tpu.memory_space<vmem>>, vector<1x512xf32>
    %141 = vector.shape_cast %140 : vector<1x512xf32> to vector<512xf32>
    %142 = vector.shape_cast %141 : vector<512xf32> to vector<1x512xf32>
    %143 = vector.broadcast %142 : vector<1x512xf32> to vector<32x512xf32>
    %144 = arith.addf %139, %143 : vector<32x512xf32>
    %cst_79 = arith.constant 5.000000e-01 : f32
    %145 = vector.broadcast %cst_79 : f32 to vector<32x512xf32>
    %146 = arith.mulf %145, %144 : vector<32x512xf32>
    %147 = arith.mulf %144, %144 : vector<32x512xf32>
    %148 = arith.mulf %147, %144 : vector<32x512xf32>
    %cst_80 = arith.constant 4.471500e-02 : f32
    %149 = vector.broadcast %cst_80 : f32 to vector<32x512xf32>
    %150 = arith.mulf %149, %148 : vector<32x512xf32>
    %151 = arith.addf %144, %150 : vector<32x512xf32>
    %cst_81 = arith.constant 0.797884583 : f32
    %152 = vector.broadcast %cst_81 : f32 to vector<32x512xf32>
    %153 = arith.mulf %152, %151 : vector<32x512xf32>
    %154 = math.tanh %153 : vector<32x512xf32>
    %cst_82 = arith.constant 1.000000e+00 : f32
    %155 = vector.broadcast %cst_82 : f32 to vector<32x512xf32>
    %156 = arith.addf %155, %154 : vector<32x512xf32>
    %157 = arith.mulf %146, %156 : vector<32x512xf32>
    %158 = arith.truncf %157 : vector<32x512xf32> to vector<32x512xbf16>
    %c0_83 = arith.constant 0 : index
    %c0_84 = arith.constant 0 : index
    %159 = vector.load %arg11[%c0_83, %c0_84] : memref<512x128xbf16, #tpu.memory_space<vmem>>, vector<512x128xbf16>
    %cst_85 = arith.constant dense<0.000000e+00> : vector<32x128xf32>
    %160 = tpu.matmul %158, %159, %cst_85 {dimension_numbers = #tpu.dot_dimension_numbers<[1], [0], [0], [1], [0, 0, 1, 1], [], []>} : vector<32x512xbf16>, vector<512x128xbf16>, vector<32x128xf32> -> vector<32x128xf32>
    %c0_86 = arith.constant 0 : index
    %c0_87 = arith.constant 0 : index
    %161 = vector.load %arg12[%c0_86, %c0_87] : memref<1x128xf32, #tpu.memory_space<vmem>>, vector<1x128xf32>
    %162 = vector.shape_cast %161 : vector<1x128xf32> to vector<128xf32>
    %163 = vector.shape_cast %162 : vector<128xf32> to vector<1x128xf32>
    %164 = vector.broadcast %163 : vector<1x128xf32> to vector<32x128xf32>
    %165 = arith.addf %160, %164 : vector<32x128xf32>
    %166 = arith.addf %108, %165 : vector<32x128xf32>
    %c0_88 = arith.constant 0 : index
    %c0_89 = arith.constant 0 : index
    %c0_90 = arith.constant 0 : index
    %167 = vector.load %arg13[%c0_88, %c0_89, %c0_90] : memref<1x32x128xf32, #tpu.memory_space<vmem>>, vector<1x32x128xf32>
    %168 = vector.shape_cast %167 : vector<1x32x128xf32> to vector<32x128xf32>
    %169 = vector.shape_cast %166 : vector<32x128xf32> to vector<1x32x128xf32>
    tpu.vector_store %arg13[%c0_88, %c0_89, %c0_90], %169 {strides = array<i32>} : memref<1x32x128xf32, #tpu.memory_space<vmem>>, vector<1x32x128xf32>,
    return
  }
  func.func @transform_0(%arg0: i32, %arg1: i32) -> (i32, i32, i32) {
    %c0_i32 = arith.constant 0 : i32
    %c0_i32_0 = arith.constant 0 : i32
    return %arg0, %arg1, %c0_i32 : i32, i32, i32
  }
  func.func @transform_1(%arg0: i32, %arg1: i32) -> (i32, i32, i32) {
    %c0_i32 = arith.constant 0 : i32
    %c0_i32_0 = arith.constant 0 : i32
    return %arg0, %arg1, %c0_i32 : i32, i32, i32
  }
  func.func @transform_2(%arg0: i32, %arg1: i32) -> (i32, i32, i32) {
    %c0_i32 = arith.constant 0 : i32
    %c0_i32_0 = arith.constant 0 : i32
    %c0_i32_1 = arith.constant 0 : i32
    return %arg0, %c0_i32, %c0_i32_0 : i32, i32, i32
  }
  func.func @transform_3(%arg0: i32, %arg1: i32) -> (i32, i32) {
    %c0_i32 = arith.constant 0 : i32
    %c0_i32_0 = arith.constant 0 : i32
    %c0_i32_1 = arith.constant 0 : i32
    return %c0_i32, %c0_i32_0 : i32, i32
  }
  func.func @transform_4(%arg0: i32, %arg1: i32) -> (i32, i32) {
    %c0_i32 = arith.constant 0 : i32
    %c0_i32_0 = arith.constant 0 : i32
    %c0_i32_1 = arith.constant 0 : i32
    return %c0_i32, %c0_i32_0 : i32, i32
  }
  func.func @transform_5(%arg0: i32, %arg1: i32) -> (i32, i32) {
    %c0_i32 = arith.constant 0 : i32
    %c0_i32_0 = arith.constant 0 : i32
    %c0_i32_1 = arith.constant 0 : i32
    return %c0_i32, %c0_i32_0 : i32, i32
  }
  func.func @transform_6(%arg0: i32, %arg1: i32) -> (i32, i32) {
    %c0_i32 = arith.constant 0 : i32
    %c0_i32_0 = arith.constant 0 : i32
    %c0_i32_1 = arith.constant 0 : i32
    return %c0_i32, %c0_i32_0 : i32, i32
  }
  func.func @transform_7(%arg0: i32, %arg1: i32) -> (i32, i32) {
    %c0_i32 = arith.constant 0 : i32
    %c0_i32_0 = arith.constant 0 : i32
    %c0_i32_1 = arith.constant 0 : i32
    return %c0_i32, %c0_i32_0 : i32, i32
  }
  func.func @transform_8(%arg0: i32, %arg1: i32) -> (i32, i32) {
    %c0_i32 = arith.constant 0 : i32
    %c0_i32_0 = arith.constant 0 : i32
    %c0_i32_1 = arith.constant 0 : i32
    return %c0_i32, %c0_i32_0 : i32, i32
  }
  func.func @transform_9(%arg0: i32, %arg1: i32) -> (i32, i32) {
    %c0_i32 = arith.constant 0 : i32
    %c0_i32_0 = arith.constant 0 : i32
    %c0_i32_1 = arith.constant 0 : i32
    return %c0_i32, %c0_i32_0 : i32, i32
  }
  func.func @transform_10(%arg0: i32, %arg1: i32) -> (i32, i32) {
    %c0_i32 = arith.constant 0 : i32
    %c0_i32_0 = arith.constant 0 : i32
    %c0_i32_1 = arith.constant 0 : i32
    return %c0_i32, %c0_i32_0 : i32, i32
  }
  func.func @transform_11(%arg0: i32, %arg1: i32) -> (i32, i32, i32) {
    %c0_i32 = arith.constant 0 : i32
    %c0_i32_0 = arith.constant 0 : i32
    return %arg0, %arg1, %c0_i32 : i32, i32, i32
  }
}

module attributes {stable_mosaic.version = 11 : i64} {
  func.func @lm_head_kernel(%arg0: i32, %arg1: i32, %arg2: i32, %arg3: memref<1x32x128xbf16, #tpu.memory_space<vmem>>, %arg4: memref<128x512xbf16, #tpu.memory_space<vmem>>, %arg5: memref<1x512xf32, #tpu.memory_space<vmem>>, %arg6: memref<1x32x512xf32, #tpu.memory_space<vmem>>) attributes {dimension_semantics = [#tpu.dimension_semantics<parallel>, #tpu.dimension_semantics<parallel>, #tpu.dimension_semantics<parallel>], iteration_bounds = array<i64: 1, 2, 1>, scalar_prefetch = 0 : i64, scratch_operands = 0 : i64, tpu.core_type = #tpu.core_type<tc>, window_params = [{transform_indices = @transform_0, window_bounds = array<i64: 1, 32, 128>}, {transform_indices = @transform_1, window_bounds = array<i64: 128, 512>}, {transform_indices = @transform_2, window_bounds = array<i64: 1, 512>}, {transform_indices = @transform_3, window_bounds = array<i64: 1, 32, 512>}]} {
    %c0 = arith.constant 0 : index
    %c0_0 = arith.constant 0 : index
    %c0_1 = arith.constant 0 : index
    %0 = vector.load %arg3[%c0, %c0_0, %c0_1] : memref<1x32x128xbf16, #tpu.memory_space<vmem>>, vector<1x32x128xbf16>
    %1 = vector.shape_cast %0 : vector<1x32x128xbf16> to vector<32x128xbf16>
    %c0_2 = arith.constant 0 : index
    %c0_3 = arith.constant 0 : index
    %2 = vector.load %arg4[%c0_2, %c0_3] : memref<128x512xbf16, #tpu.memory_space<vmem>>, vector<128x512xbf16>
    %cst = arith.constant dense<0.000000e+00> : vector<32x512xf32>
    %3 = tpu.matmul %1, %2, %cst {dimension_numbers = #tpu.dot_dimension_numbers<[1], [0], [0], [1], [0, 0, 1, 1], [], []>} : vector<32x128xbf16>, vector<128x512xbf16>, vector<32x512xf32> -> vector<32x512xf32>
    %c0_4 = arith.constant 0 : index
    %c0_5 = arith.constant 0 : index
    %4 = vector.load %arg5[%c0_4, %c0_5] : memref<1x512xf32, #tpu.memory_space<vmem>>, vector<1x512xf32>
    %5 = vector.shape_cast %4 : vector<1x512xf32> to vector<512xf32>
    %6 = vector.shape_cast %5 : vector<512xf32> to vector<1x512xf32>
    %7 = vector.broadcast %6 : vector<1x512xf32> to vector<32x512xf32>
    %8 = arith.addf %3, %7 : vector<32x512xf32>
    %c0_6 = arith.constant 0 : index
    %c0_7 = arith.constant 0 : index
    %c0_8 = arith.constant 0 : index
    %9 = vector.load %arg6[%c0_6, %c0_7, %c0_8] : memref<1x32x512xf32, #tpu.memory_space<vmem>>, vector<1x32x512xf32>
    %10 = vector.shape_cast %9 : vector<1x32x512xf32> to vector<32x512xf32>
    %11 = vector.shape_cast %8 : vector<32x512xf32> to vector<1x32x512xf32>
    tpu.vector_store %arg6[%c0_6, %c0_7, %c0_8], %11 {strides = array<i32>} : memref<1x32x512xf32, #tpu.memory_space<vmem>>, vector<1x32x512xf32>,
    return
  }
  func.func @transform_0(%arg0: i32, %arg1: i32, %arg2: i32) -> (i32, i32, i32) {
    %c0_i32 = arith.constant 0 : i32
    %c0_i32_0 = arith.constant 0 : i32
    return %arg1, %arg2, %c0_i32 : i32, i32, i32
  }
  func.func @transform_1(%arg0: i32, %arg1: i32, %arg2: i32) -> (i32, i32) {
    %c0_i32 = arith.constant 0 : i32
    %c0_i32_0 = arith.constant 0 : i32
    return %c0_i32, %arg0 : i32, i32
  }
  func.func @transform_2(%arg0: i32, %arg1: i32, %arg2: i32) -> (i32, i32) {
    %c0_i32 = arith.constant 0 : i32
    %c0_i32_0 = arith.constant 0 : i32
    return %c0_i32, %arg0 : i32, i32
  }
  func.func @transform_3(%arg0: i32, %arg1: i32, %arg2: i32) -> (i32, i32, i32) {
    %c0_i32 = arith.constant 0 : i32
    return %arg1, %arg2, %arg0 : i32, i32, i32
  }
}

</mosaic_0001>

<bundles_post_ra>
// kernel: tpu_custom_call.1
= control target key start
LH: loop header
LB: loop body
LE: loop exit
PB: predicated region body
PF: predicated region fallthrough
CT: control target
= control target key end

     0   :  { %6 = vsyncpa [#allocation3], 0  ;;  %s287_s0 = inlined_call_operand.hbm [shape: f32[8,128], index: 0, kind: input, shape index: {}]   ;;  %s288_s1 = inlined_call_operand.hbm [shape: f32[8,128], index: 1, kind: output, shape index: {}]  }
   0x1   :  { %7 = vsyncpa [#allocation4], 0  ;;  %s270_s6 = smov 0  }
   0x2 LB: > { %s149_s7 = sadd.s32 4294967295, %s256_s6   ;;  %p150_p0 = scmp.ge.s32.totalorder %s256_s6, 1  ;;  %s256_s6 = sphi %s270_s6, %s13_s6  }
   0x3   : > { %p60_p1 = scmp.lt.s32.totalorder %s256_s6, 3  ;;  %s72_s10 = sshll.u32 %s287_s0, 4  ;;  %s73_s10 = int_to_ptr.hbm [resolvable:$true] %s72_s10 }
   0x4   : > { %p170_p3 = scmp.eq.s32.totalorder %s149_s7, 0  ;;  %s258_s11 = smov [#allocation2]  }
   0x5   : > { %p61_p2 = pnand %p150_p0, %p60_p1  ;;  %s74_s12 = sshll.u32 %s258_s11, 4  ;;  %s75_s12 = int_to_ptr.vmem [resolvable:$true] %s74_s12 }
   0x7   : > { %p166_p4 = pneg %p61_p2  ;;  %87 = sbr.rel (%p61_p2) target bundleno = 20 (0x14), region = 24 }
   0x9   : > { %p167_p5 = pnand %p170_p3, %p166_p4 }
   0xb   : > { %169 = dma.hbm_to_vmem [thread:$0]  (!%p167_p5), %s73_s10, 128, %s75_s12, [#allocation3]  }
   0xc   : > { %247 = dma.done.wait (%p170_p3), [#allocation3], 128  }
   0xd   : > { %249 = vsyncadd (%p170_p3), [#allocation3], 4294967168  ;;  %s259_s13 = smov [#allocation5]   ;;  %s109_s17 = sshll.u32 %s288_s1, 4  ;;  %v98_v0 = vld [vmem:[#allocation2] sm:$0xff]  ;;  %s110_s17 = int_to_ptr.hbm [resolvable:$true] %s109_s17 }
   0xe   : > { %s107_s14 = sshll.u32 %s259_s13, 4  ;;  %p172_p6 = scmp.eq.s32.totalorder %s149_s7, 1  ;;  %v99_v1 = vadd.f32 1.0, %v98_v0  ;;  %s108_s14 = int_to_ptr.vmem [resolvable:$true] %s107_s14 }
  0x10   : > { %100 = vst [vmem:[#allocation5] sm:$0xff] %v99_v1 }
  0x11   : > { %163 = dma.vmem_to_hbm [thread:$0]  (%p172_p6), %s108_s14, 128, %s110_s17, [#allocation4]  }
  0x12   : > { %251 = dma.done.wait (%p172_p6), [#allocation4], 128  }
  0x13   : > { %253 = vsyncadd (%p172_p6), [#allocation4], 4294967168 }
  0x14 PF: > { %s13_s6 = sadd.s32 1, %s256_s6  }
  0x15   : > { %p10_p7 = scmp.ge.s32.totalorder %s13_s6, 4  }
  0x17   :  { %12 = sbr.rel (!%p10_p7) target bundleno = 2 (0x2), region = 53 }
  0x1c   :  { %123 = vsyncpa [#allocation3], 1 }
  0x1d   :  { %125 = vsyncpa [#allocation3 + $0x1], 1 }
  0x1e   :  { %126 = vsyncpa [#allocation4], 1 }
  0x1f   :  { %128 = vsyncpa [#allocation4 + $0x1], 1 }

// kernel: gpt_forward.10
= control target key start
LH: loop header
LB: loop body
LE: loop exit
PB: predicated region body
PF: predicated region fallthrough
CT: control target
= control target key end

     0   :  { %s518_s12 = smov 0   ;;  %s520_s13 = smov 0   ;;  %s581_s0 = inlined_call_operand.vmem [shape: f32[2,32,128], index: 0, kind: input, shape index: {}]   ;;  %s582_s1 = inlined_call_operand.vmem [shape: f32[1,128], index: 1, kind: input, shape index: {}]   ;;  %s583_s2 = inlined_call_operand.vmem [shape: f32[1,128], index: 2, kind: input, shape index: {}]   ;;  %s584_s3 = inlined_call_operand.vmem [shape: bf16[2,32,128], index: 3, kind: output, shape index: {}]  }
   0x1   :  { %s522_s14 = smov 0  }
   0x2 LB: > { %s25_s15 = sadd.s32 1, %s491_s13  ;;  %p416_p0 = scmp.ge.s32.totalorder %s495_s14, 1  ;;  %s495_s14 = sphi %s522_s14, %s13_s14   ;;  %s491_s13 = sphi %s520_s13, %s586_s13   ;;  %s487_s12 = sphi %s518_s12, %s585_s12  }
   0x3   : > { %p27_p1 = scmp.ge.s32.totalorder %s25_s15, 2  ;;  %p158_p2 = scmp.lt.s32.totalorder %s495_s14, 3 }
   0x5   : > { %s588_s15 = smov (%p27_p1, %s25_s15), 0  ;;  %p159_p3 = pnand %p416_p0, %p158_p2 }
   0x6   : > { %p191_p4 = scmp.lt.s32.totalorder (!%p159_p3), %s487_s12, 1 }
   0x7   : > { %162 = sbr.rel (%p159_p3) target bundleno = 294 (0x126), region = 32 }
   0xc   : > { %s590_s12 = smov (!%p191_p4, %s487_s12), 1  ;;  %v497_v4 = vmov 128.0   ;;  %v461_v62 = vld [vmem:[%s583_s2] ss:$0 sm:$0xff] }
   0xd   : > { %s423_s16 = sshll.u32 %s590_s12, 5  ;;  %463 = vrcp.f32 %v497_v4  ;;  %s424_s24 = sshll.u32 %s590_s12, 4 }
   0xe   : > { %s198_s19 = scalar_lea.vmem %s581_s0, %s423_s16  ;;  %s208_s27 = scalar_lea.vmem %s584_s3, %s424_s24 }
   0xf   : > { %v212_v0 = vld [vmem:[%s198_s19 + $0x10] sm:$0xff]  ;;  %v210_v1 = vld [vmem:[%s198_s19] sm:$0xff]  ;;  %v213_v2 = vld [vmem:[%s198_s19 + $0x18] sm:$0xff] }
  0x10   : > { %220 = vadd.xlane.f32.xlu1 %v212_v0  ;;  %216 = vadd.xlane.f32.xlu0 %v210_v1  ;;  %v211_v3 = vld [vmem:[%s198_s19 + $0x8] sm:$0xff] }
  0x13   : > { %v464_v5 = vpop.eup %463 }
  0x14   : > { %v225_v6 = vmul.f32 128.0, %v464_v5  ;;  %vm229_vm0 = vweird.f32 %v464_v5 }
  0x16   : > { %v226_v7 = vsub.f32 1.0, %v225_v6 }
  0x18   : > { %222 = vadd.xlane.f32.xlu1 %v213_v2  ;;  %218 = vadd.xlane.f32.xlu0 %v211_v3  ;;  %v227_v8 = vmul.f32 %v464_v5, %v226_v7 }
  0x1a   : > { %v228_v9 = vadd.f32 %v464_v5, %v227_v8 }
  0x1c   : > { %v230_v10 = vsel %vm229_vm0, %v464_v5, %v228_v9  ;;  %v462_v5 = vld [vmem:[%s582_s1] ss:$0 sm:$0xff] }
  0x83   : > { %v221_v11 = vpop.xlane.xlu1 %220  ;;  %v217_v12 = vpop.xlane.xlu0 %216 }
  0x84   : > { %v233_v13 = vmul.f32 %v230_v10, %v221_v11  ;;  %v231_v14 = vmul.f32 %v230_v10, %v217_v12 }
  0x86   : > { %v542_v15 = vsub.f32 %v212_v0, %v233_v13  ;;  %v544_v16 = vsub.f32 %v210_v1, %v231_v14 }
  0x88   : > { %v241_v17 = vmul.f32 %v542_v15, %v542_v15  ;;  %v239_v18 = vmul.f32 %v544_v16, %v544_v16 }
  0x8a   : > { %247 = vadd.xlane.f32.xlu0 %v241_v17  ;;  %243 = vadd.xlane.f32.xlu2 %v239_v18 }
  0x8b   : > { %v223_v19 = vpop.xlane.xlu1 %222  ;;  %v219_v20 = vpop.xlane.xlu0 %218 }
  0x8c   : > { %v234_v21 = vmul.f32 %v230_v10, %v223_v19  ;;  %v232_v22 = vmul.f32 %v230_v10, %v219_v20 }
  0x8e   : > { %v550_v23 = vsub.f32 %v213_v2, %v234_v21  ;;  %v552_v24 = vsub.f32 %v211_v3, %v232_v22 }
  0x90   : > { %v242_v25 = vmul.f32 %v550_v23, %v550_v23  ;;  %v240_v26 = vmul.f32 %v552_v24, %v552_v24 }
  0x92   : > { %249 = vadd.xlane.f32.xlu1 %v242_v25  ;;  %245 = vadd.xlane.f32.xlu2 %v240_v26 }
  0xfd   : > { %v244_v27 = vpop.xlane.xlu2 %243  ;;  %v248_v28 = vpop.xlane.xlu0 %247 }
  0xfe   : > { %v251_v29 = vmul.f32 %v244_v27, %v230_v10  ;;  %v253_v30 = vmul.f32 %v248_v28, %v230_v10 }
 0x100   : > { %v255_v31 = vadd.f32 1e-07, %v251_v29  ;;  %v257_v32 = vadd.f32 1e-07, %v253_v30 }
 0x102   : > { %465 = vrsqrt.f32 %v255_v31  ;;  %vm285_vm3 = vweird.f32 %v257_v32  ;;  %vm265_vm4 = vweird.f32 %v255_v31 }
 0x103   : > { %467 = vrsqrt.f32 %v257_v32 }
 0x105   : > { %v250_v33 = vpop.xlane.xlu1 %249  ;;  %v246_v34 = vpop.xlane.xlu2 %245 }
 0x106   : > { %v254_v35 = vmul.f32 %v250_v33, %v230_v10  ;;  %v252_v36 = vmul.f32 %v246_v34, %v230_v10 }
 0x108   : > { %v466_v37 = vpop.eup %465  ;;  %v258_v38 = vadd.f32 1e-07, %v254_v35  ;;  %v256_v39 = vadd.f32 1e-07, %v252_v36 }
 0x109   : > { %v468_v40 = vpop.eup %467  ;;  %v260_v41 = vmul.f32 %v466_v37, %v255_v31  ;;  %vm266_vm2 = vweird.f32 %v466_v37 }
 0x10a   : > { %v280_v42 = vmul.f32 %v468_v40, %v257_v32  ;;  %469 = vrsqrt.f32 %v258_v38  ;;  %vm286_vm1 = vweird.f32 %v468_v40  ;;  %vm267_vm6 = vmor %vm265_vm4, %vm266_vm2  ;;  %vm295_vm9 = vweird.f32 %v258_v38 }
 0x10b   : > { %v261_v43 = vmul.f32 %v466_v37, %v260_v41  ;;  %471 = vrsqrt.f32 %v256_v39  ;;  %vm287_vm5 = vmor %vm285_vm3, %vm286_vm1  ;;  %vm275_vm11 = vweird.f32 %v256_v39 }
 0x10c   : > { %v281_v44 = vmul.f32 %v468_v40, %v280_v42 }
 0x10d   : > { %v262_v45 = vmul.f32 0.5, %v261_v43 }
 0x10e   : > { %v282_v46 = vmul.f32 0.5, %v281_v44 }
 0x10f   : > { %v263_v47 = vsub.f32 1.5, %v262_v45 }
 0x110   : > { %v470_v48 = vpop.eup %469  ;;  %v283_v49 = vsub.f32 1.5, %v282_v46 }
 0x111   : > { %v472_v50 = vpop.eup %471  ;;  %v290_v51 = vmul.f32 %v470_v48, %v258_v38  ;;  %v264_v52 = vmul.f32 %v466_v37, %v263_v47  ;;  %vm296_vm7 = vweird.f32 %v470_v48 }
 0x112   : > { %v284_v53 = vmul.f32 %v468_v40, %v283_v49  ;;  %v270_v54 = vmul.f32 %v472_v50, %v256_v39  ;;  %vm276_vm8 = vweird.f32 %v472_v50  ;;  %vm297_vm10 = vmor %vm295_vm9, %vm296_vm7 }
 0x113   : > { %v291_v55 = vmul.f32 %v470_v48, %v290_v51  ;;  %v268_v59 = vsel %vm267_vm6, %v466_v37, %v264_v52  ;;  %vm277_vm12 = vmor %vm275_vm11, %vm276_vm8 }
 0x114   : > { %v271_v56 = vmul.f32 %v472_v50, %v270_v54  ;;  %v288_v57 = vsel %vm287_vm5, %v468_v40, %v284_v53  ;;  %v299_v1 = vmul.f32 %v268_v59, %v544_v16 }
 0x115   : > { %v292_v58 = vmul.f32 0.5, %v291_v55  ;;  %v301_v63 = vmul.f32 %v288_v57, %v542_v15 }
 0x116   : > { %v272_v60 = vmul.f32 0.5, %v271_v56  ;;  %v306_v9 = vadd.f32 %v461_v62, %v299_v1 }
 0x117   : > { %v293_v61 = vsub.f32 1.5, %v292_v58  ;;  %v308_v6 = vadd.f32 %v461_v62, %v301_v63 }
 0x118   : > { %v273_v0 = vsub.f32 1.5, %v272_v60  ;;  %v313_v15 = vmul.f32 %v462_v5, %v306_v9 }
 0x119   : > { %v294_v2 = vmul.f32 %v470_v48, %v293_v61  ;;  %v315_v13 = vmul.f32 %v462_v5, %v308_v6 }
 0x11a   : > { %v274_v3 = vmul.f32 %v472_v50, %v273_v0 }
 0x11b   : > { %v298_v4 = vsel %vm297_vm10, %v470_v48, %v294_v2 }
 0x11c   : > { %v302_v7 = vmul.f32 %v298_v4, %v550_v23  ;;  %v278_v8 = vsel %vm277_vm12, %v472_v50, %v274_v3 }
 0x11d   : > { %v300_v10 = vmul.f32 %v278_v8, %v552_v24 }
 0x11e   : > { %v309_v11 = vadd.f32 %v461_v62, %v302_v7 }
 0x11f   : > { %v307_v12 = vadd.f32 %v461_v62, %v300_v10 }
 0x120   : > { %v316_v14 = vmul.f32 %v462_v5, %v309_v11 }
 0x121   : > { %v314_v16 = vmul.f32 %v462_v5, %v307_v12 }
 0x122   : > { %v433_v17 = vpack.c.bf16 %v316_v14, %v315_v13 }
 0x123   : > { %v428_v18 = vpack.c.bf16 %v314_v16, %v313_v15 }
 0x124   : > { %435 = vst [vmem:[%s208_s27 + $0x8] sm:$0xff] %v433_v17  }
 0x125   : > { %429 = vst [vmem:[%s208_s27] sm:$0xff] %v428_v18  }
 0x126 PF: > { %s13_s14 = sadd.s32 1, %s495_s14   ;;  %s585_s12 = smov %s491_s13 }
 0x127   : > { %p10_p5 = scmp.ge.s32.totalorder %s13_s14, 4   ;;  %s586_s13 = smov %s588_s15 }
 0x129   :  { %12 = sbr.rel (!%p10_p5) target bundleno = 2 (0x2), region = 62 }

// kernel: gpt_forward.6
= control target key start
LH: loop header
LB: loop body
LE: loop exit
PB: predicated region body
PF: predicated region fallthrough
CT: control target
= control target key end

     0   :  { %11 = vsyncpa [#allocation3], 0  ;;  %s1107_s18 = smov 0   ;;  %s1109_s19 = smov 0   ;;  %s1191_s0 = inlined_call_operand.vmem [shape: f32[2,32,128], index: 0, kind: input, shape index: {}]   ;;  %s1192_s1 = inlined_call_operand.vmem [shape: f32[1,128], index: 1, kind: input, shape index: {}]   ;;  %s1193_s2 = inlined_call_operand.vmem [shape: f32[1,128], index: 2, kind: input, shape index: {}]   ;;  %s1194_s3 = inlined_call_operand.hbm [shape: bf16[128,384], index: 3, kind: input, shape index: {}]   ;;  %s1195_s4 = inlined_call_operand.vmem [shape: bf16[2,32,128], index: 4, kind: output, shape index: {0}]   ;;  %s1196_s5 = inlined_call_operand.vmem [shape: bf16[2,32,256], index: 5, kind: output, shape index: {1}]  }
   0x1   :  { %s1111_s20 = smov 0  }
   0x2 LB: > { %s808_s21 = sadd.s32 4294967295, %s1071_s20   ;;  %s29_s22 = sadd.s32 1, %s1067_s19  ;;  %s1071_s20 = sphi %s1111_s20, %s17_s20   ;;  %s1067_s19 = sphi %s1109_s19, %s1198_s19   ;;  %s1063_s18 = sphi %s1107_s18, %s1197_s18  }
   0x3   : > { %p31_p0 = scmp.ge.s32.totalorder %s29_s22, 2  ;;  %p810_p1 = scmp.ge.s32.totalorder %s1071_s20, 1 }
   0x4   : > { %p181_p2 = scmp.lt.s32.totalorder %s1071_s20, 3  ;;  %p973_p4 = scmp.eq.s32.totalorder %s808_s21, 0 }
   0x5   : > { %s1200_s22 = smov (%p31_p0, %s29_s22), 0  ;;  %s198_s25 = sshll.u32 %s1194_s3, 4  ;;  %s199_s25 = int_to_ptr.hbm [resolvable:$true] %s198_s25 }
   0x6   : > { %p182_p3 = pnand %p810_p1, %p181_p2  ;;  %s1073_s26 = smov [#allocation2]  }
   0x7   : > { %s200_s27 = sshll.u32 %s1073_s26, 4  ;;  %s1074_s28 = smov 192   ;;  %s201_s27 = int_to_ptr.vmem [resolvable:$true] %s200_s27 }
   0x8   : > { %p969_p5 = pneg %p182_p3  ;;  %s1075_s29 = smov 12  }
   0x9   : > { %229 = sbr.rel (%p182_p3) target bundleno = 458 (0x1ca), region = 36 }
   0xa   : > { %p970_p6 = pnand %p973_p4, %p969_p5 }
   0xc   : > { %972 = dma.hbm_to_vmem [thread:$0]  (!%p970_p6), %s199_s25, 3072, %s201_s27, [#allocation3], %s1074_s28, %s1074_s28, %s1075_s29  }
   0xe   : > { %1058 = dma.done.wait (%p973_p4), [#allocation3], 3072  }
   0xf   : > { %1060 = vsyncadd (%p973_p4), [#allocation3], 4294964224  ;;  %p277_p7 = scmp.lt.s32.totalorder %s1063_s18, 1  ;;  %v1076_v4 = vmov 128.0   ;;  %v907_v27 = vld [vmem:[#allocation2 + $0xa8] sm:$0xf] }
  0x10   : > { %1005 = vrcp.f32 %v1076_v4  ;;  %v944_v28 = vld [vmem:[#allocation2 + $0xb0] sm:$0xf0]  ;;  %v943_v29 = vld [vmem:[#allocation2 + $0xac] sm:$0xf]  ;;  %v909_v31 = vld [vmem:[#allocation2 + $0xb4] sm:$0xf0] }
  0x11   : > { %s1202_s18 = smov (!%p277_p7, %s1063_s18), 1  ;;  %v908_v30 = vor.u32 %v944_v28, %v907_v27  ;;  %v915_v32 = vld [vmem:[#allocation2 + $0xb0] sm:$0xf]  ;;  %v945_v33 = vld [vmem:[#allocation2 + $0xb8] sm:$0xf0]  ;;  %v912_v34 = vor.u32 %v943_v29, %v909_v31 }
  0x12   : > { %s919_s30 = sshll.u32 %s1202_s18, 5  ;;  %v916_v35 = vor.u32 %v945_v33, %v915_v32  ;;  %v895_v36 = vld [vmem:[#allocation2 + $0x90] sm:$0xf]  ;;  %v941_v37 = vld [vmem:[#allocation2 + $0x98] sm:$0xf0]  ;;  %s920_s16 = sshll.u32 %s1202_s18, 4 }
  0x13   : > { %s284_s8 = scalar_lea.vmem %s1191_s0, %s919_s30  ;;  %576 = vmatpush.bf16.msra.mxu0 %v908_v30  ;;  %957 = vmatpush.bf16.msra.mxu3 %v908_v30  ;;  %v940_v38 = vld [vmem:[#allocation2 + $0x94] sm:$0xf]  ;;  %v896_v39 = vor.u32 %v941_v37, %v895_v36  ;;  %v897_v40 = vld [vmem:[#allocation2 + $0x9c] sm:$0xf0]  ;;  %v903_v41 = vld [vmem:[#allocation2 + $0x98] sm:$0xf]  ;;  %s305_s15 = scalar_lea.vmem %s1196_s5, %s919_s30 }
  0x14   : > { %v309_v0 = vld [vmem:[%s284_s8 + $0x10] sm:$0xff]  ;;  %v307_v1 = vld [vmem:[%s284_s8] sm:$0xff]  ;;  %v310_v2 = vld [vmem:[%s284_s8 + $0x18] sm:$0xff]  ;;  %595 = vmatpush.bf16.msra.mxu1 %v912_v34  ;;  %614 = vmatpush.bf16.msra.mxu2 %v916_v35  ;;  %v900_v43 = vor.u32 %v940_v38, %v897_v40  ;;  %s294_s23 = scalar_lea.vmem %s1195_s4, %s920_s16 }
  0x15   : > { %317 = vadd.xlane.f32.xlu1 %v309_v0  ;;  %313 = vadd.xlane.f32.xlu0 %v307_v1  ;;  %v308_v3 = vld [vmem:[%s284_s8 + $0x8] sm:$0xff]  ;;  %v942_v42 = vld [vmem:[#allocation2 + $0xa0] sm:$0xf0]  ;;  %v883_v45 = vld [vmem:[#allocation2 + $0x78] sm:$0xf] }
  0x16   : > { %v1006_v5 = vpop.eup %1005  ;;  %v904_v44 = vor.u32 %v942_v42, %v903_v41  ;;  %v938_v46 = vld [vmem:[#allocation2 + $0x80] sm:$0xf0]  ;;  %v937_v47 = vld [vmem:[#allocation2 + $0x7c] sm:$0xf]  ;;  %v885_v49 = vld [vmem:[#allocation2 + $0x84] sm:$0xf0] }
  0x17   : > { %v322_v6 = vmul.f32 128.0, %v1006_v5  ;;  %vm326_vm0 = vweird.f32 %v1006_v5  ;;  %577 = vmatpush.bf16.msra.mxu0 %v896_v39  ;;  %958 = vmatpush.bf16.msra.mxu3 %v896_v39  ;;  %v884_v48 = vor.u32 %v938_v46, %v883_v45  ;;  %v891_v50 = vld [vmem:[#allocation2 + $0x80] sm:$0xf]  ;;  %v939_v51 = vld [vmem:[#allocation2 + $0x88] sm:$0xf0]  ;;  %v888_v52 = vor.u32 %v937_v47, %v885_v49 }
  0x18   : > { %596 = vmatpush.bf16.msra.mxu1 %v900_v43  ;;  %615 = vmatpush.bf16.msra.mxu2 %v904_v44  ;;  %v892_v53 = vor.u32 %v939_v51, %v891_v50  ;;  %v871_v54 = vld [vmem:[#allocation2 + $0x60] sm:$0xf]  ;;  %v935_v55 = vld [vmem:[#allocation2 + $0x68] sm:$0xf0]  ;;  %v934_v56 = vld [vmem:[#allocation2 + $0x64] sm:$0xf] }
  0x19   : > { %v323_v7 = vsub.f32 1.0, %v322_v6  ;;  %v872_v57 = vor.u32 %v935_v55, %v871_v54  ;;  %v873_v58 = vld [vmem:[#allocation2 + $0x6c] sm:$0xf0]  ;;  %v879_v59 = vld [vmem:[#allocation2 + $0x68] sm:$0xf] }
  0x1a   : > { %v936_v60 = vld [vmem:[#allocation2 + $0x70] sm:$0xf0]  ;;  %v876_v61 = vor.u32 %v934_v56, %v873_v58  ;;  %v859_v63 = vld [vmem:[#allocation2 + $0x48] sm:$0xf]  ;;  %v867_v4 = vld [vmem:[#allocation2 + $0x50] sm:$0xf] }
  0x1b   : > { %v324_v8 = vmul.f32 %v1006_v5, %v323_v7  ;;  %578 = vmatpush.bf16.msra.mxu0 %v884_v48  ;;  %959 = vmatpush.bf16.msra.mxu3 %v884_v48  ;;  %v880_v62 = vor.u32 %v936_v60, %v879_v59  ;;  %v843_v27 = vld [vmem:[#allocation2 + $0x20] sm:$0xf]  ;;  %v927_v28 = vld [vmem:[#allocation2 + $0x28] sm:$0xf0]  ;;  %v922_v35 = vld [vmem:[#allocation2 + $0x4] sm:$0xf] }
  0x1c   : > { %597 = vmatpush.bf16.msra.mxu1 %v888_v52  ;;  %616 = vmatpush.bf16.msra.mxu2 %v892_v53  ;;  %v844_v32 = vor.u32 %v927_v28, %v843_v27  ;;  %v823_v33 = vld [vmem:[#allocation2] sm:$0xf]  ;;  %v923_v34 = vld [vmem:[#allocation2 + $0x8] sm:$0xf0]  ;;  %v825_v39 = vld [vmem:[#allocation2 + $0xc] sm:$0xf0] }
  0x1d   : > { %319 = vadd.xlane.f32.xlu1 %v310_v2  ;;  %315 = vadd.xlane.f32.xlu0 %v308_v3  ;;  %v325_v9 = vadd.f32 %v1006_v5, %v324_v8  ;;  %v847_v8 = vld [vmem:[#allocation2 + $0x30] sm:$0xf]  ;;  %v824_v38 = vor.u32 %v923_v34, %v823_v33  ;;  %v831_v40 = vld [vmem:[#allocation2 + $0x8] sm:$0xf]  ;;  %v924_v41 = vld [vmem:[#allocation2 + $0x10] sm:$0xf0]  ;;  %v828_v42 = vor.u32 %v922_v35, %v825_v39 }
  0x1e   : > { %v832_v43 = vor.u32 %v924_v41, %v831_v40 }
  0x1f   : > { %v1137_v10 = vsel %vm326_vm0, %v1006_v5, %v325_v9  ;;  %579 = vmatpush.bf16.msra.mxu0 %v872_v57  ;;  %960 = vmatpush.bf16.msra.mxu3 %v872_v57  ;;  %v933_v5 = vld [vmem:[#allocation2 + $0x58] sm:$0xf0] }
  0x20   : > { %598 = vmatpush.bf16.msra.mxu1 %v876_v61  ;;  %617 = vmatpush.bf16.msra.mxu2 %v880_v62  ;;  %v868_v7 = vor.u32 %v933_v5, %v867_v4  ;;  %v929_v9 = vld [vmem:[#allocation2 + $0x38] sm:$0xf0] }
  0x24   : > { %618 = vmatpush.bf16.msra.mxu2 %v868_v7 }
  0x88   : > { %v318_v11 = vpop.xlane.xlu1 %317  ;;  %v314_v12 = vpop.xlane.xlu0 %313 }
  0x89   : > { %v330_v13 = vmul.f32 %v1137_v10, %v318_v11  ;;  %v328_v14 = vmul.f32 %v1137_v10, %v314_v12  ;;  %v928_v11 = vld [vmem:[#allocation2 + $0x34] sm:$0xf]  ;;  %v848_v12 = vor.u32 %v929_v9, %v847_v8 }
  0x8b   : > { %v1141_v15 = vsub.f32 %v309_v0, %v330_v13  ;;  %v1143_v16 = vsub.f32 %v307_v1, %v328_v14  ;;  %v932_v0 = vld [vmem:[#allocation2 + $0x50] sm:$0xf0]  ;;  %v931_v1 = vld [vmem:[#allocation2 + $0x4c] sm:$0xf]  ;;  %v849_v13 = vld [vmem:[#allocation2 + $0x3c] sm:$0xf0] }
  0x8c   : > { %v855_v14 = vld [vmem:[#allocation2 + $0x38] sm:$0xf] }
  0x8d   : > { %v338_v17 = vmul.f32 %v1141_v15, %v1141_v15  ;;  %v336_v18 = vmul.f32 %v1143_v16, %v1143_v16 }
  0x8f   : > { %344 = vadd.xlane.f32.xlu0 %v338_v17  ;;  %340 = vadd.xlane.f32.xlu2 %v336_v18  ;;  %v930_v17 = vld [vmem:[#allocation2 + $0x40] sm:$0xf0]  ;;  %v852_v18 = vor.u32 %v928_v11, %v849_v13  ;;  %v1003_v13 = vld [vmem:[%s1193_s2] ss:$0 sm:$0xff] }
  0x90   : > { %v320_v19 = vpop.xlane.xlu1 %319  ;;  %v316_v20 = vpop.xlane.xlu0 %315 }
  0x91   : > { %v331_v21 = vmul.f32 %v1137_v10, %v320_v19  ;;  %v329_v22 = vmul.f32 %v1137_v10, %v316_v20  ;;  %v856_v19 = vor.u32 %v930_v17, %v855_v14  ;;  %v835_v20 = vld [vmem:[#allocation2 + $0x18] sm:$0xf] }
  0x93   : > { %v1151_v23 = vsub.f32 %v310_v2, %v331_v21  ;;  %v1153_v24 = vsub.f32 %v308_v3, %v329_v22  ;;  %v860_v2 = vor.u32 %v932_v0, %v859_v63  ;;  %v861_v3 = vld [vmem:[#allocation2 + $0x54] sm:$0xf0]  ;;  %619 = vmatpush.bf16.msra.mxu2 %v856_v19  ;;  %v926_v21 = vld [vmem:[#allocation2 + $0x20] sm:$0xf0]  ;;  %v925_v22 = vld [vmem:[#allocation2 + $0x1c] sm:$0xf] }
  0x94   : > { %v864_v6 = vor.u32 %v931_v1, %v861_v3 }
  0x95   : > { %v339_v25 = vmul.f32 %v1151_v23, %v1151_v23  ;;  %v337_v26 = vmul.f32 %v1153_v24, %v1153_v24  ;;  %580 = vmatpush.bf16.msra.mxu0 %v860_v2  ;;  %961 = vmatpush.bf16.msra.mxu3 %v860_v2 }
  0x96   : > { %599 = vmatpush.bf16.msra.mxu1 %v864_v6 }
  0x97   : > { %346 = vadd.xlane.f32.xlu1 %v339_v25  ;;  %342 = vadd.xlane.f32.xlu2 %v337_v26  ;;  %v836_v25 = vor.u32 %v926_v21, %v835_v20  ;;  %v837_v26 = vld [vmem:[#allocation2 + $0x24] sm:$0xf0] }
  0x98   : > { %v840_v31 = vor.u32 %v925_v22, %v837_v26  ;;  %620 = vmatpush.bf16.msra.mxu2 %v844_v32 }
  0x99   : > { %581 = vmatpush.bf16.msra.mxu0 %v848_v12  ;;  %962 = vmatpush.bf16.msra.mxu3 %v848_v12 }
  0x9a   : > { %600 = vmatpush.bf16.msra.mxu1 %v852_v18 }
  0x9c   : > { %621 = vmatpush.bf16.msra.mxu2 %v832_v43 }
  0x9d   : > { %582 = vmatpush.bf16.msra.mxu0 %v836_v25  ;;  %963 = vmatpush.bf16.msra.mxu3 %v836_v25 }
  0x9e   : > { %601 = vmatpush.bf16.msra.mxu1 %v840_v31 }
  0xa1   : > { %583 = vmatpush.bf16.msra.mxu0 %v824_v38  ;;  %964 = vmatpush.bf16.msra.mxu3 %v824_v38 }
  0xa2   : > { %602 = vmatpush.bf16.msra.mxu1 %v828_v42 }
 0x102   : > { %v341_v29 = vpop.xlane.xlu2 %340  ;;  %v345_v30 = vpop.xlane.xlu0 %344 }
 0x103   : > { %v348_v36 = vmul.f32 %v341_v29, %v1137_v10  ;;  %v350_v37 = vmul.f32 %v345_v30, %v1137_v10 }
 0x105   : > { %v352_v44 = vadd.f32 1e-07, %v348_v36  ;;  %v354_v45 = vadd.f32 1e-07, %v350_v37 }
 0x107   : > { %1007 = vrsqrt.f32 %v352_v44  ;;  %vm382_vm1 = vweird.f32 %v354_v45  ;;  %vm362_vm5 = vweird.f32 %v352_v44 }
 0x108   : > { %1009 = vrsqrt.f32 %v354_v45 }
 0x10a   : > { %v347_v46 = vpop.xlane.xlu1 %346  ;;  %v343_v47 = vpop.xlane.xlu2 %342 }
 0x10b   : > { %v351_v48 = vmul.f32 %v347_v46, %v1137_v10  ;;  %v349_v49 = vmul.f32 %v343_v47, %v1137_v10 }
 0x10d   : > { %v1008_v50 = vpop.eup %1007  ;;  %v355_v51 = vadd.f32 1e-07, %v351_v48  ;;  %v353_v52 = vadd.f32 1e-07, %v349_v49 }
 0x10e   : > { %v1010_v53 = vpop.eup %1009  ;;  %v357_v54 = vmul.f32 %v1008_v50, %v352_v44  ;;  %vm363_vm3 = vweird.f32 %v1008_v50 }
 0x10f   : > { %v377_v55 = vmul.f32 %v1010_v53, %v354_v45  ;;  %1011 = vrsqrt.f32 %v355_v51  ;;  %vm383_vm2 = vweird.f32 %v1010_v53  ;;  %vm364_vm6 = vmor %vm362_vm5, %vm363_vm3  ;;  %vm392_vm7 = vweird.f32 %v355_v51 }
 0x110   : > { %v358_v56 = vmul.f32 %v1008_v50, %v357_v54  ;;  %1013 = vrsqrt.f32 %v353_v52  ;;  %vm384_vm4 = vmor %vm382_vm1, %vm383_vm2  ;;  %vm372_vm11 = vweird.f32 %v353_v52 }
 0x111   : > { %v378_v57 = vmul.f32 %v1010_v53, %v377_v55 }
 0x112   : > { %v359_v58 = vmul.f32 0.5, %v358_v56 }
 0x113   : > { %v379_v59 = vmul.f32 0.5, %v378_v57 }
 0x114   : > { %v360_v60 = vsub.f32 1.5, %v359_v58 }
 0x115   : > { %v1012_v61 = vpop.eup %1011  ;;  %v380_v62 = vsub.f32 1.5, %v379_v59 }
 0x116   : > { %v1014_v63 = vpop.eup %1013  ;;  %v387_v0 = vmul.f32 %v1012_v61, %v355_v51  ;;  %v361_v10 = vmul.f32 %v1008_v50, %v360_v60  ;;  %vm393_vm8 = vweird.f32 %v1012_v61 }
 0x117   : > { %v381_v1 = vmul.f32 %v1010_v53, %v380_v62  ;;  %v367_v2 = vmul.f32 %v1014_v63, %v353_v52  ;;  %vm394_vm9 = vmor %vm392_vm7, %vm393_vm8  ;;  %vm373_vm10 = vweird.f32 %v1014_v63 }
 0x118   : > { %v388_v3 = vmul.f32 %v1012_v61, %v387_v0  ;;  %v365_v7 = vsel %vm364_vm6, %v1008_v50, %v361_v10  ;;  %vm374_vm12 = vmor %vm372_vm11, %vm373_vm10 }
 0x119   : > { %v368_v4 = vmul.f32 %v1014_v63, %v367_v2  ;;  %v385_v5 = vsel %vm384_vm4, %v1010_v53, %v381_v1  ;;  %v396_v14 = vmul.f32 %v365_v7, %v1143_v16 }
 0x11a   : > { %v389_v6 = vmul.f32 0.5, %v388_v3  ;;  %v398_v11 = vmul.f32 %v385_v5, %v1141_v15  ;;  %v1004_v15 = vld [vmem:[%s1192_s1] ss:$0 sm:$0xff] }
 0x11b   : > { %v369_v8 = vmul.f32 0.5, %v368_v4  ;;  %v403_v26 = vadd.f32 %v1003_v13, %v396_v14 }
 0x11c   : > { %v390_v9 = vsub.f32 1.5, %v389_v6  ;;  %v405_v22 = vadd.f32 %v1003_v13, %v398_v11 }
 0x11d   : > { %v370_v12 = vsub.f32 1.5, %v369_v8  ;;  %v410_v30 = vmul.f32 %v1004_v15, %v403_v26 }
 0x11e   : > { %v391_v17 = vmul.f32 %v1012_v61, %v390_v9  ;;  %v412_v16 = vmul.f32 %v1004_v15, %v405_v22 }
 0x11f   : > { %v371_v18 = vmul.f32 %v1014_v63, %v370_v12 }
 0x120   : > { %v395_v19 = vsel %vm394_vm9, %v1012_v61, %v391_v17 }
 0x121   : > { %v399_v20 = vmul.f32 %v395_v19, %v1151_v23  ;;  %v375_v21 = vsel %vm374_vm12, %v1014_v63, %v371_v18 }
 0x122   : > { %v397_v25 = vmul.f32 %v375_v21, %v1153_v24 }
 0x123   : > { %v406_v27 = vadd.f32 %v1003_v13, %v399_v20 }
 0x124   : > { %v404_v28 = vadd.f32 %v1003_v13, %v397_v25 }
 0x125   : > { %v413_v29 = vmul.f32 %v1004_v15, %v406_v27 }
 0x126   : > { %v411_v31 = vmul.f32 %v1004_v15, %v404_v28 }
 0x127   : > { %v415_v32 = vpack.c.bf16 %v413_v29, %v412_v16 }
 0x128   : > { %v414_v33 = vpack.c.bf16 %v411_v31, %v410_v30 }
 0x129   : > { %589 = vmatmul.bf16.vlgmr.msra.gmra.mxu3 %v415_v32 }
 0x12a   : > { %584 = vmatmul.bf16.vlgmr.msra.gmra.mxu0 %v414_v33  ;;  %603 = vmatmul.bf16.vlgmr.msra.gmra.mxu1 %v414_v33 }
 0x12b   : > { %622 = vmatmul.bf16.vlgmr.msra.gmra.mxu2 %v414_v33 }
 0x13a   : > { %608 = vmatmul.bf16.gmra.mxu1 %v415_v32 }
 0x13b   : > { %627 = vmatmul.bf16.gmra.mxu2 %v415_v32 }
 0x1a7   : > { %v585_v23 = vpop.f32.mrf.mxu0  ;;  %v604_v34 = vpop.f32.mrf.mxu1 }
 0x1a8   : > { %v633_v38 = vmul.f32 0.17677669, %v585_v23 }
 0x1ac   : > { %v590_v24 = vpop.f32.mrf.mxu3 }
 0x1ad   : > { %v635_v43 = vmul.f32 0.17677669, %v590_v24 }
 0x1ae   : > { %v623_v35 = vpop.f32.mrf.mxu2 }
 0x1af   : > { %v645_v36 = vpack.c.bf16 %v623_v35, %v604_v34  ;;  %v587_v37 = vpop.f32.mrf.mxu0  ;;  %v606_v41 = vpop.f32.mrf.mxu1 }
 0x1b0   : > { %v634_v39 = vmul.f32 0.17677669, %v587_v37 }
 0x1b1   : > { %649 = vst [vmem:[%s305_s15] sm:$0xff] %v645_v36 }
 0x1b2   : > { %v949_v40 = vpack.c.bf16 %v634_v39, %v633_v38 }
 0x1b4   : > { %950 = vst [vmem:[%s294_s23] sm:$0xff] %v949_v40   ;;  %v592_v42 = vpop.f32.mrf.mxu3 }
 0x1b5   : > { %v636_v44 = vmul.f32 0.17677669, %v592_v42 }
 0x1b6   : > { %v625_v45 = vpop.f32.mrf.mxu2 }
 0x1b7   : > { %v954_v46 = vpack.c.bf16 %v636_v44, %v635_v43  ;;  %v646_v47 = vpack.c.bf16 %v625_v45, %v606_v41  ;;  %v609_v48 = vpop.f32.mrf.mxu1 }
 0x1b9   : > { %956 = vst [vmem:[%s294_s23 + $0x8] sm:$0xff] %v954_v46  }
 0x1ba   : > { %650 = vst [vmem:[%s305_s15 + $0x8] sm:$0xff] %v646_v47 }
 0x1be   : > { %v628_v49 = vpop.f32.mrf.mxu2 }
 0x1bf   : > { %v647_v50 = vpack.c.bf16 %v628_v49, %v609_v48  ;;  %v611_v51 = vpop.f32.mrf.mxu1 }
 0x1c1   : > { %651 = vst [vmem:[%s305_s15 + $0x10] sm:$0xff] %v647_v50 }
 0x1c6   : > { %v630_v52 = vpop.f32.mrf.mxu2 }
 0x1c7   : > { %v648_v53 = vpack.c.bf16 %v630_v52, %v611_v51 }
 0x1c9   : > { %652 = vst [vmem:[%s305_s15 + $0x18] sm:$0xff] %v648_v53 }
 0x1ca PF: > { %s17_s20 = sadd.s32 1, %s1071_s20   ;;  %s1197_s18 = smov %s1067_s19 }
 0x1cb   : > { %p14_p8 = scmp.ge.s32.totalorder %s17_s20, 4   ;;  %s1198_s19 = smov %s1200_s22 }
 0x1cd   :  { %16 = sbr.rel (!%p14_p8) target bundleno = 2 (0x2), region = 83 }
 0x1d2   :  { %710 = vsyncpa [#allocation3], 1 }
 0x1d3   :  { %712 = vsyncpa [#allocation3 + $0x1], 1 }

// kernel: gpt_forward.11
= control target key start
LH: loop header
LB: loop body
LE: loop exit
PB: predicated region body
PF: predicated region fallthrough
CT: control target
= control target key end

     0   :  { %8 = vsyncpa [#allocation3], 0  ;;  %s1224_s0 = inlined_call_operand.vmem [shape: bf16[2,32,128], index: 0, kind: input, shape index: {}]   ;;  %s1225_s1 = inlined_call_operand.hbm [shape: bf16[128,512], index: 1, kind: input, shape index: {}]   ;;  %s1226_s2 = inlined_call_operand.vmem [shape: f32[1,512], index: 2, kind: input, shape index: {}]   ;;  %s1227_s3 = inlined_call_operand.hbm [shape: f32[2,32,512], index: 3, kind: output, shape index: {}]  }
   0x1   :  { %9 = vsyncpa [#allocation4], 0 }
   0x2   :  { %11 = vsyncpa [#allocation4 + $0x1], 0  ;;  %s1093_s12 = smov 0   ;;  %s1095_s13 = smov 0  }
   0x3   :  { %s1097_s14 = smov 0   ;;  %s1099_s15 = smov 0  }
   0x4   :  { %s1101_s16 = smov 0   ;;  %s1103_s17 = smov 0  }
   0x5 LB: > { %s696_s18 = sadd.s32 4294967295, %s1066_s17   ;;  %s697_s19 = sadd.s32 4294967294, %s1066_s17   ;;  %s1066_s17 = sphi %s1103_s17, %s17_s17   ;;  %s1062_s16 = sphi %s1101_s16, %s1234_s16   ;;  %s1058_s15 = sphi %s1099_s15, %s1233_s15   ;;  %s1054_s14 = sphi %s1097_s14, %s1232_s14   ;;  %s1050_s13 = sphi %s1095_s13, %s1231_s13   ;;  %s1046_s12 = sphi %s1093_s12, %s1230_s12  }
   0x6   : > { %s32_s20 = sadd.s32 1, %s1062_s16  ;;  %s127_s21 = sadd.s32 1, %s1054_s14 }
   0x7   : > { %p34_p0 = scmp.ge.s32.totalorder %s32_s20, 2  ;;  %p137_p1 = scmp.ne.s32.totalorder %s1054_s14, %s1050_s13 }
   0x8   : > { %p138_p2 = scmp.eq.s32.totalorder %s696_s18, 1  ;;  %p143_p3 = scmp.ne.s32.totalorder %s1050_s13, %s1046_s12 }
   0x9   : > { %s1236_s20 = smov (%p34_p0, %s32_s20), 0  ;;  %p144_p5 = scmp.eq.s32.totalorder %s697_s19, 1 }
   0xa   : > { %p1133_p4 = por %p138_p2, %p137_p1  ;;  %s120_s23 = ssub.s32 %s1062_s16, %s1236_s20 }
   0xb   : > { %p698_p6 = scmp.ge.s32.totalorder %s1066_s17, 1  ;;  %p125_p7 = scmp.eq.s32.totalorder %s120_s23, 0 }
   0xc   : > { %p1140_p8 = por %p144_p5, %p143_p3  ;;  %p151_p9 = scmp.lt.s32.totalorder %s1066_s17, 3 }
   0xd   : > { %s1146_s25 = scalar_select %p125_p7, %s1054_s14, %s127_s21  }
   0xe   : > { %p152_p10 = pnand %p698_p6, %p151_p9  ;;  %p898_p11 = scmp.eq.s32.totalorder %s696_s18, 0 }
   0xf   : > { %s165_s28 = sshll.u32 %s1225_s1, 4  ;;  %s1068_s29 = smov [#allocation2]   ;;  %s166_s28 = int_to_ptr.hbm [resolvable:$true] %s165_s28 }
  0x10   : > { %p890_p12 = pneg %p152_p10  ;;  %s167_s30 = sshll.u32 %s1068_s29, 4  ;;  %s168_s30 = int_to_ptr.vmem [resolvable:$true] %s167_s30 }
  0x11   : > { %s1069_s4 = smov 256   ;;  %s1070_s5 = smov 16  }
  0x12   : > { %p891_p13 = pnand %p898_p11, %p890_p12  ;;  %204 = sbr.rel (%p152_p10) target bundleno = 223 (0xdf), region = 32 }
  0x14   : > { %893 = dma.hbm_to_vmem [thread:$0]  (!%p891_p13), %s166_s28, 4096, %s168_s30, [#allocation3], %s1069_s4, %s1069_s4, %s1070_s5  }
  0x17   : > { %1037 = dma.done.wait (%p898_p11), [#allocation3], 4096  }
  0x18   : > { %1039 = vsyncadd (%p898_p11), [#allocation3], 4294963200  ;;  %v829_v0 = vld [vmem:[#allocation2 + $0xe0] sm:$0xf]  ;;  %v881_v1 = vld [vmem:[#allocation2 + $0xec] sm:$0xf0] }
  0x19   : > { %v879_v2 = vld [vmem:[#allocation2 + $0xe4] sm:$0xf]  ;;  %v830_v3 = vor.u32 %v881_v1, %v829_v0  ;;  %v831_v4 = vld [vmem:[#allocation2 + $0xf0] sm:$0xf0]  ;;  %v837_v5 = vld [vmem:[#allocation2 + $0xe8] sm:$0xf] }
  0x1a   : > { %v882_v6 = vld [vmem:[#allocation2 + $0xf4] sm:$0xf0]  ;;  %v834_v7 = vor.u32 %v879_v2, %v831_v4  ;;  %v880_v9 = vld [vmem:[#allocation2 + $0xec] sm:$0xf]  ;;  %v839_v10 = vld [vmem:[#allocation2 + $0xf8] sm:$0xf0] }
  0x1b   : > { %v838_v8 = vor.u32 %v882_v6, %v837_v5  ;;  %v813_v11 = vld [vmem:[#allocation2 + $0xc0] sm:$0xf]  ;;  %473 = vmatpush.bf16.msra.mxu0 %v830_v3  ;;  %v842_v12 = vor.u32 %v880_v9, %v839_v10  ;;  %v877_v13 = vld [vmem:[#allocation2 + $0xcc] sm:$0xf0]  ;;  %v875_v14 = vld [vmem:[#allocation2 + $0xc4] sm:$0xf] }
  0x1c   : > { %v815_v15 = vld [vmem:[#allocation2 + $0xd0] sm:$0xf0]  ;;  %492 = vmatpush.bf16.msra.mxu1 %v834_v7  ;;  %v814_v16 = vor.u32 %v877_v13, %v813_v11  ;;  %v821_v18 = vld [vmem:[#allocation2 + $0xc8] sm:$0xf]  ;;  %v878_v19 = vld [vmem:[#allocation2 + $0xd4] sm:$0xf0] }
  0x1d   : > { %511 = vmatpush.bf16.msra.mxu2 %v838_v8  ;;  %v818_v17 = vor.u32 %v875_v14, %v815_v15  ;;  %v876_v20 = vld [vmem:[#allocation2 + $0xcc] sm:$0xf]  ;;  %530 = vmatpush.bf16.msra.mxu3 %v842_v12  ;;  %v822_v21 = vor.u32 %v878_v19, %v821_v18  ;;  %v823_v22 = vld [vmem:[#allocation2 + $0xd8] sm:$0xf0]  ;;  %v797_v23 = vld [vmem:[#allocation2 + $0xa0] sm:$0xf] }
  0x1e   : > { %v873_v24 = vld [vmem:[#allocation2 + $0xac] sm:$0xf0]  ;;  %v826_v25 = vor.u32 %v876_v20, %v823_v22  ;;  %v871_v26 = vld [vmem:[#allocation2 + $0xa4] sm:$0xf]  ;;  %v799_v27 = vld [vmem:[#allocation2 + $0xb0] sm:$0xf0] }
  0x1f   : > { %v805_v28 = vld [vmem:[#allocation2 + $0xa8] sm:$0xf]  ;;  %474 = vmatpush.bf16.msra.mxu0 %v814_v16  ;;  %v798_v29 = vor.u32 %v873_v24, %v797_v23  ;;  %v874_v30 = vld [vmem:[#allocation2 + $0xb4] sm:$0xf0]  ;;  %v872_v31 = vld [vmem:[#allocation2 + $0xac] sm:$0xf]  ;;  %v802_v33 = vor.u32 %v871_v26, %v799_v27 }
  0x20   : > { %v807_v32 = vld [vmem:[#allocation2 + $0xb8] sm:$0xf0]  ;;  %493 = vmatpush.bf16.msra.mxu1 %v818_v17  ;;  %v806_v34 = vor.u32 %v874_v30, %v805_v28  ;;  %v781_v35 = vld [vmem:[#allocation2 + $0x80] sm:$0xf]  ;;  %v869_v36 = vld [vmem:[#allocation2 + $0x8c] sm:$0xf0] }
  0x21   : > { %512 = vmatpush.bf16.msra.mxu2 %v822_v21  ;;  %v867_v37 = vld [vmem:[#allocation2 + $0x84] sm:$0xf]  ;;  %531 = vmatpush.bf16.msra.mxu3 %v826_v25  ;;  %v810_v38 = vor.u32 %v872_v31, %v807_v32  ;;  %v783_v39 = vld [vmem:[#allocation2 + $0x90] sm:$0xf0]  ;;  %v789_v40 = vld [vmem:[#allocation2 + $0x88] sm:$0xf]  ;;  %v782_v44 = vor.u32 %v869_v36, %v781_v35 }
  0x22   : > { %v870_v41 = vld [vmem:[#allocation2 + $0x94] sm:$0xf0]  ;;  %v868_v42 = vld [vmem:[#allocation2 + $0x8c] sm:$0xf]  ;;  %v791_v43 = vld [vmem:[#allocation2 + $0x98] sm:$0xf0]  ;;  %v786_v45 = vor.u32 %v867_v37, %v783_v39 }
  0x23   : > { %475 = vmatpush.bf16.msra.mxu0 %v798_v29  ;;  %v790_v46 = vor.u32 %v870_v41, %v789_v40  ;;  %v765_v47 = vld [vmem:[#allocation2 + $0x60] sm:$0xf]  ;;  %v865_v48 = vld [vmem:[#allocation2 + $0x6c] sm:$0xf0]  ;;  %v863_v49 = vld [vmem:[#allocation2 + $0x64] sm:$0xf]  ;;  %v794_v50 = vor.u32 %v868_v42, %v791_v43 }
  0x24   : > { %494 = vmatpush.bf16.msra.mxu1 %v802_v33  ;;  %v767_v51 = vld [vmem:[#allocation2 + $0x70] sm:$0xf0]  ;;  %v773_v52 = vld [vmem:[#allocation2 + $0x68] sm:$0xf]  ;;  %v866_v53 = vld [vmem:[#allocation2 + $0x74] sm:$0xf0]  ;;  %v766_v56 = vor.u32 %v865_v48, %v765_v47 }
  0x25   : > { %513 = vmatpush.bf16.msra.mxu2 %v806_v34  ;;  %532 = vmatpush.bf16.msra.mxu3 %v810_v38  ;;  %v864_v54 = vld [vmem:[#allocation2 + $0x6c] sm:$0xf]  ;;  %v775_v55 = vld [vmem:[#allocation2 + $0x78] sm:$0xf0]  ;;  %p238_p0 = scmp.lt.s32.totalorder %s1058_s15, 1  ;;  %v770_v57 = vor.u32 %v863_v49, %v767_v51  ;;  %v774_v58 = vor.u32 %v866_v53, %v773_v52  ;;  %s234_s11 = sand.u32 1, %s1050_s13  }
  0x26   : > { %v749_v59 = vld [vmem:[#allocation2 + $0x40] sm:$0xf]  ;;  %v861_v60 = vld [vmem:[#allocation2 + $0x4c] sm:$0xf0]  ;;  %v859_v61 = vld [vmem:[#allocation2 + $0x44] sm:$0xf]  ;;  %v778_v62 = vor.u32 %v864_v54, %v775_v55 }
  0x27   : > { %476 = vmatpush.bf16.msra.mxu0 %v782_v44  ;;  %v751_v63 = vld [vmem:[#allocation2 + $0x50] sm:$0xf0]  ;;  %v757_v0 = vld [vmem:[#allocation2 + $0x48] sm:$0xf]  ;;  %v862_v1 = vld [vmem:[#allocation2 + $0x54] sm:$0xf0]  ;;  %v750_v4 = vor.u32 %v861_v60, %v749_v59 }
  0x28   : > { %495 = vmatpush.bf16.msra.mxu1 %v786_v45  ;;  %v860_v2 = vld [vmem:[#allocation2 + $0x4c] sm:$0xf]  ;;  %v759_v3 = vld [vmem:[#allocation2 + $0x58] sm:$0xf0]  ;;  %s1155_s6 = scalar_select %p238_p0, %s1058_s15, 1  ;;  %v754_v5 = vor.u32 %v859_v61, %v751_v63  ;;  %v758_v6 = vor.u32 %v862_v1, %v757_v0 }
  0x29   : > { %514 = vmatpush.bf16.msra.mxu2 %v790_v46  ;;  %533 = vmatpush.bf16.msra.mxu3 %v794_v50  ;;  %v733_v7 = vld [vmem:[#allocation2 + $0x20] sm:$0xf]  ;;  %v857_v8 = vld [vmem:[#allocation2 + $0x2c] sm:$0xf0]  ;;  %v855_v9 = vld [vmem:[#allocation2 + $0x24] sm:$0xf]  ;;  %v762_v10 = vor.u32 %v860_v2, %v759_v3 }
  0x2a   : > { %v735_v11 = vld [vmem:[#allocation2 + $0x30] sm:$0xf0]  ;;  %v741_v12 = vld [vmem:[#allocation2 + $0x28] sm:$0xf]  ;;  %v858_v13 = vld [vmem:[#allocation2 + $0x34] sm:$0xf0]  ;;  %v734_v16 = vor.u32 %v857_v8, %v733_v7 }
  0x2b   : > { %477 = vmatpush.bf16.msra.mxu0 %v766_v56  ;;  %v856_v14 = vld [vmem:[#allocation2 + $0x2c] sm:$0xf]  ;;  %v743_v15 = vld [vmem:[#allocation2 + $0x38] sm:$0xf0]  ;;  %s848_s7 = sshll.u32 %s1155_s6, 4  ;;  %v738_v17 = vor.u32 %v855_v9, %v735_v11  ;;  %v742_v18 = vor.u32 %v858_v13, %v741_v12  ;;  %s704_s21 = sshll.u32 %s234_s11, 7 }
  0x2c   : > { %496 = vmatpush.bf16.msra.mxu1 %v770_v57  ;;  %v717_v19 = vld [vmem:[#allocation2] sm:$0xf]  ;;  %v853_v20 = vld [vmem:[#allocation2 + $0xc] sm:$0xf0]  ;;  %v851_v21 = vld [vmem:[#allocation2 + $0x4] sm:$0xf]  ;;  %v746_v22 = vor.u32 %v856_v14, %v743_v15  ;;  %s245_s10 = scalar_lea.vmem %s1224_s0, %s848_s7 }
  0x2d   : > { %515 = vmatpush.bf16.msra.mxu2 %v774_v58  ;;  %534 = vmatpush.bf16.msra.mxu3 %v778_v62  ;;  %v719_v23 = vld [vmem:[#allocation2 + $0x10] sm:$0xf0]  ;;  %v725_v24 = vld [vmem:[#allocation2 + $0x8] sm:$0xf]  ;;  %v854_v25 = vld [vmem:[#allocation2 + $0x14] sm:$0xf0]  ;;  %v718_v28 = vor.u32 %v853_v20, %v717_v19 }
  0x2e   : > { %v852_v26 = vld [vmem:[#allocation2 + $0xc] sm:$0xf]  ;;  %v727_v27 = vld [vmem:[#allocation2 + $0x18] sm:$0xf0]  ;;  %v722_v29 = vor.u32 %v851_v21, %v719_v23  ;;  %v726_v30 = vor.u32 %v854_v25, %v725_v24  ;;  %v849_v32 = vld [vmem:[%s245_s10] sm:$0xff]  ;;  %s1167_s23 = scalar_lea.vmem [#allocation5], %s704_s21 }
  0x2f   : > { %478 = vmatpush.bf16.msra.mxu0 %v750_v4  ;;  %v730_v31 = vor.u32 %v852_v26, %v727_v27  ;;  %v850_v33 = vld [vmem:[%s245_s10 + $0x8] sm:$0xff]  ;;  %v291_v34 = vld [vmem:[%s1226_s2] sm:$0xf]  ;;  %s883_s26 = sshll.u32 %s1058_s15, 7  ;;  %s583_s15 = sshll.u32 %s1167_s23, 4  ;;  %s584_s15 = int_to_ptr.vmem [resolvable:$true] %s583_s15 }
  0x30   : > { %497 = vmatpush.bf16.msra.mxu1 %v754_v5  ;;  %v293_v35 = vperm.slane %v291_v34, 0  ;;  %v294_v36 = vperm.slane %v291_v34, 1  ;;  %v295_v41 = vperm.slane %v291_v34, 2  ;;  %v296_v42 = vperm.slane %v291_v34, 3  ;;  %s582_s29 = scalar_lea.hbm %s1227_s3, %s883_s26  ;;  %s566_s4 = scalar_lea.sflag [#allocation4], %s234_s11 }
  0x31   : > { %516 = vmatpush.bf16.msra.mxu2 %v758_v6  ;;  %535 = vmatpush.bf16.msra.mxu3 %v762_v10  ;;  %s585_s30 = sshll.u32 %s582_s29, 4  ;;  %s1004_s9 = scalar_lea.hbm %s1227_s3, 256  ;;  %s586_s30 = int_to_ptr.hbm [resolvable:$true] %s585_s30 }
  0x32   : > { %s998_s5 = sshra.s32 %s586_s30, 4  ;;  %s999_s5 = int_to_ptr.hbm [resolvable:$true] %s998_s5 }
  0x33   : > { %479 = vmatpush.bf16.msra.mxu0 %v734_v16  ;;  %s1000_s6 = scalar_lea.hbm %s999_s5, 128  ;;  %p1005_p5 = scmp.lt.s32.totalorder %s999_s5, %s1227_s3 }
  0x34   : > { %498 = vmatpush.bf16.msra.mxu1 %v738_v17  ;;  %p1001_p1 = scmp.ne.s32.totalorder %s999_s5, %s1000_s6  ;;  %p1006_p6 = scmp.lt.s32.totalorder %s1004_s9, %s1000_s6 }
  0x35   : > { %517 = vmatpush.bf16.msra.mxu2 %v742_v18  ;;  %536 = vmatpush.bf16.msra.mxu3 %v746_v22 }
  0x36   : > { %p1002_p2 = pnand %p1001_p1, %p1133_p4  ;;  %p1007_p7 = por %p1006_p6, %p1005_p5 }
  0x37   : > { %480 = vmatpush.bf16.msra.mxu0 %v718_v28 }
  0x38   : > { %499 = vmatpush.bf16.msra.mxu1 %v722_v29  ;;  %p1003_p3 = pneg %p1002_p2 }
  0x39   : > { %518 = vmatpush.bf16.msra.mxu2 %v726_v30  ;;  %537 = vmatpush.bf16.msra.mxu3 %v730_v31 }
  0x3a   : > { %481 = vmatmul.bf16.vlgmr.msra.gmra.mxu0 %v849_v32  ;;  %p1008_p9 = pnand %p1007_p7, %p1003_p3 }
  0x3b   : > { %500 = vmatmul.bf16.vlgmr.msra.gmra.mxu1 %v849_v32 }
  0x3c   : > { %519 = vmatmul.bf16.vlgmr.msra.gmra.mxu2 %v849_v32  ;;  %538 = vmatmul.bf16.vlgmr.msra.gmra.mxu3 %v849_v32 }
  0x4a   : > { %486 = vmatmul.bf16.gmra.mxu0 %v850_v33 }
  0x4b   : > { %505 = vmatmul.bf16.gmra.mxu1 %v850_v33 }
  0x4c   : > { %524 = vmatmul.bf16.gmra.mxu2 %v850_v33  ;;  %543 = vmatmul.bf16.gmra.mxu3 %v850_v33 }
  0xb7   : > { %v482_v37 = vpop.f32.mrf.mxu0 }
  0xb8   : > { %v483_v38 = vadd.f32 %v482_v37, %v293_v35  ;;  %v501_v39 = vpop.f32.mrf.mxu1 }
  0xb9   : > { %v502_v40 = vadd.f32 %v501_v39, %v294_v36 }
  0xba   : > { %549 = vst [vmem:[%s1167_s23] sm:$0xff] %v483_v38 }
  0xbb   : > { %550 = vst [vmem:[%s1167_s23 + $0x8] sm:$0xff] %v502_v40 }
  0xbf   : > { %v520_v43 = vpop.f32.mrf.mxu2  ;;  %v539_v45 = vpop.f32.mrf.mxu3 }
  0xc0   : > { %v521_v44 = vadd.f32 %v520_v43, %v295_v41  ;;  %v484_v46 = vpop.f32.mrf.mxu0  ;;  %v540_v47 = vadd.f32 %v539_v45, %v296_v42  ;;  %v503_v49 = vpop.f32.mrf.mxu1 }
  0xc1   : > { %v485_v48 = vadd.f32 %v484_v46, %v293_v35  ;;  %v504_v50 = vadd.f32 %v503_v49, %v294_v36 }
  0xc2   : > { %551 = vst [vmem:[%s1167_s23 + $0x10] sm:$0xff] %v521_v44 }
  0xc3   : > { %552 = vst [vmem:[%s1167_s23 + $0x18] sm:$0xff] %v540_v47 }
  0xc4   : > { %553 = vst [vmem:[%s1167_s23 + $0x20] sm:$0xff] %v485_v48 }
  0xc5   : > { %554 = vst [vmem:[%s1167_s23 + $0x28] sm:$0xff] %v504_v50 }
  0xc7   : > { %v522_v51 = vpop.f32.mrf.mxu2  ;;  %v541_v53 = vpop.f32.mrf.mxu3 }
  0xc8   : > { %v523_v52 = vadd.f32 %v522_v51, %v295_v41  ;;  %v487_v54 = vpop.f32.mrf.mxu0  ;;  %v542_v55 = vadd.f32 %v541_v53, %v296_v42  ;;  %v506_v57 = vpop.f32.mrf.mxu1 }
  0xc9   : > { %v488_v56 = vadd.f32 %v487_v54, %v293_v35  ;;  %v507_v58 = vadd.f32 %v506_v57, %v294_v36 }
  0xca   : > { %555 = vst [vmem:[%s1167_s23 + $0x30] sm:$0xff] %v523_v52 }
  0xcb   : > { %556 = vst [vmem:[%s1167_s23 + $0x38] sm:$0xff] %v542_v55 }
  0xcc   : > { %557 = vst [vmem:[%s1167_s23 + $0x40] sm:$0xff] %v488_v56 }
  0xcd   : > { %558 = vst [vmem:[%s1167_s23 + $0x48] sm:$0xff] %v507_v58 }
  0xcf   : > { %v525_v59 = vpop.f32.mrf.mxu2  ;;  %v544_v61 = vpop.f32.mrf.mxu3 }
  0xd0   : > { %v526_v60 = vadd.f32 %v525_v59, %v295_v41  ;;  %v489_v62 = vpop.f32.mrf.mxu0  ;;  %v545_v63 = vadd.f32 %v544_v61, %v296_v42  ;;  %v508_v1 = vpop.f32.mrf.mxu1 }
  0xd1   : > { %v490_v0 = vadd.f32 %v489_v62, %v293_v35  ;;  %v509_v2 = vadd.f32 %v508_v1, %v294_v36 }
  0xd2   : > { %559 = vst [vmem:[%s1167_s23 + $0x50] sm:$0xff] %v526_v60 }
  0xd3   : > { %560 = vst [vmem:[%s1167_s23 + $0x58] sm:$0xff] %v545_v63 }
  0xd4   : > { %561 = vst [vmem:[%s1167_s23 + $0x60] sm:$0xff] %v490_v0 }
  0xd5   : > { %562 = vst [vmem:[%s1167_s23 + $0x68] sm:$0xff] %v509_v2 }
  0xd7   : > { %v527_v3 = vpop.f32.mrf.mxu2  ;;  %v546_v5 = vpop.f32.mrf.mxu3 }
  0xd8   : > { %v528_v4 = vadd.f32 %v527_v3, %v295_v41  ;;  %v547_v6 = vadd.f32 %v546_v5, %v296_v42 }
  0xda   : > { %563 = vst [vmem:[%s1167_s23 + $0x70] sm:$0xff] %v528_v4 }
  0xdb   : > { %564 = vst [vmem:[%s1167_s23 + $0x78] sm:$0xff] %v547_v6 }
  0xdc   : > { %1011 = shalt.err (!%p1008_p9)
}
  0xdd   : > { %s1071_s11 = smov 512   ;;  %s1072_s19 = smov 32  }
  0xde   : > { %888 = dma.vmem_to_hbm [thread:$0]  (%p1133_p4), %s584_s15, 2048, %s586_s30, %s566_s4, %s1071_s11, %s1071_s11, %s1072_s19  }
  0xdf PF: > { %p900_p10 = scmp.ge.s32.totalorder %s1066_s17, 2  ;;  %s600_s21 = sand.u32 1, %s1046_s12  }
  0xe0   : > { %s601_s23 = scalar_lea.sflag [#allocation4], %s600_s21 }
  0xe1   : > { %p895_p11 = pnand %p900_p10, %p1140_p8 }
  0xe3   : > { %p896_p12 = pneg %p895_p11 }
  0xe5   : > { %1041 = dma.done.wait (%p896_p12), %s601_s23, 2048  }
  0xe6   : > { %1043 = vsyncadd (%p896_p12), %s601_s23, 4294965248  ;;  %s17_s17 = sadd.s32 1, %s1066_s17   ;;  %s1230_s12 = smov %s1050_s13 }
  0xe7   : > { %p14_p13 = scmp.ge.s32.totalorder %s17_s17, 4   ;;  %s1231_s13 = smov %s1054_s14 }
  0xe8   : > { %s1232_s14 = smov %s1146_s25  ;;  %s1233_s15 = smov %s1062_s16 }
  0xe9   : > { %s1234_s16 = smov %s1236_s20  ;;  %16 = sbr.rel (!%p14_p13) target bundleno = 5 (0x5), region = 76 }
  0xee   :  { %607 = vsyncpa [#allocation3], 1 }
  0xef   :  { %609 = vsyncpa [#allocation3 + $0x1], 1 }
  0xf0   :  { %610 = vsyncpa [#allocation4], 1 }
  0xf1   :  { %612 = vsyncpa [#allocation4 + $0x1], 1 }

// kernel: gpt_forward.7
= control target key start
LH: loop header
LB: loop body
LE: loop exit
PB: predicated region body
PF: predicated region fallthrough
CT: control target
= control target key end

     0   :  { %16 = vsyncpa [#allocation4], 0  ;;  %s3162_s17 = smov 0   ;;  %s3164_s18 = smov 0   ;;  %s3964_s0 = inlined_call_operand.vmem [shape: f32[2,32,128], index: 0, kind: input, shape index: {}]   ;;  %s3965_s1 = inlined_call_operand.vmem [shape: bf16[2,32,128], index: 1, kind: input, shape index: {}]   ;;  %s3966_s2 = inlined_call_operand.vmem [shape: bf16[2,32,256], index: 2, kind: input, shape index: {}]   ;;  %s3967_s3 = inlined_call_operand.hbm [shape: bf16[128,128], index: 3, kind: input, shape index: {}]   ;;  %s3968_s4 = inlined_call_operand.vmem [shape: f32[1,128], index: 4, kind: input, shape index: {}]   ;;  %s3969_s5 = inlined_call_operand.vmem [shape: f32[1,128], index: 5, kind: input, shape index: {}]   ;;  %s3970_s6 = inlined_call_operand.vmem [shape: f32[1,128], index: 6, kind: input, shape index: {}]   ;;  %s3971_s7 = inlined_call_operand.vmem [shape: bf16[128,512], index: 7, kind: input, shape index: {}]   ;;  %s3972_s8 = inlined_call_operand.vmem [shape: f32[1,512], index: 8, kind: input, shape index: {}]   ;;  %s3973_s9 = inlined_call_operand.vmem [shape: bf16[512,128], index: 9, kind: input, shape index: {}]   ;;  %s3974_s10 = inlined_call_operand.vmem [shape: f32[1,128], index: 10, kind: input, shape index: {}]   ;;  %s3975_s11 = inlined_call_operand.vmem [shape: f32[2,32,128], index: 11, kind: output, shape index: {}]  }
   0x1   :  { %s3166_s19 = smov 0  }
   0x2 LB: > { %s2357_s20 = sadd.s32 4294967295, %s3093_s19   ;;  %s34_s21 = sadd.s32 1, %s3089_s18  ;;  %s3093_s19 = sphi %s3166_s19, %s22_s19   ;;  %s3089_s18 = sphi %s3164_s18, %s3977_s18   ;;  %s3085_s17 = sphi %s3162_s17, %s3976_s17  }
   0x3   : > { %p36_p0 = scmp.ge.s32.totalorder %s34_s21, 2  ;;  %p2359_p1 = scmp.ge.s32.totalorder %s3093_s19, 1 }
   0x4   : > { %p317_p2 = scmp.lt.s32.totalorder %s3093_s19, 3  ;;  %p2894_p4 = scmp.eq.s32.totalorder %s2357_s20, 0 }
   0x5   : > { %s3979_s21 = smov (%p36_p0, %s34_s21), 0  ;;  %s328_s24 = sshll.u32 %s3967_s3, 4  ;;  %s329_s24 = int_to_ptr.hbm [resolvable:$true] %s328_s24 }
   0x6   : > { %p318_p3 = pnand %p2359_p1, %p317_p2  ;;  %s3095_s25 = smov [#allocation3]  }
   0x7   : > { %s330_s26 = sshll.u32 %s3095_s25, 4  ;;  %s3096_s27 = smov 64   ;;  %s331_s26 = int_to_ptr.vmem [resolvable:$true] %s330_s26 }
   0x8   : > { %p2890_p5 = pneg %p318_p3  ;;  %s3097_s28 = smov 4  }
   0x9   : > { %401 = sbr.rel (%p318_p3) target bundleno = 1894 (0x766), region = 64 }
   0xa   : > { %p2891_p6 = pnand %p2894_p4, %p2890_p5 }
   0xc   : > { %2893 = dma.hbm_to_vmem [thread:$0]  (!%p2891_p6), %s329_s24, 1024, %s331_s26, [#allocation4], %s3096_s27, %s3096_s27, %s3097_s28  }
   0xe   : > { %3080 = dma.done.wait (%p2894_p4), [#allocation4], 1024  }
   0xf   : > { %3082 = vsyncadd (%p2894_p4), [#allocation4], 4294966272  ;;  %p465_p7 = scmp.lt.s32.totalorder %s3085_s17, 1  ;;  %vm553_vm0 = vcmask 261120   ;;  %s3099_s22 = smov 32   ;;  %v505_v33 = vlaneseq  ;;  %vm676_vm5 = vcmask 257024  }
  0x10   : > { %s3100_s23 = smov 64   ;;  %vm863_vm6 = vcmask 519424   ;;  %vm1050_vm7 = vcmask 781824   ;;  %vm1237_vm8 = vcmask 1044224  }
  0x11   : > { %s3981_s17 = smov (!%p465_p7, %s3085_s17), 1  ;;  %v3231_v35 = vshrl.u32 %v505_v33, 7  ;;  %v3233_v36 = vand.u32 127, %v505_v33 }
  0x12   : > { %s3184_s29 = sshll.u32 %s3981_s17, 5  ;;  %s2783_s14 = sshll.u32 %s3981_s17, 4 }
  0x13   : > { %s3190_s13 = scalar_lea.vmem %s3966_s2, %s3184_s29  ;;  %s3201_s20 = scalar_lea.vmem %s3965_s1, %s2783_s14  ;;  %vm517_vm1 = vcmp.ge.s32.totalorder %v3231_v35, %v3233_v36  ;;  %v3243_v42 = vadd.s32 8, %v3231_v35  ;;  %v3255_v47 = vadd.s32 16, %v3231_v35 }
  0x14   : > { %v2386_v0 = vld [vmem:[%s3190_s13 + $0x10] sm:$0xf]  ;;  %v2789_v1 = vld [vmem:[%s3190_s13 + $0x14] sm:$0xf0]  ;;  %v2382_v6 = vld [vmem:[%s3190_s13] sm:$0xf]  ;;  %s472_s26 = scalar_lea.vmem %s3964_s0, %s3184_s29 }
  0x15   : > { %v2414_v2 = vld [vmem:[%s3190_s13 + $0x10] sm:$0xf]  ;;  %v2387_v3 = vor.u32 %v2789_v1, %v2386_v0  ;;  %v2795_v4 = vld [vmem:[%s3190_s13 + $0x14] sm:$0xf0]  ;;  %v2788_v7 = vld [vmem:[%s3190_s13 + $0x4] sm:$0xf0]  ;;  %vm518_vm2 = vcmp.ge.s32.totalorder %v3243_v42, %v3233_v36  ;;  %vm519_vm3 = vcmp.ge.s32.totalorder %v3255_v47, %v3233_v36 }
  0x16   : > { %v2415_v5 = vor.u32 %v2795_v4, %v2414_v2  ;;  %v2792_v9 = vld [vmem:[%s3201_s20] sm:$0xff]  ;;  %s3098_s17 = smov 96   ;;  %v2383_v10 = vor.u32 %v2788_v7, %v2382_v6  ;;  %v2794_v12 = vld [vmem:[%s3190_s13 + $0x4] sm:$0xf0]  ;;  %v2470_v17 = vld [vmem:[%s3190_s13 + $0x10] sm:$0xf] }
  0x17   : > { %v564_v8 = vsel %vm553_vm0, %v2387_v3, 0  ;;  %v2410_v11 = vld [vmem:[%s3190_s13] sm:$0xf]  ;;  %703 = vrot.lane.b32.xlu2 %v2792_v9, %s3098_s17  ;;  %v2793_v16 = vld [vmem:[%s3201_s20 + $0x8] sm:$0xff]  ;;  %v2807_v18 = vld [vmem:[%s3190_s13 + $0x14] sm:$0xf0] }
  0x18   : > { %572 = vmatpush.bf16.xpose.msra.mxu0 %v564_v8  ;;  %719 = vrot.lane.b32.xlu1 %v2415_v5, %s3098_s17  ;;  %v2411_v13 = vor.u32 %v2794_v12, %v2410_v11  ;;  %v561_v14 = vsel %vm553_vm0, %v2383_v10, 0  ;;  %v2786_v15 = vld [vmem:[%s3201_s20] sm:$0xff]  ;;  %v2471_v19 = vor.u32 %v2807_v18, %v2470_v17  ;;  %v2800_v21 = vld [vmem:[%s3190_s13 + $0x4] sm:$0xf0]  ;;  %v2442_v54 = vld [vmem:[%s3190_s13 + $0x10] sm:$0xf] }
  0x19   : > { %v2438_v20 = vld [vmem:[%s3190_s13] sm:$0xf]  ;;  %v2787_v22 = vld [vmem:[%s3201_s20 + $0x8] sm:$0xff]  ;;  %v2801_v55 = vld [vmem:[%s3190_s13 + $0x14] sm:$0xf0]  ;;  %v3282_v17 = vadd.s32 24, %v3231_v35 }
  0x1a   : > { %v2439_v23 = vor.u32 %v2800_v21, %v2438_v20  ;;  %v2466_v24 = vld [vmem:[%s3190_s13] sm:$0xf]  ;;  %v2806_v25 = vld [vmem:[%s3190_s13 + $0x4] sm:$0xf0]  ;;  %v2443_v56 = vor.u32 %v2801_v55, %v2442_v54  ;;  %v2396_v57 = vld [vmem:[%s3190_s13 + $0x14] sm:$0xf] }
  0x1b   : > { %v2467_v26 = vor.u32 %v2806_v25, %v2466_v24  ;;  %v2804_v27 = vld [vmem:[%s3201_s20] sm:$0xff]  ;;  %v2791_v58 = vld [vmem:[%s3190_s13 + $0x18] sm:$0xf0]  ;;  %v2790_v61 = vld [vmem:[%s3190_s13 + $0x8] sm:$0xf0]  ;;  %vm520_vm4 = vcmp.ge.s32.totalorder %v3282_v17, %v3233_v36 }
  0x1c   : > { %v2397_v59 = vor.u32 %v2791_v58, %v2396_v57  ;;  %v2392_v60 = vld [vmem:[%s3190_s13 + $0x4] sm:$0xf]  ;;  %v2799_v24 = vld [vmem:[%s3201_s20 + $0x8] sm:$0xff] }
  0x1d   : > { %v2393_v62 = vor.u32 %v2790_v61, %v2392_v60 }
  0x1e   : > { %659 = vmatpush.bf16.msra.mxu1 %v2397_v59  ;;  %2884 = vmatpush.bf16.msra.mxu3 %v2397_v59 }
  0x20   : > { %573 = vmatpush.bf16.xpose.msra.mxu0 %v561_v14  ;;  %717 = vrot.lane.b32.xlu1 %v2411_v13, %s3098_s17 }
  0x22   : > { %660 = vmatpush.bf16.msra.mxu1 %v2393_v62  ;;  %2885 = vmatpush.bf16.msra.mxu3 %v2393_v62 }
  0x27   : > { %2388 = vmatmul.msk.bf16.vlgmr.msra.gmra.mxu0 %vm553_vm0, %v2786_v15 }
  0x28   : > { %705 = vrot.lane.b32.xlu1 %v2793_v16, %s3098_s17 }
  0x30   : > { %1093 = vrot.lane.b32.xlu1 %v2471_v19, %s3099_s22 }
  0x37   : > { %2389 = vmatmul.msk.bf16.gmra.mxu0 %vm553_vm0, %v2787_v22 }
  0x38   : > { %904 = vrot.lane.b32.xlu1 %v2439_v23, %s3100_s23 }
  0x40   : > { %1091 = vrot.lane.b32.xlu1 %v2467_v26, %s3099_s22 }
  0x48   : > { %1077 = vrot.lane.b32.xlu1 %v2804_v27, %s3099_s22  ;;  %v2798_v27 = vld [vmem:[%s3201_s20] sm:$0xff] }
  0x71   : > { %v704_v32 = vpop.permute.xlu2 %703 }
  0x8a   : > { %v720_v28 = vpop.permute.xlu1 %719 }
  0x8b   : > { %v731_v29 = vsel %vm553_vm0, %v720_v28, 0  ;;  %v2805_v28 = vld [vmem:[%s3201_s20 + $0x8] sm:$0xff] }
  0x8c   : > { %739 = vmatpush.bf16.xpose.msra.mxu2 %v731_v29 }
  0x92   : > { %v718_v30 = vpop.permute.xlu1 %717 }
  0x93   : > { %v728_v31 = vsel %vm553_vm0, %v718_v30, 0 }
  0x94   : > { %740 = vmatpush.bf16.xpose.msra.mxu2 %v728_v31 }
  0x9a   : > { %v706_v34 = vpop.permute.xlu1 %705 }
  0x9b   : > { %2416 = vmatmul.msk.bf16.vlgmr.msra.gmra.mxu2 %vm553_vm0, %v704_v32 }
  0xa2   : > { %v1094_v37 = vpop.permute.xlu1 %1093 }
  0xa3   : > { %v1105_v39 = vsel %vm553_vm0, %v1094_v37, 0 }
  0xa4   : > { %v575_v38 = vpop.f32.mrf.mxu0  ;;  %1113 = vmatpush.bf16.xpose.msrb.mxu0 %v1105_v39 }
  0xa5   : > { %v585_v40 = vsel %vm517_vm1, %v575_v38, -inf }
  0xa6   : > { %v589_v41 = vsel %vm553_vm0, %v585_v40, -inf }
  0xa7   : > { %590 = vmax.xlane.f32.xlu0 %v589_v41 }
  0xaa   : > { %v3248_v43 = vpop.permute.xlu1 %904 }
  0xab   : > { %2417 = vmatmul.msk.bf16.gmra.mxu2 %vm553_vm0, %v706_v34  ;;  %v915_v26 = vsel %vm553_vm0, %v3248_v43, 0  ;;  %v2424_v43 = vld [vmem:[%s3190_s13 + $0x14] sm:$0xf] }
  0xac   : > { %v577_v44 = vpop.f32.mrf.mxu0 }
  0xad   : > { %v586_v45 = vsel %vm518_vm2, %v577_v44, -inf  ;;  %v2797_v44 = vld [vmem:[%s3190_s13 + $0x18] sm:$0xf0] }
  0xae   : > { %v592_v46 = vsel %vm553_vm0, %v586_v45, -inf }
  0xaf   : > { %593 = vmax.xlane.f32.xlu0 %v592_v46 }
  0xb2   : > { %v1092_v48 = vpop.permute.xlu1 %1091 }
  0xb3   : > { %v1102_v50 = vsel %vm553_vm0, %v1092_v48, 0 }
  0xb4   : > { %v580_v49 = vpop.f32.mrf.mxu0  ;;  %1114 = vmatpush.bf16.xpose.msrb.mxu0 %v1102_v50 }
  0xb5   : > { %v587_v51 = vsel %vm519_vm3, %v580_v49, -inf }
  0xb6   : > { %v595_v52 = vsel %vm553_vm0, %v587_v51, -inf }
  0xb7   : > { %596 = vmax.xlane.f32.xlu1 %v595_v52 }
  0xba   : > { %v1078_v53 = vpop.permute.xlu1 %1077 }
  0xbb   : > { %2472 = vmatmul.msk.bf16.vlgmr.msrb.gmra.mxu0 %vm553_vm0, %v1078_v53 }
  0xbc   : > { %v582_v29 = vpop.f32.mrf.mxu0 }
  0xbd   : > { %v588_v37 = vsel %vm520_vm4, %v582_v29, -inf }
  0xbe   : > { %v598_v38 = vsel %vm553_vm0, %v588_v37, -inf }
  0xc3   : > { %906 = vrot.lane.b32.xlu0 %v2443_v56, %s3100_s23 }
 0x11a   : > { %v591_v63 = vpop.xlane.xlu0 %590 }
 0x11b   : > { %v601_v0 = vsub.f32 %v585_v40, %v591_v63 }
 0x11d   : > { %v605_v1 = vmul.f32 1.442695, %v601_v0 }
 0x11e   : > { %v742_v2 = vpop.f32.mrf.mxu2 }
 0x11f   : > { %2931 = vpow2.f32 %v605_v1  ;;  %v752_v30 = vsel %vm517_vm1, %v742_v2, -inf }
 0x120   : > { %v756_v31 = vsel %vm553_vm0, %v752_v30, -inf }
 0x122   : > { %v594_v3 = vpop.xlane.xlu0 %593 }
 0x123   : > { %v602_v4 = vsub.f32 %v586_v45, %v594_v3  ;;  %v2425_v45 = vor.u32 %v2797_v44, %v2424_v43 }
 0x125   : > { %v2932_v5 = vpop.eup %2931  ;;  %v607_v6 = vmul.f32 1.442695, %v602_v4 }
 0x126   : > { %v613_v7 = vsel %vm553_vm0, %v2932_v5, 0.0  ;;  %v744_v8 = vpop.f32.mrf.mxu2 }
 0x127   : > { %2933 = vpow2.f32 %v607_v6  ;;  %614 = vadd.xlane.f32.xlu2 %v613_v7  ;;  %v3276_v9 = vsel %vm518_vm2, %v744_v8, -inf }
 0x128   : > { %v759_v10 = vsel %vm553_vm0, %v3276_v9, -inf }
 0x129   : > { %760 = vmax.xlane.f32.xlu1 %v759_v10 }
 0x12a   : > { %v597_v11 = vpop.xlane.xlu1 %596 }
 0x12b   : > { %v603_v12 = vsub.f32 %v587_v51, %v597_v11 }
 0x12d   : > { %v2934_v13 = vpop.eup %2933  ;;  %v609_v14 = vmul.f32 1.442695, %v603_v12 }
 0x12e   : > { %v616_v15 = vsel %vm553_vm0, %v2934_v13, 0.0  ;;  %v747_v16 = vpop.f32.mrf.mxu2 }
 0x12f   : > { %2935 = vpow2.f32 %v609_v14  ;;  %617 = vadd.xlane.f32.xlu0 %v616_v15  ;;  %v754_v55 = vsel %vm519_vm3, %v747_v16, -inf }
 0x130   : > { %v762_v56 = vsel %vm553_vm0, %v754_v55, -inf }
 0x135   : > { %v3284_v18 = vpop.eup %2935  ;;  %v907_v19 = vpop.permute.xlu0 %906 }
 0x136   : > { %v918_v20 = vsel %vm553_vm0, %v907_v19, 0  ;;  %v619_v21 = vsel %vm553_vm0, %v3284_v18, 0.0  ;;  %v749_v22 = vpop.f32.mrf.mxu2 }
 0x137   : > { %926 = vmatpush.bf16.xpose.msrb.mxu1 %v918_v20  ;;  %620 = vadd.xlane.f32.xlu1 %v619_v21  ;;  %v3294_v23 = vsel %vm520_vm4, %v749_v22, -inf }
 0x138   : > { %v765_v25 = vsel %vm553_vm0, %v3294_v23, -inf  ;;  %v1116_v32 = vpop.f32.mrf.mxu0 }
 0x139   : > { %v3313_v33 = vsel %vm517_vm1, %v1116_v32, -inf }
 0x13a   : > { %v1130_v34 = vsel %vm553_vm0, %v3313_v33, -inf }
 0x13f   : > { %892 = vrot.lane.b32.xlu2 %v2799_v24, %s3100_s23  ;;  %927 = vmatpush.bf16.xpose.msrb.mxu1 %v915_v26 }
 0x140   : > { %766 = vmax.xlane.f32.xlu1 %v765_v25  ;;  %v1118_v39 = vpop.f32.mrf.mxu0 }
 0x141   : > { %v3324_v40 = vsel %vm518_vm2, %v1118_v39, -inf }
 0x142   : > { %v1133_v41 = vsel %vm553_vm0, %v3324_v40, -inf }
 0x143   : > { %890 = vrot.lane.b32.xlu0 %v2798_v27, %s3100_s23 }
 0x14b   : > { %1079 = vrot.lane.b32.xlu0 %v2805_v28, %s3099_s22 }
 0x168   : > { %757 = vmax.xlane.f32.xlu2 %v756_v31 }
 0x170   : > { %1131 = vmax.xlane.f32.xlu2 %v1130_v34 }
 0x175   : > { %599 = vmax.xlane.f32.xlu0 %v598_v38 }
 0x17d   : > { %1134 = vmax.xlane.f32.xlu0 %v1133_v41 }
 0x191   : > { %814 = vrot.lane.b32.xlu0 %v2425_v45, %s3098_s17 }
 0x19a   : > { %v615_v46 = vpop.xlane.xlu2 %614 }
 0x19b   : > { %2937 = vrcp.f32 %v615_v46 }
 0x19c   : > { %v761_v8 = vpop.xlane.xlu1 %760 }
 0x19d   : > { %v769_v14 = vsub.f32 %v3276_v9, %v761_v8 }
 0x19f   : > { %v774_v19 = vmul.f32 1.442695, %v769_v14 }
 0x1a1   : > { %v2938_v49 = vpop.eup %2937 }
 0x1a2   : > { %v618_v48 = vpop.xlane.xlu0 %617  ;;  %v629_v51 = vmul.f32 %v2938_v49, %v2932_v5  ;;  %v893_v58 = vpop.permute.xlu2 %892 }
 0x1a3   : > { %2939 = vrcp.f32 %v618_v48 }
 0x1a9   : > { %v2940_v50 = vpop.eup %2939 }
 0x1aa   : > { %v630_v52 = vmul.f32 %v2940_v50, %v2934_v13  ;;  %v3355_v16 = vpop.xlane.xlu1 %620 }
 0x1ac   : > { %v633_v53 = vpack.c.bf16 %v630_v52, %v629_v51  ;;  %v2420_v52 = vld [vmem:[%s3190_s13 + $0x4] sm:$0xf] }
 0x1ae   : > { %2398 = vmatmul.msk.bf16.vlgmr.msra.gmra.mxu1 %vm553_vm0, %v633_v53  ;;  %v2796_v53 = vld [vmem:[%s3190_s13 + $0x8] sm:$0xf0] }
 0x1b5   : > { %v891_v54 = vpop.permute.xlu0 %890 }
 0x1bb   : > { %763 = vmax.xlane.f32.xlu0 %v762_v56  ;;  %v2803_v56 = vld [vmem:[%s3190_s13 + $0x18] sm:$0xf0] }
 0x1bd   : > { %v1080_v57 = vpop.permute.xlu0 %1079 }
 0x1be   : > { %2444 = vmatmul.msk.bf16.vlgmr.msrb.gmra.mxu1 %vm553_vm0, %v891_v54  ;;  %2473 = vmatmul.msk.bf16.gmra.mxu0 %vm553_vm0, %v1080_v57  ;;  %v2421_v54 = vor.u32 %v2796_v53, %v2420_v52 }
 0x1ce   : > { %2445 = vmatmul.msk.bf16.gmra.mxu1 %vm553_vm0, %v893_v58  ;;  %v2480_v58 = vld [vmem:[%s3190_s13 + $0x14] sm:$0xf] }
 0x1db   : > { %v758_v59 = vpop.xlane.xlu2 %757 }
 0x1dc   : > { %v768_v60 = vsub.f32 %v752_v30, %v758_v59  ;;  %v767_v30 = vpop.xlane.xlu1 %766  ;;  %v2809_v59 = vld [vmem:[%s3190_s13 + $0x18] sm:$0xf0] }
 0x1de   : > { %v772_v61 = vmul.f32 1.442695, %v768_v60  ;;  %v2481_v60 = vor.u32 %v2809_v59, %v2480_v58 }
 0x1e0   : > { %2941 = vpow2.f32 %v772_v61 }
 0x1e3   : > { %v1132_v43 = vpop.xlane.xlu2 %1131 }
 0x1e4   : > { %v1142_v47 = vsub.f32 %v3313_v33, %v1132_v43  ;;  %v2448_v43 = vld [vmem:[%s3190_s13 + $0x4] sm:$0xf] }
 0x1e6   : > { %v3339_v62 = vpop.eup %2941  ;;  %v1146_v50 = vmul.f32 1.442695, %v1142_v47 }
 0x1e7   : > { %v780_v63 = vsel %vm553_vm0, %v3339_v62, 0.0 }
 0x1e8   : > { %781 = vadd.xlane.f32.xlu1 %v780_v63  ;;  %v600_v0 = vpop.xlane.xlu0 %599 }
 0x1e9   : > { %v604_v7 = vsub.f32 %v588_v37, %v600_v0  ;;  %v771_v37 = vsub.f32 %v3294_v23, %v767_v30 }
 0x1eb   : > { %v611_v10 = vmul.f32 1.442695, %v604_v7  ;;  %v778_v41 = vmul.f32 1.442695, %v771_v37  ;;  %v2476_v37 = vld [vmem:[%s3190_s13 + $0x4] sm:$0xf] }
 0x1ed   : > { %2943 = vpow2.f32 %v611_v10 }
 0x1ee   : > { %2945 = vpow2.f32 %v774_v19 }
 0x1f0   : > { %v3343_v1 = vpop.xlane.xlu0 %1134 }
 0x1f1   : > { %v1143_v61 = vsub.f32 %v3324_v40, %v3343_v1 }
 0x1f3   : > { %v3357_v21 = vpop.eup %2943  ;;  %v1148_v63 = vmul.f32 1.442695, %v1143_v61 }
 0x1f4   : > { %v622_v42 = vsel %vm553_vm0, %v3357_v21, 0.0  ;;  %v3380_v32 = vpop.eup %2945 }
 0x1f5   : > { %v783_v39 = vsel %vm553_vm0, %v3380_v32, 0.0 }
 0x203   : > { %v815_v2 = vpop.permute.xlu0 %814 }
 0x204   : > { %830 = vmatpush.bf16.msrb.mxu3 %v815_v2 }
 0x22b   : > { %v662_v3 = vpop.f32.mrf.mxu1 }
 0x22c   : > { %v672_v4 = vpack.c.bf16 %v662_v3, %v662_v3 }
 0x22e   : > { %677 = vst.msk [vmem:[#allocation2] sm:$0xf] %vm676_vm5, %v672_v4  ;;  %v764_v20 = vpop.xlane.xlu0 %763 }
 0x22f   : > { %v770_v26 = vsub.f32 %v754_v55, %v764_v20  ;;  %v2452_v55 = vld [vmem:[%s3190_s13 + $0x14] sm:$0xf] }
 0x230   : > { %v2453_v57 = vor.u32 %v2803_v56, %v2452_v55 }
 0x231   : > { %v776_v29 = vmul.f32 1.442695, %v770_v26 }
 0x233   : > { %v664_v5 = vpop.f32.mrf.mxu1  ;;  %2947 = vpow2.f32 %v776_v29 }
 0x234   : > { %v673_v6 = vpack.c.bf16 %v664_v5, %v664_v5  ;;  %2949 = vpow2.f32 %v778_v41 }
 0x235   : > { %2951 = vpow2.f32 %v1146_v50 }
 0x236   : > { %678 = vst.msk [vmem:[#allocation2 + $0x4] sm:$0xf] %vm676_vm5, %v673_v6  ;;  %2953 = vpow2.f32 %v1148_v63 }
 0x237   : > { %2955 = vrcp.f32 %v3355_v16 }
 0x239   : > { %v3392_v44 = vpop.eup %2947 }
 0x23a   : > { %v786_v49 = vsel %vm553_vm0, %v3392_v44, 0.0  ;;  %v3406_v36 = vpop.eup %2949 }
 0x23b   : > { %v929_v11 = vpop.f32.mrf.mxu1  ;;  %v1121_v12 = vpop.f32.mrf.mxu0  ;;  %v789_v17 = vsel %vm553_vm0, %v3406_v36, 0.0 }
 0x23c   : > { %v3350_v13 = vsel %vm519_vm3, %v1121_v12, -inf  ;;  %v3378_v31 = vsel %vm517_vm1, %v929_v11, -inf  ;;  %v3410_v33 = vpop.eup %2951 }
 0x23d   : > { %v1136_v15 = vsel %vm553_vm0, %v3350_v13, -inf  ;;  %v943_v38 = vsel %vm553_vm0, %v3378_v31, -inf  ;;  %v1154_v51 = vsel %vm553_vm0, %v3410_v33, 0.0  ;;  %v3425_v0 = vpop.eup %2953 }
 0x23e   : > { %1137 = vmax.xlane.f32.xlu2 %v1136_v15  ;;  %v1157_v2 = vsel %vm553_vm0, %v3425_v0, 0.0  ;;  %v2956_v8 = vpop.eup %2955 }
 0x23f   : > { %v631_v15 = vmul.f32 %v2956_v8, %v3284_v18 }
 0x243   : > { %v931_v22 = vpop.f32.mrf.mxu1  ;;  %v1123_v24 = vpop.f32.mrf.mxu0 }
 0x244   : > { %v3362_v25 = vsel %vm518_vm2, %v931_v22, -inf  ;;  %v3367_v9 = vsel %vm520_vm4, %v1123_v24, -inf }
 0x245   : > { %v946_v27 = vsel %vm553_vm0, %v3362_v25, -inf  ;;  %v1139_v28 = vsel %vm553_vm0, %v3367_v9, -inf }
 0x246   : > { %947 = vmax.xlane.f32.xlu1 %v946_v27  ;;  %1140 = vmax.xlane.f32.xlu0 %v1139_v28 }
 0x247   : > { %623 = vadd.xlane.f32.xlu2 %v622_v42 }
 0x24b   : > { %v934_v34 = vpop.f32.mrf.mxu1 }
 0x24c   : > { %v3390_v35 = vsel %vm519_vm3, %v934_v34, -inf }
 0x24d   : > { %v949_v23 = vsel %vm553_vm0, %v3390_v35, -inf }
 0x24e   : > { %944 = vmax.xlane.f32.xlu0 %v943_v38  ;;  %v2808_v38 = vld [vmem:[%s3190_s13 + $0x8] sm:$0xf0] }
 0x24f   : > { %784 = vadd.xlane.f32.xlu2 %v783_v39 }
 0x253   : > { %v936_v45 = vpop.f32.mrf.mxu1 }
 0x254   : > { %v3399_v46 = vsel %vm520_vm4, %v936_v45, -inf  ;;  %v2802_v45 = vld [vmem:[%s3190_s13 + $0x8] sm:$0xf0] }
 0x255   : > { %v952_v48 = vsel %vm553_vm0, %v3399_v46, -inf }
 0x256   : > { %953 = vmax.xlane.f32.xlu1 %v952_v48  ;;  %950 = vmax.xlane.f32.xlu0 %v949_v23 }
 0x257   : > { %787 = vadd.xlane.f32.xlu2 %v786_v49  ;;  %v2449_v49 = vor.u32 %v2802_v45, %v2448_v43 }
 0x25b   : > { %v782_v3 = vpop.xlane.xlu1 %781 }
 0x25f   : > { %790 = vadd.xlane.f32.xlu2 %v789_v17 }
 0x267   : > { %1155 = vadd.xlane.f32.xlu2 %v1154_v51 }
 0x26f   : > { %812 = vrot.lane.b32.xlu1 %v2421_v54, %s3098_s17 }
 0x27f   : > { %1001 = vrot.lane.b32.xlu2 %v2453_v57, %s3100_s23 }
 0x287   : > { %1188 = vrot.lane.b32.xlu2 %v2481_v60, %s3099_s22 }
 0x299   : > { %1158 = vadd.xlane.f32.xlu1 %v1157_v2 }
 0x2b1   : > { %v1138_v4 = vpop.xlane.xlu2 %1137 }
 0x2b2   : > { %v1144_v28 = vsub.f32 %v3350_v13, %v1138_v4 }
 0x2b4   : > { %v1150_v29 = vmul.f32 1.442695, %v1144_v28 }
 0x2b9   : > { %v948_v5 = vpop.xlane.xlu1 %947  ;;  %v3430_v6 = vpop.xlane.xlu0 %1140 }
 0x2ba   : > { %v956_v7 = vsub.f32 %v3362_v25, %v948_v5  ;;  %v624_v40 = vpop.xlane.xlu2 %623  ;;  %v1145_v60 = vsub.f32 %v3367_v9, %v3430_v6 }
 0x2bb   : > { %2957 = vrcp.f32 %v624_v40 }
 0x2bc   : > { %v961_v1 = vmul.f32 1.442695, %v956_v7  ;;  %v1152_v61 = vmul.f32 1.442695, %v1145_v60 }
 0x2be   : > { %2959 = vpow2.f32 %v961_v1 }
 0x2c1   : > { %v2958_v10 = vpop.eup %2957  ;;  %v945_v11 = vpop.xlane.xlu0 %944 }
 0x2c2   : > { %v785_v12 = vpop.xlane.xlu2 %784  ;;  %v955_v14 = vsub.f32 %v3378_v31, %v945_v11  ;;  %v632_v19 = vmul.f32 %v2958_v10, %v3357_v21 }
 0x2c4   : > { %v3436_v16 = vpop.eup %2959  ;;  %v959_v20 = vmul.f32 1.442695, %v955_v14  ;;  %v634_v22 = vpack.c.bf16 %v632_v19, %v631_v15 }
 0x2c5   : > { %v970_v24 = vsel %vm553_vm0, %v3436_v16, 0.0 }
 0x2c6   : > { %2961 = vpow2.f32 %v959_v20  ;;  %2399 = vmatmul.msk.bf16.vlgmr.msra.gmra.mxu3 %vm553_vm0, %v634_v22  ;;  %971 = vadd.xlane.f32.xlu2 %v970_v24 }
 0x2c9   : > { %v951_v25 = vpop.xlane.xlu0 %950  ;;  %v954_v13 = vpop.xlane.xlu1 %953 }
 0x2ca   : > { %v788_v26 = vpop.xlane.xlu2 %787  ;;  %v957_v27 = vsub.f32 %v3390_v35, %v951_v25  ;;  %v2477_v35 = vor.u32 %v2808_v38, %v2476_v37  ;;  %v958_v58 = vsub.f32 %v3399_v46, %v954_v13 }
 0x2cc   : > { %v3442_v18 = vpop.eup %2961  ;;  %v963_v21 = vmul.f32 1.442695, %v957_v27  ;;  %v965_v59 = vmul.f32 1.442695, %v958_v58 }
 0x2cd   : > { %v967_v42 = vsel %vm553_vm0, %v3442_v18, 0.0 }
 0x2ce   : > { %968 = vadd.xlane.f32.xlu0 %v967_v42  ;;  %2963 = vpow2.f32 %v963_v21 }
 0x2cf   : > { %2965 = vpow2.f32 %v1150_v29 }
 0x2d0   : > { %2967 = vrcp.f32 %v785_v12 }
 0x2d1   : > { %2969 = vrcp.f32 %v782_v3 }
 0x2d2   : > { %v791_v30 = vpop.xlane.xlu2 %790 }
 0x2d3   : > { %2971 = vrcp.f32 %v791_v30 }
 0x2d4   : > { %v3447_v31 = vpop.eup %2963  ;;  %2973 = vrcp.f32 %v788_v26 }
 0x2d5   : > { %v973_v34 = vsel %vm553_vm0, %v3447_v31, 0.0  ;;  %v3453_v41 = vpop.eup %2965  ;;  %2975 = vpow2.f32 %v965_v59 }
 0x2d6   : > { %974 = vadd.xlane.f32.xlu1 %v973_v34  ;;  %v2968_v23 = vpop.eup %2967  ;;  %v1160_v48 = vsel %vm553_vm0, %v3453_v41, 0.0  ;;  %2977 = vpow2.f32 %v1152_v61  ;;  %v2819_v61 = vld [vmem:[#allocation3 + $0x38] sm:$0xff] }
 0x2d7   : > { %v2970_v47 = vpop.eup %2969  ;;  %v797_v50 = vmul.f32 %v2968_v23, %v3380_v32  ;;  %1326 = vmatpush.bf16.msra.mxu1 %v2819_v61  ;;  %v2640_v61 = vld [vmem:[%s3971_s7 + $0xf0] sm:$0xf0] }
 0x2d8   : > { %v796_v17 = vmul.f32 %v2970_v47, %v3339_v62 }
 0x2d9   : > { %v2972_v55 = vpop.eup %2971 }
 0x2da   : > { %v1156_v39 = vpop.xlane.xlu2 %1155  ;;  %v800_v53 = vpack.c.bf16 %v797_v50, %v796_v17  ;;  %v2974_v56 = vpop.eup %2973  ;;  %v799_v32 = vmul.f32 %v2972_v55, %v3406_v36 }
 0x2db   : > { %v798_v57 = vmul.f32 %v2974_v56, %v3392_v44  ;;  %v2976_v63 = vpop.eup %2975 }
 0x2dc   : > { %v976_v2 = vsel %vm553_vm0, %v2976_v63, 0.0  ;;  %v2978_v3 = vpop.eup %2977 }
 0x2dd   : > { %v801_v62 = vpack.c.bf16 %v799_v32, %v798_v57  ;;  %v1163_v36 = vsel %vm553_vm0, %v2978_v3, 0.0 }
 0x2de   : > { %1186 = vrot.lane.b32.xlu2 %v2477_v35, %s3099_s22  ;;  %1161 = vadd.xlane.f32.xlu1 %v1160_v48 }
 0x2e1   : > { %v813_v51 = vpop.permute.xlu1 %812 }
 0x2e2   : > { %831 = vmatpush.bf16.msrb.mxu3 %v813_v51  ;;  %999 = vrot.lane.b32.xlu0 %v2449_v49, %s3100_s23  ;;  %v1002_v52 = vpop.permute.xlu2 %1001 }
 0x2e5   : > { %2426 = vmatmul.msk.bf16.vlgmr.msrb.gmra.mxu3 %vm553_vm0, %v800_v53 }
 0x2e6   : > { %1017 = vmatpush.bf16.msra.mxu3 %v1002_v52 }
 0x2ea   : > { %v1189_v54 = vpop.permute.xlu2 %1188 }
 0x2eb   : > { %1204 = vmatpush.bf16.msrb.mxu2 %v1189_v54 }
 0x2f5   : > { %2427 = vmatmul.msk.bf16.gmra.mxu3 %vm553_vm0, %v801_v62 }
 0x307   : > { %977 = vadd.xlane.f32.xlu2 %v976_v2  ;;  %v2817_v2 = vld [vmem:[#allocation3 + $0x28] sm:$0xff] }
 0x30c   : > { %1164 = vadd.xlane.f32.xlu0 %v1163_v36  ;;  %v1159_v44 = vpop.xlane.xlu1 %1158  ;;  %v2815_v36 = vld [vmem:[#allocation3 + $0x18] sm:$0xff] }
 0x30d   : > { %2979 = vrcp.f32 %v1159_v44  ;;  %v2814_v44 = vld [vmem:[#allocation3 + $0x10] sm:$0xff] }
 0x30e   : > { %2981 = vrcp.f32 %v1156_v39 }
 0x313   : > { %v2980_v4 = vpop.eup %2979 }
 0x314   : > { %v2982_v5 = vpop.eup %2981  ;;  %v1171_v7 = vmul.f32 %v2980_v4, %v3425_v0  ;;  %v2813_v4 = vld [vmem:[#allocation3 + $0x8] sm:$0xff] }
 0x315   : > { %v1170_v9 = vmul.f32 %v2982_v5, %v3410_v33 }
 0x317   : > { %v1174_v40 = vpack.c.bf16 %v1171_v7, %v1170_v9  ;;  %v2812_v7 = vld [vmem:[#allocation3] sm:$0xff] }
 0x339   : > { %v972_v46 = vpop.xlane.xlu2 %971 }
 0x341   : > { %v1187_v6 = vpop.permute.xlu2 %1186  ;;  %v969_v1 = vpop.xlane.xlu0 %968 }
 0x342   : > { %1205 = vmatpush.bf16.msrb.mxu2 %v1187_v6  ;;  %2983 = vrcp.f32 %v969_v1 }
 0x343   : > { %2985 = vrcp.f32 %v972_v46 }
 0x345   : > { %2482 = vmatmul.msk.bf16.vlgmr.msrb.gmra.mxu2 %vm553_vm0, %v1174_v40 }
 0x348   : > { %v2984_v11 = vpop.eup %2983 }
 0x349   : > { %v667_v8 = vpop.f32.mrf.mxu3  ;;  %v2986_v12 = vpop.eup %2985  ;;  %v983_v15 = vmul.f32 %v2984_v11, %v3442_v18 }
 0x34a   : > { %v674_v10 = vpack.c.bf16 %v667_v8, %v667_v8  ;;  %v984_v33 = vmul.f32 %v2986_v12, %v3436_v16  ;;  %v975_v26 = vpop.xlane.xlu1 %974 }
 0x34b   : > { %2987 = vrcp.f32 %v975_v26 }
 0x34c   : > { %679 = vst.msk [vmem:[#allocation2 + $0x8] sm:$0xf] %vm676_vm5, %v674_v10  ;;  %v987_v20 = vpack.c.bf16 %v984_v33, %v983_v15  ;;  %v500_v33 = vld [vmem:[%s472_s26] sm:$0xff] }
 0x351   : > { %v669_v14 = vpop.f32.mrf.mxu3  ;;  %v2988_v16 = vpop.eup %2987 }
 0x352   : > { %v675_v0 = vpack.c.bf16 %v669_v14, %v669_v14  ;;  %v1162_v21 = vpop.xlane.xlu1 %1161  ;;  %v985_v29 = vmul.f32 %v2988_v16, %v3447_v31 }
 0x354   : > { %680 = vst.msk [vmem:[#allocation2 + $0xc] sm:$0xf] %vm676_vm5, %v675_v0  ;;  %v1000_v19 = vpop.permute.xlu0 %999  ;;  %v2927_v0 = vld [vmem:[%s3968_s4] ss:$0 sm:$0xff] }
 0x355   : > { %1018 = vmatpush.bf16.msra.mxu3 %v1000_v19 }
 0x358   : > { %2454 = vmatmul.msk.bf16.vlgmr.msra.gmra.mxu3 %vm553_vm0, %v987_v20 }
 0x368   : > { %v833_v22 = vpop.f32.mrf.mxu3 }
 0x369   : > { %v843_v24 = vpack.c.bf16 %v833_v22, %v833_v22 }
 0x36b   : > { %851 = vrot.lane.b32.xlu1 %v843_v24, %s3099_s22  ;;  %v501_v24 = vld [vmem:[%s472_s26 + $0x8] sm:$0xff] }
 0x370   : > { %v835_v25 = vpop.f32.mrf.mxu3 }
 0x371   : > { %v844_v27 = vpack.c.bf16 %v835_v25, %v835_v25 }
 0x373   : > { %853 = vrot.lane.b32.xlu1 %v844_v27, %s3099_s22 }
 0x378   : > { %v838_v45 = vpop.f32.mrf.mxu3 }
 0x379   : > { %v845_v54 = vpack.c.bf16 %v838_v45, %v838_v45 }
 0x37a   : > { %v978_v18 = vpop.xlane.xlu2 %977 }
 0x37b   : > { %2989 = vrcp.f32 %v978_v18  ;;  %v502_v18 = vld [vmem:[%s472_s26 + $0x10] sm:$0xff] }
 0x37c   : > { %2991 = vrcp.f32 %v1162_v21 }
 0x37f   : > { %v1165_v28 = vpop.xlane.xlu0 %1164 }
 0x380   : > { %2993 = vrcp.f32 %v1165_v28  ;;  %v840_v31 = vpop.f32.mrf.mxu3 }
 0x381   : > { %v2990_v42 = vpop.eup %2989  ;;  %v846_v51 = vpack.c.bf16 %v840_v31, %v840_v31 }
 0x382   : > { %v986_v30 = vmul.f32 %v2990_v42, %v2976_v63  ;;  %v2992_v34 = vpop.eup %2991  ;;  %v2818_v63 = vld [vmem:[#allocation3 + $0x30] sm:$0xff]  ;;  %v503_v42 = vld [vmem:[%s472_s26 + $0x18] sm:$0xff] }
 0x383   : > { %v1172_v13 = vmul.f32 %v2992_v34, %v3453_v41  ;;  %1327 = vmatpush.bf16.msra.mxu1 %v2818_v63  ;;  %v2646_v63 = vld [vmem:[%s3971_s7 + $0xe8] sm:$0xf] }
 0x384   : > { %v988_v37 = vpack.c.bf16 %v986_v30, %v985_v29 }
 0x386   : > { %v2994_v38 = vpop.eup %2993  ;;  %2455 = vmatmul.msk.bf16.gmra.mxu3 %vm553_vm0, %v988_v37  ;;  %v3101_v37 = vmov 128.0  }
 0x387   : > { %v1173_v39 = vmul.f32 %v2994_v38, %v2978_v3  ;;  %1328 = vmatpush.bf16.msra.mxu1 %v2817_v2  ;;  %v2816_v3 = vld [vmem:[#allocation3 + $0x20] sm:$0xff]  ;;  %2995 = vrcp.f32 %v3101_v37  ;;  %v2851_v2 = vld [vmem:[%s3971_s7 + $0xf4] sm:$0xf0] }
 0x388   : > { %v2838_v37 = vld [vmem:[%s3971_s7 + $0x8c] sm:$0xf0] }
 0x389   : > { %v1175_v35 = vpack.c.bf16 %v1173_v39, %v1172_v13 }
 0x38b   : > { %2483 = vmatmul.msk.bf16.gmra.mxu2 %vm553_vm0, %v1175_v35  ;;  %1329 = vmatpush.bf16.msra.mxu1 %v2816_v3 }
 0x38d   : > { %v2996_v38 = vpop.eup %2995 }
 0x38e   : > { %v1360_v13 = vmul.f32 128.0, %v2996_v38  ;;  %vm1364_vm9 = vweird.f32 %v2996_v38 }
 0x38f   : > { %1330 = vmatpush.bf16.msra.mxu1 %v2815_v36  ;;  %v2647_v36 = vor.u32 %v2851_v2, %v2646_v63  ;;  %v2558_v63 = vld [vmem:[%s3971_s7 + $0x40] sm:$0xf]  ;;  %v2830_v2 = vld [vmem:[%s3971_s7 + $0x4c] sm:$0xf0] }
 0x390   : > { %v1361_v39 = vsub.f32 1.0, %v1360_v13 }
 0x391   : > { %1694 = vmatpush.bf16.msra.mxu2 %v2647_v36  ;;  %v2559_v36 = vor.u32 %v2830_v2, %v2558_v63  ;;  %v2928_v63 = vld [vmem:[%s3970_s6] ss:$0 sm:$0xff] }
 0x392   : > { %v1362_v35 = vmul.f32 %v2996_v38, %v1361_v39  ;;  %v2592_v39 = vld [vmem:[%s3971_s7 + $0x90] sm:$0xf0] }
 0x393   : > { %1331 = vmatpush.bf16.msra.mxu1 %v2814_v44  ;;  %v2849_v44 = vld [vmem:[%s3971_s7 + $0xec] sm:$0xf] }
 0x397   : > { %1332 = vmatpush.bf16.msra.mxu1 %v2813_v4 }
 0x39b   : > { %1333 = vmatpush.bf16.msra.mxu1 %v2812_v7  ;;  %v2846_v7 = vld [vmem:[%s3971_s7 + $0xcc] sm:$0xf0] }
 0x3c8   : > { %v1207_v43 = vpop.f32.mrf.mxu2 }
 0x3c9   : > { %v1217_v23 = vpack.c.bf16 %v1207_v43, %v1207_v43  ;;  %v1363_v43 = vadd.f32 %v2996_v38, %v1362_v35  ;;  %v2598_v35 = vld [vmem:[%s3971_s7 + $0x88] sm:$0xf] }
 0x3cb   : > { %1225 = vrot.lane.b32.xlu0 %v1217_v23, %s3098_s17  ;;  %v3527_v45 = vsel %vm1364_vm9, %v2996_v38, %v1363_v43  ;;  %v2836_v38 = vld [vmem:[%s3971_s7 + $0x84] sm:$0xf]  ;;  %v2839_v43 = vld [vmem:[%s3971_s7 + $0x94] sm:$0xf0] }
 0x3d0   : > { %v1209_v47 = vpop.f32.mrf.mxu2 }
 0x3d1   : > { %v1218_v48 = vpack.c.bf16 %v1209_v47, %v1209_v47 }
 0x3d3   : > { %1227 = vrot.lane.b32.xlu1 %v1218_v48, %s3098_s17 }
 0x3db   : > { %v1020_v49 = vpop.f32.mrf.mxu3 }
 0x3dc   : > { %v1030_v50 = vpack.c.bf16 %v1020_v49, %v1020_v49 }
 0x3dd   : > { %v852_v17 = vpop.permute.xlu1 %851 }
 0x3de   : > { %864 = vst.msk [vmem:[#allocation2] sm:$0xf] %vm863_vm6, %v852_v17  ;;  %1038 = vrot.lane.b32.xlu2 %v1030_v50, %s3100_s23 }
 0x3e3   : > { %v1022_v41 = vpop.f32.mrf.mxu3 }
 0x3e4   : > { %v1031_v52 = vpack.c.bf16 %v1022_v41, %v1022_v41 }
 0x3e5   : > { %v854_v53 = vpop.permute.xlu1 %853 }
 0x3e6   : > { %865 = vst.msk [vmem:[#allocation2 + $0x4] sm:$0xf] %vm863_vm6, %v854_v53  ;;  %857 = vrot.lane.b32.xlu2 %v846_v51, %s3099_s22  ;;  %1040 = vrot.lane.b32.xlu1 %v1031_v52, %s3100_s23 }
 0x3ee   : > { %855 = vrot.lane.b32.xlu1 %v845_v54, %s3099_s22 }
 0x409   : > { %v1025_v55 = vpop.f32.mrf.mxu3 }
 0x40a   : > { %v1032_v56 = vpack.c.bf16 %v1025_v55, %v1025_v55 }
 0x40c   : > { %1042 = vrot.lane.b32.xlu0 %v1032_v56, %s3100_s23 }
 0x40e   : > { %v1212_v32 = vpop.f32.mrf.mxu2 }
 0x40f   : > { %v1219_v57 = vpack.c.bf16 %v1212_v32, %v1212_v32 }
 0x411   : > { %v1027_v62 = vpop.f32.mrf.mxu3  ;;  %1229 = vrot.lane.b32.xlu2 %v1219_v57, %s3098_s17 }
 0x412   : > { %v1033_v58 = vpack.c.bf16 %v1027_v62, %v1027_v62  ;;  %v2638_v62 = vld [vmem:[%s3971_s7 + $0xe0] sm:$0xf] }
 0x414   : > { %1044 = vrot.lane.b32.xlu1 %v1033_v58, %s3100_s23  ;;  %v2850_v58 = vld [vmem:[%s3971_s7 + $0xec] sm:$0xf0] }
 0x416   : > { %v1214_v59 = vpop.f32.mrf.mxu2 }
 0x417   : > { %v1220_v60 = vpack.c.bf16 %v1214_v59, %v1214_v59  ;;  %v2848_v59 = vld [vmem:[%s3971_s7 + $0xe4] sm:$0xf] }
 0x418   : > { %v2643_v3 = vor.u32 %v2848_v59, %v2640_v61  ;;  %v2833_v59 = vld [vmem:[%s3971_s7 + $0x6c] sm:$0xf] }
 0x419   : > { %1231 = vrot.lane.b32.xlu0 %v1220_v60, %s3098_s17  ;;  %v2639_v60 = vor.u32 %v2850_v58, %v2638_v62  ;;  %s3945_s17 = scalar_lea.vmem %s3975_s11, %s3184_s29 }
 0x41a   : > { %1675 = vmatpush.bf16.msra.mxu0 %v2643_v3  ;;  %v2828_v3 = vld [vmem:[%s3971_s7 + $0x44] sm:$0xf] }
 0x41b   : > { %1656 = vmatpush.bf16.msrb.mxu3 %v2639_v60  ;;  %v2584_v60 = vld [vmem:[%s3971_s7 + $0x78] sm:$0xf0] }
 0x41c   : > { %v2587_v61 = vor.u32 %v2833_v59, %v2584_v60 }
 0x438   : > { %v1039_v46 = vpop.permute.xlu2 %1038 }
 0x439   : > { %1051 = vst.msk [vmem:[#allocation2] sm:$0xf] %vm1050_vm7, %v1039_v46  ;;  %v2648_v46 = vld [vmem:[%s3971_s7 + $0xf8] sm:$0xf0] }
 0x43a   : > { %v2651_v4 = vor.u32 %v2849_v44, %v2648_v46  ;;  %v2560_v44 = vld [vmem:[%s3971_s7 + $0x50] sm:$0xf0]  ;;  %v2566_v46 = vld [vmem:[%s3971_s7 + $0x48] sm:$0xf] }
 0x43c   : > { %1713 = vmatpush.bf16.msrb.mxu1 %v2651_v4  ;;  %v2831_v4 = vld [vmem:[%s3971_s7 + $0x54] sm:$0xf0] }
 0x43d   : > { %v1226_v5 = vpop.permute.xlu0 %1225 }
 0x43e   : > { %1238 = vst.msk [vmem:[#allocation2] sm:$0xf] %vm1237_vm8, %v1226_v5  ;;  %v2622_v5 = vld [vmem:[%s3971_s7 + $0xc0] sm:$0xf] }
 0x440   : > { %v858_v9 = vpop.permute.xlu2 %857 }
 0x441   : > { %867 = vst.msk [vmem:[#allocation2 + $0xc] sm:$0xf] %vm863_vm6, %v858_v9  ;;  %v2844_v9 = vld [vmem:[%s3971_s7 + $0xc4] sm:$0xf] }
 0x445   : > { %v1228_v6 = vpop.permute.xlu1 %1227 }
 0x458   : > { %v1041_v40 = vpop.permute.xlu1 %1040 }
 0x459   : > { %1052 = vst.msk [vmem:[#allocation2 + $0x4] sm:$0xf] %vm1050_vm7, %v1041_v40  ;;  %v2624_v40 = vld [vmem:[%s3971_s7 + $0xd0] sm:$0xf0] }
 0x45a   : > { %1239 = vst.msk [vmem:[#allocation2 + $0x4] sm:$0xf] %vm1237_vm8, %v1228_v6  ;;  %v2623_v6 = vor.u32 %v2846_v7, %v2622_v5  ;;  %v2563_v5 = vor.u32 %v2828_v3, %v2560_v44  ;;  %v2567_v7 = vor.u32 %v2831_v4, %v2566_v46  ;;  %v2929_v46 = vld [vmem:[%s3969_s5] ss:$0 sm:$0xff] }
 0x45c   : > { %1657 = vmatpush.bf16.msrb.mxu3 %v2623_v6  ;;  %v2568_v6 = vld [vmem:[%s3971_s7 + $0x58] sm:$0xf0] }
 0x460   : > { %v856_v1 = vpop.permute.xlu1 %855 }
 0x461   : > { %866 = vst.msk [vmem:[#allocation2 + $0x8] sm:$0xf] %vm863_vm6, %v856_v1  ;;  %v2810_v8 = vld [vmem:[#allocation2] sm:$0xff]  ;;  %v2630_v1 = vld [vmem:[%s3971_s7 + $0xc8] sm:$0xf] }
 0x462   : > { %1334 = vmatmul.bf16.vlgmr.msra.gmra.mxu1 %v2810_v8  ;;  %v2847_v8 = vld [vmem:[%s3971_s7 + $0xd4] sm:$0xf0] }
 0x46b   : > { %v1230_v11 = vpop.permute.xlu2 %1229 }
 0x47e   : > { %v1043_v10 = vpop.permute.xlu0 %1042 }
 0x47f   : > { %1053 = vst.msk [vmem:[#allocation2 + $0x8] sm:$0xf] %vm1050_vm7, %v1043_v10  ;;  %v2627_v10 = vor.u32 %v2844_v9, %v2624_v40  ;;  %v2829_v9 = vld [vmem:[%s3971_s7 + $0x4c] sm:$0xf] }
 0x480   : > { %1240 = vst.msk [vmem:[#allocation2 + $0x8] sm:$0xf] %vm1237_vm8, %v1230_v11  ;;  %v2631_v11 = vor.u32 %v2847_v8, %v2630_v1  ;;  %v2571_v40 = vor.u32 %v2829_v9, %v2568_v6  ;;  %v2542_v1 = vld [vmem:[%s3971_s7 + $0x20] sm:$0xf]  ;;  %v2826_v8 = vld [vmem:[%s3971_s7 + $0x2c] sm:$0xf0] }
 0x481   : > { %1676 = vmatpush.bf16.msra.mxu0 %v2627_v10  ;;  %v2824_v10 = vld [vmem:[%s3971_s7 + $0x24] sm:$0xf] }
 0x482   : > { %1695 = vmatpush.bf16.msra.mxu2 %v2631_v11  ;;  %v2543_v11 = vor.u32 %v2826_v8, %v2542_v1 }
 0x486   : > { %v1045_v12 = vpop.permute.xlu1 %1044 }
 0x487   : > { %1054 = vst.msk [vmem:[#allocation2 + $0xc] sm:$0xf] %vm1050_vm7, %v1045_v12  ;;  %v2845_v12 = vld [vmem:[%s3971_s7 + $0xcc] sm:$0xf] }
 0x48b   : > { %v1232_v14 = vpop.permute.xlu0 %1231 }
 0x48c   : > { %1241 = vst.msk [vmem:[#allocation2 + $0xc] sm:$0xf] %vm1237_vm8, %v1232_v14  ;;  %v2632_v14 = vld [vmem:[%s3971_s7 + $0xd8] sm:$0xf0] }
 0x493   : > { %v2811_v15 = vld [vmem:[#allocation2 + $0x8] sm:$0xff] }
 0x494   : > { %1339 = vmatmul.bf16.gmra.mxu1 %v2811_v15  ;;  %v2635_v15 = vor.u32 %v2845_v12, %v2632_v14  ;;  %v2544_v12 = vld [vmem:[%s3971_s7 + $0x30] sm:$0xf0]  ;;  %v2550_v14 = vld [vmem:[%s3971_s7 + $0x28] sm:$0xf] }
 0x496   : > { %1714 = vmatpush.bf16.msrb.mxu1 %v2635_v15  ;;  %v2827_v15 = vld [vmem:[%s3971_s7 + $0x34] sm:$0xf0] }
 0x4df   : > { %v1335_v19 = vpop.f32.mrf.mxu1 }
 0x4e0   : > { %v1336_v20 = vadd.f32 %v2927_v0, %v1335_v19  ;;  %v2840_v19 = vld [vmem:[%s3971_s7 + $0xa4] sm:$0xf] }
 0x4e2   : > { %v3515_v22 = vadd.f32 %v1336_v20, %v500_v33  ;;  %v2842_v33 = vld [vmem:[%s3971_s7 + $0xac] sm:$0xf0] }
 0x4e4   : > { %1351 = vadd.xlane.f32.xlu1 %v3515_v22 }
 0x4e7   : > { %v1337_v25 = vpop.f32.mrf.mxu1 }
 0x4e8   : > { %v1338_v26 = vadd.f32 %v2927_v0, %v1337_v25  ;;  %v2614_v25 = vld [vmem:[%s3971_s7 + $0xa8] sm:$0xf] }
 0x4ea   : > { %v3518_v27 = vadd.f32 %v1338_v26, %v501_v24  ;;  %v2608_v24 = vld [vmem:[%s3971_s7 + $0xb0] sm:$0xf0]  ;;  %v2843_v26 = vld [vmem:[%s3971_s7 + $0xb4] sm:$0xf0] }
 0x4ec   : > { %1353 = vadd.xlane.f32.xlu2 %v3518_v27 }
 0x511   : > { %v1340_v21 = vpop.f32.mrf.mxu1 }
 0x512   : > { %v1341_v16 = vadd.f32 %v2927_v0, %v1340_v21  ;;  %v2615_v21 = vor.u32 %v2843_v26, %v2614_v25  ;;  %v2526_v25 = vld [vmem:[%s3971_s7] sm:$0xf] }
 0x514   : > { %v3521_v28 = vadd.f32 %v1341_v16, %v502_v18  ;;  %v2611_v18 = vor.u32 %v2840_v19, %v2608_v24  ;;  %v2841_v16 = vld [vmem:[%s3971_s7 + $0xac] sm:$0xf]  ;;  %1696 = vmatpush.bf16.msra.mxu2 %v2615_v21  ;;  %v2551_v19 = vor.u32 %v2827_v15, %v2550_v14  ;;  %v2552_v24 = vld [vmem:[%s3971_s7 + $0x38] sm:$0xf0]  ;;  %v2822_v21 = vld [vmem:[%s3971_s7 + $0xc] sm:$0xf0] }
 0x516   : > { %1355 = vadd.xlane.f32.xlu0 %v3521_v28  ;;  %1677 = vmatpush.bf16.msra.mxu0 %v2611_v18 }
 0x519   : > { %v1342_v29 = vpop.f32.mrf.mxu1 }
 0x51a   : > { %v1343_v30 = vadd.f32 %v2927_v0, %v1342_v29  ;;  %v2606_v0 = vld [vmem:[%s3971_s7 + $0xa0] sm:$0xf] }
 0x51b   : > { %v2607_v20 = vor.u32 %v2842_v33, %v2606_v0  ;;  %v2547_v33 = vor.u32 %v2824_v10, %v2544_v12 }
 0x51c   : > { %v3524_v34 = vadd.f32 %v1343_v30, %v503_v42  ;;  %v2616_v42 = vld [vmem:[%s3971_s7 + $0xb8] sm:$0xf0]  ;;  %v2590_v30 = vld [vmem:[%s3971_s7 + $0x80] sm:$0xf] }
 0x51d   : > { %1658 = vmatpush.bf16.msrb.mxu3 %v2607_v20  ;;  %v2619_v29 = vor.u32 %v2841_v16, %v2616_v42  ;;  %v2591_v13 = vor.u32 %v2838_v37, %v2590_v30  ;;  %v2825_v20 = vld [vmem:[%s3971_s7 + $0x2c] sm:$0xf]  ;;  %v2820_v16 = vld [vmem:[%s3971_s7 + $0x4] sm:$0xf]  ;;  %v2528_v42 = vld [vmem:[%s3971_s7 + $0x10] sm:$0xf0] }
 0x51e   : > { %1357 = vadd.xlane.f32.xlu1 %v3524_v34  ;;  %v2555_v18 = vor.u32 %v2825_v20, %v2552_v24  ;;  %v2531_v30 = vor.u32 %v2820_v16, %v2528_v42  ;;  %v2534_v37 = vld [vmem:[%s3971_s7 + $0x8] sm:$0xf] }
 0x51f   : > { %1715 = vmatpush.bf16.msrb.mxu1 %v2619_v29  ;;  %v2527_v29 = vor.u32 %v2822_v21, %v2526_v25 }
 0x521   : > { %1659 = vmatpush.bf16.msrb.mxu3 %v2591_v13  ;;  %v2821_v13 = vld [vmem:[%s3971_s7 + $0xc] sm:$0xf] }
 0x557   : > { %v1352_v23 = vpop.xlane.xlu1 %1351 }
 0x558   : > { %v1366_v47 = vmul.f32 %v3527_v45, %v1352_v23  ;;  %v2595_v23 = vor.u32 %v2836_v38, %v2592_v39  ;;  %v2823_v38 = vld [vmem:[%s3971_s7 + $0x14] sm:$0xf0] }
 0x55a   : > { %v3531_v48 = vsub.f32 %v3515_v22, %v1366_v47  ;;  %v2599_v47 = vor.u32 %v2839_v43, %v2598_v35  ;;  %1678 = vmatpush.bf16.msra.mxu0 %v2595_v23  ;;  %v2535_v35 = vor.u32 %v2823_v38, %v2534_v37  ;;  %v2536_v43 = vld [vmem:[%s3971_s7 + $0x18] sm:$0xf0] }
 0x55b   : > { %v2539_v23 = vor.u32 %v2821_v13, %v2536_v43  ;;  %v2867_v13 = vld [vmem:[%s3973_s9 + $0x78] sm:$0xff] }
 0x55c   : > { %v1374_v31 = vmul.f32 %v3531_v48, %v3531_v48  ;;  %1697 = vmatpush.bf16.msra.mxu2 %v2599_v47  ;;  %v2875_v43 = vld [vmem:[%s3973_s9 + $0xb8] sm:$0xff] }
 0x55e   : > { %1378 = vadd.xlane.f32.xlu2 %v1374_v31  ;;  %v2837_v31 = vld [vmem:[%s3971_s7 + $0x8c] sm:$0xf] }
 0x55f   : > { %v1354_v49 = vpop.xlane.xlu2 %1353 }
 0x560   : > { %v1367_v50 = vmul.f32 %v3527_v45, %v1354_v49  ;;  %v2600_v49 = vld [vmem:[%s3971_s7 + $0x98] sm:$0xf0] }
 0x562   : > { %v3537_v17 = vsub.f32 %v3518_v27, %v1367_v50  ;;  %v2603_v50 = vor.u32 %v2837_v31, %v2600_v49 }
 0x564   : > { %v1375_v41 = vmul.f32 %v3537_v17, %v3537_v17  ;;  %1716 = vmatpush.bf16.msrb.mxu1 %v2603_v50 }
 0x566   : > { %1380 = vadd.xlane.f32.xlu0 %v1375_v41  ;;  %v2574_v41 = vld [vmem:[%s3971_s7 + $0x60] sm:$0xf] }
 0x568   : > { %1717 = vmatpush.bf16.msrb.mxu1 %v2587_v61 }
 0x56c   : > { %1718 = vmatpush.bf16.msrb.mxu1 %v2571_v40 }
 0x570   : > { %1719 = vmatpush.bf16.msrb.mxu1 %v2555_v18 }
 0x574   : > { %1720 = vmatpush.bf16.msrb.mxu1 %v2539_v23  ;;  %v2865_v23 = vld [vmem:[%s3973_s9 + $0x68] sm:$0xff] }
 0x589   : > { %v1356_v51 = vpop.xlane.xlu0 %1355 }
 0x58a   : > { %v1368_v52 = vmul.f32 %v3527_v45, %v1356_v51  ;;  %v2834_v51 = vld [vmem:[%s3971_s7 + $0x6c] sm:$0xf0] }
 0x58c   : > { %v3543_v53 = vsub.f32 %v3521_v28, %v1368_v52  ;;  %v2832_v52 = vld [vmem:[%s3971_s7 + $0x64] sm:$0xf] }
 0x58e   : > { %v1376_v54 = vmul.f32 %v3543_v53, %v3543_v53 }
 0x590   : > { %1382 = vadd.xlane.f32.xlu1 %v1376_v54  ;;  %v2575_v54 = vor.u32 %v2834_v51, %v2574_v41 }
 0x591   : > { %v1358_v55 = vpop.xlane.xlu1 %1357 }
 0x592   : > { %v1369_v56 = vmul.f32 %v3527_v45, %v1358_v55  ;;  %v2576_v55 = vld [vmem:[%s3971_s7 + $0x70] sm:$0xf0]  ;;  %1660 = vmatpush.bf16.msrb.mxu3 %v2575_v54 }
 0x593   : > { %v2579_v62 = vor.u32 %v2832_v52, %v2576_v55 }
 0x594   : > { %v3549_v32 = vsub.f32 %v3524_v34, %v1369_v56  ;;  %v2582_v56 = vld [vmem:[%s3971_s7 + $0x68] sm:$0xf] }
 0x595   : > { %1679 = vmatpush.bf16.msra.mxu0 %v2579_v62 }
 0x596   : > { %v1377_v57 = vmul.f32 %v3549_v32, %v3549_v32  ;;  %1661 = vmatpush.bf16.msrb.mxu3 %v2559_v36 }
 0x598   : > { %1384 = vadd.xlane.f32.xlu2 %v1377_v57  ;;  %v2835_v57 = vld [vmem:[%s3971_s7 + $0x74] sm:$0xf0] }
 0x599   : > { %v2583_v58 = vor.u32 %v2835_v57, %v2582_v56  ;;  %1680 = vmatpush.bf16.msra.mxu0 %v2563_v5 }
 0x59a   : > { %1662 = vmatpush.bf16.msrb.mxu3 %v2543_v11 }
 0x59b   : > { %1698 = vmatpush.bf16.msra.mxu2 %v2583_v58 }
 0x59d   : > { %1681 = vmatpush.bf16.msra.mxu0 %v2547_v33 }
 0x59e   : > { %1663 = vmatpush.bf16.msrb.mxu3 %v2527_v29 }
 0x59f   : > { %1699 = vmatpush.bf16.msra.mxu2 %v2567_v7 }
 0x5a1   : > { %1682 = vmatpush.bf16.msra.mxu0 %v2531_v30 }
 0x5a3   : > { %1700 = vmatpush.bf16.msra.mxu2 %v2551_v19 }
 0x5a5   : > { %2163 = vmatpush.bf16.msrb.mxu0 %v2867_v13 }
 0x5a7   : > { %1701 = vmatpush.bf16.msra.mxu2 %v2535_v35  ;;  %v2859_v35 = vld [vmem:[%s3973_s9 + $0x38] sm:$0xff] }
 0x5a8   : > { %2144 = vmatpush.bf16.msra.mxu3 %v2859_v35 }
 0x5ab   : > { %2182 = vmatpush.bf16.msrb.mxu2 %v2875_v43 }
 0x5d1   : > { %v1379_v0 = vpop.xlane.xlu2 %1378 }
 0x5d2   : > { %v1386_v26 = vmul.f32 %v1379_v0, %v3527_v45 }
 0x5d4   : > { %v1390_v39 = vadd.f32 1e-07, %v1386_v26 }
 0x5d6   : > { %2997 = vrsqrt.f32 %v1390_v39  ;;  %vm1400_vm11 = vweird.f32 %v1390_v39 }
 0x5d9   : > { %v1381_v47 = vpop.xlane.xlu0 %1380 }
 0x5da   : > { %v1387_v31 = vmul.f32 %v1381_v47, %v3527_v45  ;;  %v2881_v47 = vld [vmem:[%s3973_s9 + $0xe8] sm:$0xff] }
 0x5dc   : > { %v2998_v49 = vpop.eup %2997  ;;  %v1391_v50 = vadd.f32 1e-07, %v1387_v31  ;;  %v2858_v31 = vld [vmem:[%s3973_s9 + $0x30] sm:$0xff] }
 0x5dd   : > { %v1395_v41 = vmul.f32 %v2998_v49, %v1390_v39  ;;  %vm1401_vm10 = vweird.f32 %v2998_v49  ;;  %v2882_v39 = vld [vmem:[%s3973_s9 + $0xf0] sm:$0xff]  ;;  %2145 = vmatpush.bf16.msra.mxu3 %v2858_v31 }
 0x5de   : > { %2999 = vrsqrt.f32 %v1391_v50  ;;  %vm1402_vm12 = vmor %vm1400_vm11, %vm1401_vm10  ;;  %vm1410_vm14 = vweird.f32 %v1391_v50 }
 0x5df   : > { %v1396_v51 = vmul.f32 %v2998_v49, %v1395_v41  ;;  %v2880_v41 = vld [vmem:[%s3973_s9 + $0xe0] sm:$0xff] }
 0x5e1   : > { %v1397_v52 = vmul.f32 0.5, %v1396_v51  ;;  %v2857_v51 = vld [vmem:[%s3973_s9 + $0x28] sm:$0xff] }
 0x5e2   : > { %2146 = vmatpush.bf16.msra.mxu3 %v2857_v51 }
 0x5e3   : > { %v1398_v54 = vsub.f32 1.5, %v1397_v52  ;;  %v2873_v52 = vld [vmem:[%s3973_s9 + $0xa8] sm:$0xff] }
 0x5e4   : > { %v3000_v55 = vpop.eup %2999 }
 0x5e5   : > { %v1399_v56 = vmul.f32 %v2998_v49, %v1398_v54  ;;  %v1405_v57 = vmul.f32 %v3000_v55, %v1391_v50  ;;  %vm1411_vm13 = vweird.f32 %v3000_v55  ;;  %v2864_v50 = vld [vmem:[%s3973_s9 + $0x60] sm:$0xff]  ;;  %v2863_v54 = vld [vmem:[%s3973_s9 + $0x58] sm:$0xff] }
 0x5e6   : > { %vm1412_vm15 = vmor %vm1410_vm14, %vm1411_vm13 }
 0x5e7   : > { %v1406_v62 = vmul.f32 %v3000_v55, %v1405_v57  ;;  %v1403_v58 = vsel %vm1402_vm12, %v2998_v49, %v1399_v56  ;;  %v2874_v49 = vld [vmem:[%s3973_s9 + $0xb0] sm:$0xff]  ;;  %v2856_v56 = vld [vmem:[%s3973_s9 + $0x20] sm:$0xff] }
 0x5e8   : > { %v1434_v61 = vmul.f32 %v1403_v58, %v3531_v48  ;;  %2183 = vmatpush.bf16.msrb.mxu2 %v2874_v49  ;;  %v2872_v57 = vld [vmem:[%s3973_s9 + $0xa0] sm:$0xff]  ;;  %2147 = vmatpush.bf16.msra.mxu3 %v2856_v56  ;;  %v2878_v58 = vld [vmem:[%s3973_s9 + $0xd0] sm:$0xff] }
 0x5e9   : > { %v1407_v59 = vmul.f32 0.5, %v1406_v62  ;;  %v2862_v62 = vld [vmem:[%s3973_s9 + $0x50] sm:$0xff] }
 0x5ea   : > { %v1441_v44 = vadd.f32 %v2928_v63, %v1434_v61  ;;  %v1486_v61 = vld [vmem:[%s3972_s8] sm:$0xf] }
 0x5eb   : > { %v1408_v60 = vsub.f32 1.5, %v1407_v59  ;;  %v2855_v59 = vld [vmem:[%s3973_s9 + $0x18] sm:$0xff] }
 0x5ec   : > { %v1448_v5 = vmul.f32 %v2929_v46, %v1441_v44  ;;  %2184 = vmatpush.bf16.msrb.mxu2 %v2873_v52  ;;  %2148 = vmatpush.bf16.msra.mxu3 %v2855_v59  ;;  %v3840_v44 = vperm.slane %v1486_v61, 1 }
 0x5ed   : > { %v1409_v2 = vmul.f32 %v3000_v55, %v1408_v60  ;;  %v2871_v60 = vld [vmem:[%s3973_s9 + $0x98] sm:$0xff] }
 0x5ef   : > { %v1413_v3 = vsel %vm1412_vm15, %v3000_v55, %v1409_v2  ;;  %v2879_v55 = vld [vmem:[%s3973_s9 + $0xd8] sm:$0xff]  ;;  %v2877_v2 = vld [vmem:[%s3973_s9 + $0xc8] sm:$0xff] }
 0x5f0   : > { %v1435_v36 = vmul.f32 %v1413_v3, %v3537_v17  ;;  %2185 = vmatpush.bf16.msrb.mxu2 %v2872_v57  ;;  %v2854_v3 = vld [vmem:[%s3973_s9 + $0x10] sm:$0xff] }
 0x5f1   : > { %2149 = vmatpush.bf16.msra.mxu3 %v2854_v3 }
 0x5f2   : > { %v1442_v4 = vadd.f32 %v2928_v63, %v1435_v36  ;;  %v2870_v36 = vld [vmem:[%s3973_s9 + $0x90] sm:$0xff] }
 0x5f4   : > { %v1449_v7 = vmul.f32 %v2929_v46, %v1442_v4  ;;  %2186 = vmatpush.bf16.msrb.mxu2 %v2871_v60  ;;  %v2860_v4 = vld [vmem:[%s3973_s9 + $0x40] sm:$0xff] }
 0x5f6   : > { %v1452_v9 = vpack.c.bf16 %v1449_v7, %v1448_v5  ;;  %v2876_v5 = vld [vmem:[%s3973_s9 + $0xc0] sm:$0xff] }
 0x5f8   : > { %1664 = vmatmul.bf16.vlgmr.msrb.gmra.mxu3 %v1452_v9  ;;  %1683 = vmatmul.bf16.vlgmr.msra.gmra.mxu0 %v1452_v9 }
 0x5f9   : > { %1702 = vmatmul.bf16.vlgmr.msra.gmra.mxu2 %v1452_v9  ;;  %1721 = vmatmul.bf16.vlgmr.msrb.gmra.mxu1 %v1452_v9  ;;  %v2853_v9 = vld [vmem:[%s3973_s9 + $0x8] sm:$0xff] }
 0x5fa   : > { %2187 = vmatpush.bf16.msrb.mxu2 %v2870_v36  ;;  %2150 = vmatpush.bf16.msra.mxu3 %v2853_v9 }
 0x603   : > { %v1383_v48 = vpop.xlane.xlu1 %1382 }
 0x604   : > { %v1388_v6 = vmul.f32 %v1383_v48, %v3527_v45  ;;  %v2869_v48 = vld [vmem:[%s3973_s9 + $0x88] sm:$0xff] }
 0x605   : > { %2188 = vmatpush.bf16.msrb.mxu2 %v2869_v48 }
 0x606   : > { %v1392_v40 = vadd.f32 1e-07, %v1388_v6 }
 0x608   : > { %3001 = vrsqrt.f32 %v1392_v40  ;;  %vm1420_vm1 = vweird.f32 %v1392_v40 }
 0x60b   : > { %v1385_v1 = vpop.xlane.xlu2 %1384 }
 0x60c   : > { %v1389_v17 = vmul.f32 %v1385_v1, %v3527_v45 }
 0x60e   : > { %v3002_v8 = vpop.eup %3001  ;;  %v1393_v10 = vadd.f32 1e-07, %v1389_v17 }
 0x60f   : > { %v1415_v11 = vmul.f32 %v3002_v8, %v1392_v40  ;;  %vm1421_vm0 = vweird.f32 %v3002_v8 }
 0x610   : > { %3003 = vrsqrt.f32 %v1393_v10  ;;  %vm1422_vm2 = vmor %vm1420_vm1, %vm1421_vm0  ;;  %vm1430_vm4 = vweird.f32 %v1393_v10 }
 0x611   : > { %v1416_v12 = vmul.f32 %v3002_v8, %v1415_v11  ;;  %v2868_v11 = vld [vmem:[%s3973_s9 + $0x80] sm:$0xff] }
 0x612   : > { %2189 = vmatpush.bf16.msrb.mxu2 %v2868_v11 }
 0x613   : > { %v1417_v14 = vmul.f32 0.5, %v1416_v12 }
 0x615   : > { %v1418_v15 = vsub.f32 1.5, %v1417_v14  ;;  %v3874_v14 = vperm.slane %v1486_v61, 2 }
 0x616   : > { %v3004_v0 = vpop.eup %3003 }
 0x617   : > { %v1419_v33 = vmul.f32 %v3002_v8, %v1418_v15  ;;  %v1425_v19 = vmul.f32 %v3004_v0, %v1393_v10  ;;  %vm1431_vm3 = vweird.f32 %v3004_v0  ;;  %v2852_v10 = vld [vmem:[%s3973_s9] sm:$0xff] }
 0x618   : > { %vm1432_vm5 = vmor %vm1430_vm4, %vm1431_vm3  ;;  %2151 = vmatpush.bf16.msra.mxu3 %v2852_v10 }
 0x619   : > { %v1426_v20 = vmul.f32 %v3004_v0, %v1425_v19  ;;  %v1423_v24 = vsel %vm1422_vm2, %v3002_v8, %v1419_v33  ;;  %v3864_v8 = vperm.slane %v1486_v61, 0 }
 0x61a   : > { %v1436_v45 = vmul.f32 %v1423_v24, %v3543_v53  ;;  %v2883_v53 = vld [vmem:[%s3973_s9 + $0xf8] sm:$0xff] }
 0x61b   : > { %v1427_v25 = vmul.f32 0.5, %v1426_v20  ;;  %2201 = vmatpush.bf16.msra.mxu1 %v2883_v53 }
 0x61c   : > { %v1443_v42 = vadd.f32 %v2928_v63, %v1436_v45 }
 0x61d   : > { %v1428_v26 = vsub.f32 1.5, %v1427_v25 }
 0x61e   : > { %v1450_v30 = vmul.f32 %v2929_v46, %v1443_v42 }
 0x61f   : > { %v1429_v18 = vmul.f32 %v3004_v0, %v1428_v26  ;;  %2202 = vmatpush.bf16.msra.mxu1 %v2882_v39 }
 0x621   : > { %v1433_v21 = vsel %vm1432_vm5, %v3004_v0, %v1429_v18 }
 0x622   : > { %v1437_v16 = vmul.f32 %v1433_v21, %v3549_v32  ;;  %v2866_v32 = vld [vmem:[%s3973_s9 + $0x70] sm:$0xff] }
 0x623   : > { %2164 = vmatpush.bf16.msrb.mxu0 %v2866_v32  ;;  %2203 = vmatpush.bf16.msra.mxu1 %v2881_v47 }
 0x624   : > { %v1444_v29 = vadd.f32 %v2928_v63, %v1437_v16  ;;  %v2861_v63 = vld [vmem:[%s3973_s9 + $0x48] sm:$0xff] }
 0x626   : > { %v1451_v37 = vmul.f32 %v2929_v46, %v1444_v29  ;;  %v3842_v46 = vperm.slane %v1486_v61, 3 }
 0x627   : > { %2165 = vmatpush.bf16.msrb.mxu0 %v2865_v23  ;;  %2204 = vmatpush.bf16.msra.mxu1 %v2880_v41 }
 0x628   : > { %v1453_v38 = vpack.c.bf16 %v1451_v37, %v1450_v30 }
 0x62a   : > { %1669 = vmatmul.bf16.gmra.mxu3 %v1453_v38  ;;  %1688 = vmatmul.bf16.gmra.mxu0 %v1453_v38 }
 0x62b   : > { %1707 = vmatmul.bf16.gmra.mxu2 %v1453_v38  ;;  %1726 = vmatmul.bf16.gmra.mxu1 %v1453_v38 }
 0x62c   : > { %2166 = vmatpush.bf16.msrb.mxu0 %v2864_v50  ;;  %2205 = vmatpush.bf16.msra.mxu1 %v2879_v55 }
 0x630   : > { %2167 = vmatpush.bf16.msrb.mxu0 %v2863_v54  ;;  %2206 = vmatpush.bf16.msra.mxu1 %v2878_v58 }
 0x634   : > { %2168 = vmatpush.bf16.msrb.mxu0 %v2862_v62  ;;  %2207 = vmatpush.bf16.msra.mxu1 %v2877_v2 }
 0x638   : > { %2169 = vmatpush.bf16.msrb.mxu0 %v2861_v63  ;;  %2208 = vmatpush.bf16.msra.mxu1 %v2876_v5 }
 0x63c   : > { %2170 = vmatpush.bf16.msrb.mxu0 %v2860_v4 }
 0x675   : > { %v1684_v7 = vpop.f32.mrf.mxu0 }
 0x676   : > { %v3857_v6 = vadd.f32 %v1684_v7, %v3840_v44  ;;  %v1722_v40 = vpop.f32.mrf.mxu1 }
 0x677   : > { %v3860_v1 = vadd.f32 %v1722_v40, %v3842_v46 }
 0x678   : > { %v1749_v17 = vmul.f32 %v3857_v6, %v3857_v6 }
 0x679   : > { %v1751_v12 = vmul.f32 %v3860_v1, %v3860_v1 }
 0x67a   : > { %v1765_v15 = vmul.f32 %v1749_v17, %v3857_v6 }
 0x67b   : > { %v1767_v0 = vmul.f32 %v1751_v12, %v3860_v1  ;;  %v1665_v33 = vpop.f32.mrf.mxu3 }
 0x67c   : > { %v1781_v19 = vmul.f32 0.044715, %v1765_v15  ;;  %v3879_v20 = vadd.f32 %v1665_v33, %v3864_v8  ;;  %v1703_v24 = vpop.f32.mrf.mxu2  ;;  %v1733_v33 = vmul.f32 0.5, %v3857_v6 }
 0x67d   : > { %v1783_v25 = vmul.f32 0.044715, %v1767_v0  ;;  %v3882_v26 = vadd.f32 %v1703_v24, %v3874_v14  ;;  %v1686_v45 = vpop.f32.mrf.mxu0 }
 0x67e   : > { %v1797_v18 = vadd.f32 %v1781_v19, %v3857_v6  ;;  %v1748_v21 = vmul.f32 %v3879_v20, %v3879_v20  ;;  %v1687_v16 = vadd.f32 %v1686_v45, %v3840_v44  ;;  %v1724_v42 = vpop.f32.mrf.mxu1  ;;  %v1735_v45 = vmul.f32 0.5, %v3860_v1 }
 0x67f   : > { %v1799_v29 = vadd.f32 %v1783_v25, %v3860_v1  ;;  %v1750_v30 = vmul.f32 %v3882_v26, %v3882_v26  ;;  %v1725_v37 = vadd.f32 %v1724_v42, %v3842_v46  ;;  %v1732_v6 = vmul.f32 0.5, %v3879_v20 }
 0x680   : > { %v1764_v38 = vmul.f32 %v1748_v21, %v3879_v20  ;;  %v1753_v13 = vmul.f32 %v1687_v16, %v1687_v16  ;;  %v1813_v39 = vmul.f32 0.7978846, %v1797_v18  ;;  %v1737_v19 = vmul.f32 0.5, %v1687_v16 }
 0x681   : > { %v1766_v53 = vmul.f32 %v1750_v30, %v3882_v26  ;;  %v1755_v32 = vmul.f32 %v1725_v37, %v1725_v37  ;;  %v1815_v23 = vmul.f32 0.7978846, %v1799_v29  ;;  %v1739_v18 = vmul.f32 0.5, %v1725_v37 }
 0x682   : > { %v1780_v35 = vmul.f32 0.044715, %v1764_v38  ;;  %v1769_v43 = vmul.f32 %v1753_v13, %v1687_v16  ;;  %3005 = vtanh.f32 %v1813_v39  ;;  %v1734_v1 = vmul.f32 0.5, %v3882_v26 }
 0x683   : > { %v1782_v47 = vmul.f32 0.044715, %v1766_v53  ;;  %v1771_v31 = vmul.f32 %v1755_v32, %v1725_v37  ;;  %v1667_v49 = vpop.f32.mrf.mxu3  ;;  %3007 = vtanh.f32 %v1815_v23 }
 0x684   : > { %v1796_v50 = vadd.f32 %v1780_v35, %v3879_v20  ;;  %v1785_v41 = vmul.f32 0.044715, %v1769_v43  ;;  %v1668_v51 = vadd.f32 %v1667_v49, %v3864_v8  ;;  %v1705_v52 = vpop.f32.mrf.mxu2 }
 0x685   : > { %v1798_v54 = vadd.f32 %v1782_v47, %v3882_v26  ;;  %v1787_v55 = vmul.f32 0.044715, %v1771_v31  ;;  %v1706_v56 = vadd.f32 %v1705_v52, %v3874_v14 }
 0x686   : > { %v1801_v57 = vadd.f32 %v1785_v41, %v1687_v16  ;;  %v1752_v62 = vmul.f32 %v1668_v51, %v1668_v51  ;;  %v1812_v60 = vmul.f32 0.7978846, %v1796_v50  ;;  %v1736_v16 = vmul.f32 0.5, %v1668_v51 }
 0x687   : > { %v1803_v58 = vadd.f32 %v1787_v55, %v1725_v37  ;;  %v1754_v59 = vmul.f32 %v1706_v56, %v1706_v56  ;;  %v1814_v2 = vmul.f32 0.7978846, %v1798_v54  ;;  %v1738_v37 = vmul.f32 0.5, %v1706_v56 }
 0x688   : > { %v1817_v61 = vmul.f32 0.7978846, %v1801_v57  ;;  %v1768_v63 = vmul.f32 %v1752_v62, %v1668_v51  ;;  %v3006_v7 = vpop.eup %3005 }
 0x689   : > { %v1819_v3 = vmul.f32 0.7978846, %v1803_v58  ;;  %v1770_v36 = vmul.f32 %v1754_v59, %v1706_v56  ;;  %v3008_v48 = vpop.eup %3007  ;;  %v1845_v10 = vadd.f32 1.0, %v3006_v7 }
 0x68a   : > { %3009 = vtanh.f32 %v1817_v61  ;;  %v1784_v4 = vmul.f32 0.044715, %v1768_v63  ;;  %v1847_v15 = vadd.f32 1.0, %v3008_v48 }
 0x68b   : > { %3011 = vtanh.f32 %v1819_v3  ;;  %v1786_v5 = vmul.f32 0.044715, %v1770_v36  ;;  %v1861_v29 = vmul.f32 %v1845_v10, %v1733_v33 }
 0x68c   : > { %3013 = vtanh.f32 %v1812_v60  ;;  %v1800_v9 = vadd.f32 %v1784_v4, %v1668_v51  ;;  %v1863_v38 = vmul.f32 %v1847_v15, %v1735_v45 }
 0x68d   : > { %3015 = vtanh.f32 %v1814_v2  ;;  %v1802_v40 = vadd.f32 %v1786_v5, %v1706_v56 }
 0x68e   : > { %v1816_v17 = vmul.f32 0.7978846, %v1800_v9 }
 0x68f   : > { %v1818_v11 = vmul.f32 0.7978846, %v1802_v40 }
 0x690   : > { %v3010_v12 = vpop.eup %3009  ;;  %3017 = vtanh.f32 %v1816_v17 }
 0x691   : > { %v3012_v0 = vpop.eup %3011  ;;  %v1849_v24 = vadd.f32 1.0, %v3010_v12  ;;  %3019 = vtanh.f32 %v1818_v11 }
 0x692   : > { %v3014_v25 = vpop.eup %3013  ;;  %v1851_v21 = vadd.f32 1.0, %v3012_v0 }
 0x693   : > { %v3016_v42 = vpop.eup %3015  ;;  %v1865_v30 = vmul.f32 %v1849_v24, %v1737_v19  ;;  %v1844_v53 = vadd.f32 1.0, %v3014_v25 }
 0x694   : > { %v1867_v13 = vmul.f32 %v1851_v21, %v1739_v18  ;;  %v1846_v35 = vadd.f32 1.0, %v3016_v42 }
 0x695   : > { %v1877_v32 = vpack.c.bf16 %v1865_v30, %v1861_v29  ;;  %v1860_v49 = vmul.f32 %v1844_v53, %v1732_v6 }
 0x696   : > { %v3018_v39 = vpop.eup %3017  ;;  %v1879_v43 = vpack.c.bf16 %v1867_v13, %v1863_v38  ;;  %v1862_v41 = vmul.f32 %v1846_v35, %v1734_v1 }
 0x697   : > { %v3020_v23 = vpop.eup %3019  ;;  %v1848_v47 = vadd.f32 1.0, %v3018_v39  ;;  %2171 = vmatmul.bf16.vlgmr.msrb.gmra.mxu0 %v1877_v32 }
 0x698   : > { %v1850_v31 = vadd.f32 1.0, %v3020_v23  ;;  %2209 = vmatmul.bf16.vlgmr.msra.gmra.mxu1 %v1879_v43 }
 0x699   : > { %v1864_v50 = vmul.f32 %v1848_v47, %v1736_v16 }
 0x69a   : > { %v1866_v52 = vmul.f32 %v1850_v31, %v1738_v37 }
 0x69b   : > { %v1876_v54 = vpack.c.bf16 %v1864_v50, %v1860_v49 }
 0x69c   : > { %v1878_v55 = vpack.c.bf16 %v1866_v52, %v1862_v41 }
 0x69d   : > { %2152 = vmatmul.bf16.vlgmr.msra.gmra.mxu3 %v1876_v54 }
 0x69e   : > { %2190 = vmatmul.bf16.vlgmr.msrb.gmra.mxu2 %v1878_v55 }
 0x6a7   : > { %v1689_v57 = vpop.f32.mrf.mxu0 }
 0x6a8   : > { %v3903_v62 = vadd.f32 %v1689_v57, %v3840_v44  ;;  %v1727_v20 = vpop.f32.mrf.mxu1 }
 0x6a9   : > { %v3906_v51 = vadd.f32 %v1727_v20, %v3842_v46 }
 0x6aa   : > { %v1757_v26 = vmul.f32 %v3903_v62, %v3903_v62 }
 0x6ab   : > { %v1759_v56 = vmul.f32 %v3906_v51, %v3906_v51 }
 0x6ac   : > { %v1773_v58 = vmul.f32 %v1757_v26, %v3903_v62  ;;  %v1741_v26 = vmul.f32 0.5, %v3903_v62 }
 0x6ad   : > { %v1775_v59 = vmul.f32 %v1759_v56, %v3906_v51  ;;  %v1670_v60 = vpop.f32.mrf.mxu3 }
 0x6ae   : > { %v1789_v61 = vmul.f32 0.044715, %v1773_v58  ;;  %v3915_v63 = vadd.f32 %v1670_v60, %v3864_v8  ;;  %v1708_v2 = vpop.f32.mrf.mxu2  ;;  %v1743_v60 = vmul.f32 0.5, %v3906_v51 }
 0x6af   : > { %v1791_v3 = vmul.f32 0.044715, %v1775_v59  ;;  %v3918_v36 = vadd.f32 %v1708_v2, %v3874_v14  ;;  %v1691_v4 = vpop.f32.mrf.mxu0 }
 0x6b0   : > { %v1756_v5 = vmul.f32 %v3915_v63, %v3915_v63  ;;  %v1692_v7 = vadd.f32 %v1691_v4, %v3840_v44  ;;  %v1729_v9 = vpop.f32.mrf.mxu1  ;;  %v1805_v48 = vadd.f32 %v1789_v61, %v3903_v62  ;;  %v1740_v62 = vmul.f32 0.5, %v3915_v63 }
 0x6b1   : > { %v1758_v40 = vmul.f32 %v3918_v36, %v3918_v36  ;;  %v1730_v17 = vadd.f32 %v1729_v9, %v3842_v46  ;;  %v1807_v10 = vadd.f32 %v1791_v3, %v3906_v51  ;;  %v1742_v51 = vmul.f32 0.5, %v3918_v36 }
 0x6b2   : > { %v1772_v11 = vmul.f32 %v1756_v5, %v3915_v63  ;;  %v1761_v12 = vmul.f32 %v1692_v7, %v1692_v7  ;;  %v1821_v24 = vmul.f32 0.7978846, %v1805_v48  ;;  %v1745_v56 = vmul.f32 0.5, %v1692_v7 }
 0x6b3   : > { %v1774_v15 = vmul.f32 %v1758_v40, %v3918_v36  ;;  %v1763_v0 = vmul.f32 %v1730_v17, %v1730_v17  ;;  %v1823_v18 = vmul.f32 0.7978846, %v1807_v10  ;;  %v1747_v61 = vmul.f32 0.5, %v1730_v17 }
 0x6b4   : > { %v1788_v33 = vmul.f32 0.044715, %v1772_v11  ;;  %v1777_v19 = vmul.f32 %v1761_v12, %v1692_v7  ;;  %3021 = vtanh.f32 %v1821_v24 }
 0x6b5   : > { %v1790_v44 = vmul.f32 0.044715, %v1774_v15  ;;  %v1779_v25 = vmul.f32 %v1763_v0, %v1730_v17  ;;  %v1672_v45 = vpop.f32.mrf.mxu3  ;;  %3023 = vtanh.f32 %v1823_v18 }
 0x6b6   : > { %v1793_v21 = vmul.f32 0.044715, %v1777_v19  ;;  %v1673_v42 = vadd.f32 %v1672_v45, %v3864_v8  ;;  %v1710_v29 = vpop.f32.mrf.mxu2  ;;  %v1804_v46 = vadd.f32 %v1788_v33, %v3915_v63  ;;  %v2930_v63 = vld [vmem:[%s3974_s10] ss:$0 sm:$0xff] }
 0x6b7   : > { %v1795_v30 = vmul.f32 0.044715, %v1779_v25  ;;  %v1711_v38 = vadd.f32 %v1710_v29, %v3874_v14  ;;  %v1806_v13 = vadd.f32 %v1790_v44, %v3918_v36 }
 0x6b8   : > { %v1760_v53 = vmul.f32 %v1673_v42, %v1673_v42  ;;  %v1809_v32 = vadd.f32 %v1793_v21, %v1692_v7  ;;  %v1820_v6 = vmul.f32 0.7978846, %v1804_v46  ;;  %v1744_v7 = vmul.f32 0.5, %v1673_v42 }
 0x6b9   : > { %v1762_v39 = vmul.f32 %v1711_v38, %v1711_v38  ;;  %v1811_v35 = vadd.f32 %v1795_v30, %v1730_v17  ;;  %v1822_v8 = vmul.f32 0.7978846, %v1806_v13  ;;  %v1746_v17 = vmul.f32 0.5, %v1711_v38 }
 0x6ba   : > { %v1776_v43 = vmul.f32 %v1760_v53, %v1673_v42  ;;  %v1825_v23 = vmul.f32 0.7978846, %v1809_v32  ;;  %v3022_v31 = vpop.eup %3021 }
 0x6bb   : > { %v1778_v16 = vmul.f32 %v1762_v39, %v1711_v38  ;;  %v1827_v47 = vmul.f32 0.7978846, %v1811_v35  ;;  %v3024_v49 = vpop.eup %3023  ;;  %v1853_v52 = vadd.f32 1.0, %v3022_v31 }
 0x6bc   : > { %v1792_v1 = vmul.f32 0.044715, %v1776_v43  ;;  %3025 = vtanh.f32 %v1825_v23  ;;  %v1855_v57 = vadd.f32 1.0, %v3024_v49 }
 0x6bd   : > { %v1794_v37 = vmul.f32 0.044715, %v1778_v16  ;;  %3027 = vtanh.f32 %v1827_v47  ;;  %v1869_v4 = vmul.f32 %v1853_v52, %v1741_v26 }
 0x6be   : > { %v1808_v14 = vadd.f32 %v1792_v1, %v1673_v42  ;;  %3029 = vtanh.f32 %v1820_v6  ;;  %v1871_v9 = vmul.f32 %v1855_v57, %v1743_v60 }
 0x6bf   : > { %v1810_v50 = vadd.f32 %v1794_v37, %v1711_v38  ;;  %3031 = vtanh.f32 %v1822_v8 }
 0x6c0   : > { %v1824_v41 = vmul.f32 0.7978846, %v1808_v14 }
 0x6c1   : > { %v1826_v54 = vmul.f32 0.7978846, %v1810_v50 }
 0x6c2   : > { %v3026_v55 = vpop.eup %3025  ;;  %3033 = vtanh.f32 %v1824_v41 }
 0x6c3   : > { %v3028_v20 = vpop.eup %3027  ;;  %v1857_v58 = vadd.f32 1.0, %v3026_v55  ;;  %3035 = vtanh.f32 %v1826_v54 }
 0x6c4   : > { %v3030_v59 = vpop.eup %3029  ;;  %v1859_v2 = vadd.f32 1.0, %v3028_v20 }
 0x6c5   : > { %v3032_v3 = vpop.eup %3031  ;;  %v1873_v5 = vmul.f32 %v1857_v58, %v1745_v56  ;;  %v1852_v10 = vadd.f32 1.0, %v3030_v59 }
 0x6c6   : > { %v1875_v48 = vmul.f32 %v1859_v2, %v1747_v61  ;;  %v1854_v15 = vadd.f32 1.0, %v3032_v3 }
 0x6c7   : > { %v1881_v40 = vpack.c.bf16 %v1873_v5, %v1869_v4  ;;  %v1868_v24 = vmul.f32 %v1852_v10, %v1740_v62 }
 0x6c8   : > { %v3034_v11 = vpop.eup %3033  ;;  %v1883_v12 = vpack.c.bf16 %v1875_v48, %v1871_v9  ;;  %v1870_v25 = vmul.f32 %v1854_v15, %v1742_v51 }
 0x6c9   : > { %v3036_v0 = vpop.eup %3035  ;;  %2176 = vmatmul.bf16.gmra.mxu0 %v1881_v40  ;;  %v1856_v33 = vadd.f32 1.0, %v3034_v11 }
 0x6ca   : > { %2214 = vmatmul.bf16.gmra.mxu1 %v1883_v12  ;;  %v1858_v19 = vadd.f32 1.0, %v3036_v0 }
 0x6cb   : > { %v1872_v44 = vmul.f32 %v1856_v33, %v1744_v7 }
 0x6cc   : > { %v1874_v45 = vmul.f32 %v1858_v19, %v1746_v17 }
 0x6cd   : > { %v1880_v18 = vpack.c.bf16 %v1872_v44, %v1868_v24 }
 0x6ce   : > { %v1882_v21 = vpack.c.bf16 %v1874_v45, %v1870_v25 }
 0x6cf   : > { %2157 = vmatmul.bf16.gmra.mxu3 %v1880_v18 }
 0x6d0   : > { %2195 = vmatmul.bf16.gmra.mxu2 %v1882_v21 }
 0x714   : > { %v2172_v42 = vpop.f32.mrf.mxu0 }
 0x715   : > { %v2210_v38 = vpop.f32.mrf.mxu1 }
 0x71c   : > { %v2174_v43 = vpop.f32.mrf.mxu0 }
 0x71d   : > { %v2212_v47 = vpop.f32.mrf.mxu1 }
 0x720   : > { %v2153_v29 = vpop.f32.mrf.mxu3 }
 0x721   : > { %v2154_v46 = vadd.f32 %v2930_v63, %v2153_v29  ;;  %v2191_v30 = vpop.f32.mrf.mxu2 }
 0x723   : > { %v2173_v36 = vadd.f32 %v2172_v42, %v2154_v46 }
 0x725   : > { %v2192_v13 = vadd.f32 %v2191_v30, %v2173_v36 }
 0x727   : > { %v2211_v53 = vadd.f32 %v2210_v38, %v2192_v13 }
 0x728   : > { %v2155_v32 = vpop.f32.mrf.mxu3 }
 0x729   : > { %v2220_v39 = vadd.f32 %v2211_v53, %v3515_v22  ;;  %v2156_v35 = vadd.f32 %v2930_v63, %v2155_v32  ;;  %v2193_v6 = vpop.f32.mrf.mxu2 }
 0x72b   : > { %2224 = vst [vmem:[%s3945_s17] sm:$0xff] %v2220_v39  ;;  %v2175_v23 = vadd.f32 %v2174_v43, %v2156_v35 }
 0x72d   : > { %v2194_v16 = vadd.f32 %v2193_v6, %v2175_v23 }
 0x72f   : > { %v2213_v8 = vadd.f32 %v2212_v47, %v2194_v16 }
 0x731   : > { %v2221_v1 = vadd.f32 %v2213_v8, %v3518_v27 }
 0x733   : > { %2225 = vst [vmem:[%s3945_s17 + $0x8] sm:$0xff] %v2221_v1 }
 0x746   : > { %v2177_v37 = vpop.f32.mrf.mxu0 }
 0x747   : > { %v2215_v41 = vpop.f32.mrf.mxu1 }
 0x74e   : > { %v2179_v20 = vpop.f32.mrf.mxu0 }
 0x74f   : > { %v2217_v27 = vpop.f32.mrf.mxu1 }
 0x752   : > { %v2158_v31 = vpop.f32.mrf.mxu3 }
 0x753   : > { %v2159_v14 = vadd.f32 %v2930_v63, %v2158_v31  ;;  %v2196_v49 = vpop.f32.mrf.mxu2 }
 0x755   : > { %v2178_v50 = vadd.f32 %v2177_v37, %v2159_v14 }
 0x757   : > { %v2197_v22 = vadd.f32 %v2196_v49, %v2178_v50 }
 0x759   : > { %v2216_v52 = vadd.f32 %v2215_v41, %v2197_v22 }
 0x75a   : > { %v2160_v54 = vpop.f32.mrf.mxu3 }
 0x75b   : > { %v2222_v55 = vadd.f32 %v2216_v52, %v3521_v28  ;;  %v2161_v57 = vadd.f32 %v2930_v63, %v2160_v54  ;;  %v2198_v56 = vpop.f32.mrf.mxu2 }
 0x75d   : > { %2226 = vst [vmem:[%s3945_s17 + $0x10] sm:$0xff] %v2222_v55  ;;  %v2180_v26 = vadd.f32 %v2179_v20, %v2161_v57 }
 0x75f   : > { %v2199_v58 = vadd.f32 %v2198_v56, %v2180_v26 }
 0x761   : > { %v2218_v59 = vadd.f32 %v2217_v27, %v2199_v58 }
 0x763   : > { %v2223_v60 = vadd.f32 %v2218_v59, %v3524_v34 }
 0x765   : > { %2227 = vst [vmem:[%s3945_s17 + $0x18] sm:$0xff] %v2223_v60 }
 0x766 PF: > { %s22_s19 = sadd.s32 1, %s3093_s19   ;;  %s3976_s17 = smov %s3089_s18 }
 0x767   : > { %p19_p8 = scmp.ge.s32.totalorder %s22_s19, 4   ;;  %s3977_s18 = smov %s3979_s21 }
 0x769   :  { %21 = sbr.rel (!%p19_p8) target bundleno = 2 (0x2), region = 105 }
 0x76e   :  { %2258 = vsyncpa [#allocation4], 1 }
 0x76f   :  { %2260 = vsyncpa [#allocation4 + $0x1], 1 }

// kernel: gpt_forward.9
= control target key start
LH: loop header
LB: loop body
LE: loop exit
PB: predicated region body
PF: predicated region fallthrough
CT: control target
= control target key end

     0   :  { %16 = vsyncpa [#allocation4], 0  ;;  %s3971_s0 = inlined_call_operand.vmem [shape: f32[2,32,128], index: 0, kind: input, shape index: {}]   ;;  %s3972_s1 = inlined_call_operand.vmem [shape: bf16[2,32,128], index: 1, kind: input, shape index: {}]   ;;  %s3973_s2 = inlined_call_operand.vmem [shape: bf16[2,32,256], index: 2, kind: input, shape index: {}]   ;;  %s3974_s3 = inlined_call_operand.hbm [shape: bf16[128,128], index: 3, kind: input, shape index: {}]   ;;  %s3975_s4 = inlined_call_operand.vmem [shape: f32[1,128], index: 4, kind: input, shape index: {}]   ;;  %s3976_s5 = inlined_call_operand.vmem [shape: f32[1,128], index: 5, kind: input, shape index: {}]   ;;  %s3977_s6 = inlined_call_operand.vmem [shape: f32[1,128], index: 6, kind: input, shape index: {}]   ;;  %s3978_s7 = inlined_call_operand.vmem [shape: bf16[128,512], index: 7, kind: input, shape index: {}]   ;;  %s3979_s8 = inlined_call_operand.vmem [shape: f32[1,512], index: 8, kind: input, shape index: {}]   ;;  %s3980_s9 = inlined_call_operand.hbm [shape: bf16[512,128], index: 9, kind: input, shape index: {}]   ;;  %s3981_s10 = inlined_call_operand.vmem [shape: f32[1,128], index: 10, kind: input, shape index: {}]   ;;  %s3982_s11 = inlined_call_operand.vmem [shape: f32[2,32,128], index: 11, kind: output, shape index: {}]  }
   0x1   :  { %17 = vsyncpa [#allocation6], 0  ;;  %s3236_s17 = smov 0   ;;  %s3238_s18 = smov 0  }
   0x2   :  { %s3240_s19 = smov 0  }
   0x3 LB: > { %s2384_s20 = sadd.s32 4294967295, %s3166_s19   ;;  %s35_s21 = sadd.s32 1, %s3162_s18  ;;  %s3166_s19 = sphi %s3240_s19, %s23_s19   ;;  %s3162_s18 = sphi %s3238_s18, %s3986_s18   ;;  %s3158_s17 = sphi %s3236_s17, %s3985_s17  }
   0x4   : > { %p37_p0 = scmp.ge.s32.totalorder %s35_s21, 2  ;;  %p2386_p1 = scmp.ge.s32.totalorder %s3166_s19, 1 }
   0x5   : > { %p318_p2 = scmp.lt.s32.totalorder %s3166_s19, 3  ;;  %p3261_p4 = scmp.eq.s32.totalorder %s2384_s20, 0 }
   0x6   : > { %s3988_s21 = smov (%p37_p0, %s35_s21), 0  ;;  %s329_s26 = sshll.u32 %s3974_s3, 4  ;;  %s330_s26 = int_to_ptr.hbm [resolvable:$true] %s329_s26 }
   0x7   : > { %p3257_p3 = pnand %p2386_p1, %p318_p2  ;;  %s3168_s27 = smov [#allocation3]  }
   0x8   : > { %s331_s28 = sshll.u32 %s3168_s27, 4  ;;  %s358_s12 = sshll.u32 %s3980_s9, 4  ;;  %s332_s28 = int_to_ptr.vmem [resolvable:$true] %s331_s28  ;;  %s359_s12 = int_to_ptr.hbm [resolvable:$true] %s358_s12 }
   0x9   : > { %p2923_p5 = pneg %p3257_p3  ;;  %s3169_s13 = smov 64  }
   0xa   : > { %s3170_s14 = smov 4   ;;  %s3171_s15 = smov [#allocation5]  }
   0xb   : > { %p2924_p6 = pnand %p3261_p4, %p2923_p5  ;;  %s360_s16 = sshll.u32 %s3171_s15, 4  ;;  %s361_s16 = int_to_ptr.vmem [resolvable:$true] %s360_s16 }
   0xc   : > { %413 = sbr.rel (%p3257_p3) target bundleno = 1899 (0x76b), region = 64 }
   0xd   : > { %2926 = dma.hbm_to_vmem [thread:$0]  (!%p2924_p6), %s330_s26, 1024, %s332_s28, [#allocation4], %s3169_s13, %s3169_s13, %s3170_s14  }
   0xe   : > { %2929 = dma.hbm_to_vmem [thread:$0]  (!%p2924_p6), %s359_s12, 4096, %s361_s16, [#allocation6], %s3169_s13, %s3169_s13, %s3170_s14  }
  0x11   : > { %3149 = dma.done.wait (%p3261_p4), [#allocation4], 1024  }
  0x12   : > { %3151 = vsyncadd (%p3261_p4), [#allocation4], 4294966272 }
  0x13   : > { %3153 = dma.done.wait (%p3261_p4), [#allocation6], 4096  }
  0x14   : > { %3155 = vsyncadd (%p3261_p4), [#allocation6], 4294963200  ;;  %p482_p7 = scmp.lt.s32.totalorder %s3158_s17, 1  ;;  %vm570_vm0 = vcmask 261120   ;;  %s3173_s29 = smov 32   ;;  %v522_v33 = vlaneseq  ;;  %vm693_vm5 = vcmask 257024  }
  0x15   : > { %s3174_s30 = smov 64   ;;  %vm880_vm6 = vcmask 519424   ;;  %vm1067_vm7 = vcmask 781824   ;;  %vm1254_vm8 = vcmask 1044224  }
  0x16   : > { %s3990_s17 = smov (!%p482_p7, %s3158_s17), 1  ;;  %v3334_v35 = vshrl.u32 %v522_v33, 7  ;;  %v3336_v36 = vand.u32 127, %v522_v33 }
  0x17   : > { %s3287_s20 = sshll.u32 %s3990_s17, 5  ;;  %s2812_s23 = sshll.u32 %s3990_s17, 4 }
  0x18   : > { %s3293_s25 = scalar_lea.vmem %s3973_s2, %s3287_s20  ;;  %s3304_s28 = scalar_lea.vmem %s3972_s1, %s2812_s23  ;;  %vm534_vm1 = vcmp.ge.s32.totalorder %v3334_v35, %v3336_v36  ;;  %v3346_v42 = vadd.s32 8, %v3334_v35  ;;  %v3358_v47 = vadd.s32 16, %v3334_v35 }
  0x19   : > { %v2415_v0 = vld [vmem:[%s3293_s25 + $0x10] sm:$0xf]  ;;  %v2818_v1 = vld [vmem:[%s3293_s25 + $0x14] sm:$0xf0]  ;;  %v2411_v6 = vld [vmem:[%s3293_s25] sm:$0xf]  ;;  %s489_s14 = scalar_lea.vmem %s3971_s0, %s3287_s20  ;;  %s3952_s23 = scalar_lea.vmem %s3982_s11, %s3287_s20 }
  0x1a   : > { %v2443_v2 = vld [vmem:[%s3293_s25 + $0x10] sm:$0xf]  ;;  %v2416_v3 = vor.u32 %v2818_v1, %v2415_v0  ;;  %v2824_v4 = vld [vmem:[%s3293_s25 + $0x14] sm:$0xf0]  ;;  %v2817_v7 = vld [vmem:[%s3293_s25 + $0x4] sm:$0xf0]  ;;  %vm535_vm2 = vcmp.ge.s32.totalorder %v3346_v42, %v3336_v36  ;;  %vm536_vm3 = vcmp.ge.s32.totalorder %v3358_v47, %v3336_v36 }
  0x1b   : > { %v2444_v5 = vor.u32 %v2824_v4, %v2443_v2  ;;  %v2821_v9 = vld [vmem:[%s3304_s28] sm:$0xff]  ;;  %s3172_s17 = smov 96   ;;  %v2412_v10 = vor.u32 %v2817_v7, %v2411_v6  ;;  %v2823_v12 = vld [vmem:[%s3293_s25 + $0x4] sm:$0xf0]  ;;  %v2499_v17 = vld [vmem:[%s3293_s25 + $0x10] sm:$0xf] }
  0x1c   : > { %v581_v8 = vsel %vm570_vm0, %v2416_v3, 0  ;;  %v2439_v11 = vld [vmem:[%s3293_s25] sm:$0xf]  ;;  %720 = vrot.lane.b32.xlu2 %v2821_v9, %s3172_s17  ;;  %v2822_v16 = vld [vmem:[%s3304_s28 + $0x8] sm:$0xff]  ;;  %v2836_v18 = vld [vmem:[%s3293_s25 + $0x14] sm:$0xf0] }
  0x1d   : > { %589 = vmatpush.bf16.xpose.msra.mxu0 %v581_v8  ;;  %736 = vrot.lane.b32.xlu1 %v2444_v5, %s3172_s17  ;;  %v2440_v13 = vor.u32 %v2823_v12, %v2439_v11  ;;  %v578_v14 = vsel %vm570_vm0, %v2412_v10, 0  ;;  %v2815_v15 = vld [vmem:[%s3304_s28] sm:$0xff]  ;;  %v2500_v19 = vor.u32 %v2836_v18, %v2499_v17  ;;  %v2829_v21 = vld [vmem:[%s3293_s25 + $0x4] sm:$0xf0]  ;;  %v2471_v54 = vld [vmem:[%s3293_s25 + $0x10] sm:$0xf] }
  0x1e   : > { %v2467_v20 = vld [vmem:[%s3293_s25] sm:$0xf]  ;;  %v2816_v22 = vld [vmem:[%s3304_s28 + $0x8] sm:$0xff]  ;;  %v2830_v55 = vld [vmem:[%s3293_s25 + $0x14] sm:$0xf0]  ;;  %v3385_v17 = vadd.s32 24, %v3334_v35 }
  0x1f   : > { %v2468_v23 = vor.u32 %v2829_v21, %v2467_v20  ;;  %v2495_v24 = vld [vmem:[%s3293_s25] sm:$0xf]  ;;  %v2835_v25 = vld [vmem:[%s3293_s25 + $0x4] sm:$0xf0]  ;;  %v2472_v56 = vor.u32 %v2830_v55, %v2471_v54  ;;  %v2425_v57 = vld [vmem:[%s3293_s25 + $0x14] sm:$0xf] }
  0x20   : > { %v2496_v26 = vor.u32 %v2835_v25, %v2495_v24  ;;  %v2833_v27 = vld [vmem:[%s3304_s28] sm:$0xff]  ;;  %v2820_v58 = vld [vmem:[%s3293_s25 + $0x18] sm:$0xf0]  ;;  %v2819_v61 = vld [vmem:[%s3293_s25 + $0x8] sm:$0xf0]  ;;  %vm537_vm4 = vcmp.ge.s32.totalorder %v3385_v17, %v3336_v36 }
  0x21   : > { %v2426_v59 = vor.u32 %v2820_v58, %v2425_v57  ;;  %v2421_v60 = vld [vmem:[%s3293_s25 + $0x4] sm:$0xf]  ;;  %v2828_v24 = vld [vmem:[%s3304_s28 + $0x8] sm:$0xff] }
  0x22   : > { %v2422_v62 = vor.u32 %v2819_v61, %v2421_v60 }
  0x23   : > { %676 = vmatpush.bf16.msra.mxu1 %v2426_v59  ;;  %2913 = vmatpush.bf16.msra.mxu3 %v2426_v59 }
  0x25   : > { %590 = vmatpush.bf16.xpose.msra.mxu0 %v578_v14  ;;  %734 = vrot.lane.b32.xlu1 %v2440_v13, %s3172_s17 }
  0x27   : > { %677 = vmatpush.bf16.msra.mxu1 %v2422_v62  ;;  %2914 = vmatpush.bf16.msra.mxu3 %v2422_v62 }
  0x2c   : > { %2417 = vmatmul.msk.bf16.vlgmr.msra.gmra.mxu0 %vm570_vm0, %v2815_v15 }
  0x2d   : > { %722 = vrot.lane.b32.xlu1 %v2822_v16, %s3172_s17 }
  0x35   : > { %1110 = vrot.lane.b32.xlu1 %v2500_v19, %s3173_s29 }
  0x3c   : > { %2418 = vmatmul.msk.bf16.gmra.mxu0 %vm570_vm0, %v2816_v22 }
  0x3d   : > { %921 = vrot.lane.b32.xlu1 %v2468_v23, %s3174_s30 }
  0x45   : > { %1108 = vrot.lane.b32.xlu1 %v2496_v26, %s3173_s29 }
  0x4d   : > { %1094 = vrot.lane.b32.xlu1 %v2833_v27, %s3173_s29  ;;  %v2827_v27 = vld [vmem:[%s3304_s28] sm:$0xff] }
  0x76   : > { %v721_v32 = vpop.permute.xlu2 %720 }
  0x8f   : > { %v737_v28 = vpop.permute.xlu1 %736 }
  0x90   : > { %v748_v29 = vsel %vm570_vm0, %v737_v28, 0  ;;  %v2834_v28 = vld [vmem:[%s3304_s28 + $0x8] sm:$0xff] }
  0x91   : > { %756 = vmatpush.bf16.xpose.msra.mxu2 %v748_v29 }
  0x97   : > { %v735_v30 = vpop.permute.xlu1 %734 }
  0x98   : > { %v745_v31 = vsel %vm570_vm0, %v735_v30, 0 }
  0x99   : > { %757 = vmatpush.bf16.xpose.msra.mxu2 %v745_v31 }
  0x9f   : > { %v723_v34 = vpop.permute.xlu1 %722 }
  0xa0   : > { %2445 = vmatmul.msk.bf16.vlgmr.msra.gmra.mxu2 %vm570_vm0, %v721_v32 }
  0xa7   : > { %v1111_v37 = vpop.permute.xlu1 %1110 }
  0xa8   : > { %v1122_v39 = vsel %vm570_vm0, %v1111_v37, 0 }
  0xa9   : > { %v592_v38 = vpop.f32.mrf.mxu0  ;;  %1130 = vmatpush.bf16.xpose.msrb.mxu0 %v1122_v39 }
  0xaa   : > { %v602_v40 = vsel %vm534_vm1, %v592_v38, -inf }
  0xab   : > { %v606_v41 = vsel %vm570_vm0, %v602_v40, -inf }
  0xac   : > { %607 = vmax.xlane.f32.xlu0 %v606_v41 }
  0xaf   : > { %v3351_v43 = vpop.permute.xlu1 %921 }
  0xb0   : > { %2446 = vmatmul.msk.bf16.gmra.mxu2 %vm570_vm0, %v723_v34  ;;  %v932_v26 = vsel %vm570_vm0, %v3351_v43, 0  ;;  %v2453_v43 = vld [vmem:[%s3293_s25 + $0x14] sm:$0xf] }
  0xb1   : > { %v594_v44 = vpop.f32.mrf.mxu0 }
  0xb2   : > { %v603_v45 = vsel %vm535_vm2, %v594_v44, -inf  ;;  %v2826_v44 = vld [vmem:[%s3293_s25 + $0x18] sm:$0xf0] }
  0xb3   : > { %v609_v46 = vsel %vm570_vm0, %v603_v45, -inf }
  0xb4   : > { %610 = vmax.xlane.f32.xlu0 %v609_v46 }
  0xb7   : > { %v1109_v48 = vpop.permute.xlu1 %1108 }
  0xb8   : > { %v1119_v50 = vsel %vm570_vm0, %v1109_v48, 0 }
  0xb9   : > { %v597_v49 = vpop.f32.mrf.mxu0  ;;  %1131 = vmatpush.bf16.xpose.msrb.mxu0 %v1119_v50 }
  0xba   : > { %v604_v51 = vsel %vm536_vm3, %v597_v49, -inf }
  0xbb   : > { %v612_v52 = vsel %vm570_vm0, %v604_v51, -inf }
  0xbc   : > { %613 = vmax.xlane.f32.xlu1 %v612_v52 }
  0xbf   : > { %v1095_v53 = vpop.permute.xlu1 %1094 }
  0xc0   : > { %2501 = vmatmul.msk.bf16.vlgmr.msrb.gmra.mxu0 %vm570_vm0, %v1095_v53 }
  0xc1   : > { %v599_v29 = vpop.f32.mrf.mxu0 }
  0xc2   : > { %v605_v37 = vsel %vm537_vm4, %v599_v29, -inf }
  0xc3   : > { %v615_v38 = vsel %vm570_vm0, %v605_v37, -inf }
  0xc8   : > { %923 = vrot.lane.b32.xlu0 %v2472_v56, %s3174_s30 }
 0x11f   : > { %v608_v63 = vpop.xlane.xlu0 %607 }
 0x120   : > { %v618_v0 = vsub.f32 %v602_v40, %v608_v63 }
 0x122   : > { %v622_v1 = vmul.f32 1.442695, %v618_v0 }
 0x123   : > { %v759_v2 = vpop.f32.mrf.mxu2 }
 0x124   : > { %2970 = vpow2.f32 %v622_v1  ;;  %v769_v30 = vsel %vm534_vm1, %v759_v2, -inf }
 0x125   : > { %v773_v31 = vsel %vm570_vm0, %v769_v30, -inf }
 0x127   : > { %v611_v3 = vpop.xlane.xlu0 %610 }
 0x128   : > { %v619_v4 = vsub.f32 %v603_v45, %v611_v3  ;;  %v2454_v45 = vor.u32 %v2826_v44, %v2453_v43 }
 0x12a   : > { %v2971_v5 = vpop.eup %2970  ;;  %v624_v6 = vmul.f32 1.442695, %v619_v4 }
 0x12b   : > { %v630_v7 = vsel %vm570_vm0, %v2971_v5, 0.0  ;;  %v761_v8 = vpop.f32.mrf.mxu2 }
 0x12c   : > { %2972 = vpow2.f32 %v624_v6  ;;  %631 = vadd.xlane.f32.xlu2 %v630_v7  ;;  %v3379_v9 = vsel %vm535_vm2, %v761_v8, -inf }
 0x12d   : > { %v776_v10 = vsel %vm570_vm0, %v3379_v9, -inf }
 0x12e   : > { %777 = vmax.xlane.f32.xlu1 %v776_v10 }
 0x12f   : > { %v614_v11 = vpop.xlane.xlu1 %613 }
 0x130   : > { %v620_v12 = vsub.f32 %v604_v51, %v614_v11 }
 0x132   : > { %v2973_v13 = vpop.eup %2972  ;;  %v626_v14 = vmul.f32 1.442695, %v620_v12 }
 0x133   : > { %v633_v15 = vsel %vm570_vm0, %v2973_v13, 0.0  ;;  %v764_v16 = vpop.f32.mrf.mxu2 }
 0x134   : > { %2974 = vpow2.f32 %v626_v14  ;;  %634 = vadd.xlane.f32.xlu0 %v633_v15  ;;  %v771_v55 = vsel %vm536_vm3, %v764_v16, -inf }
 0x135   : > { %v779_v56 = vsel %vm570_vm0, %v771_v55, -inf }
 0x13a   : > { %v3387_v18 = vpop.eup %2974  ;;  %v924_v19 = vpop.permute.xlu0 %923 }
 0x13b   : > { %v935_v20 = vsel %vm570_vm0, %v924_v19, 0  ;;  %v636_v21 = vsel %vm570_vm0, %v3387_v18, 0.0  ;;  %v766_v22 = vpop.f32.mrf.mxu2 }
 0x13c   : > { %943 = vmatpush.bf16.xpose.msrb.mxu1 %v935_v20  ;;  %637 = vadd.xlane.f32.xlu1 %v636_v21  ;;  %v3397_v23 = vsel %vm537_vm4, %v766_v22, -inf }
 0x13d   : > { %v782_v25 = vsel %vm570_vm0, %v3397_v23, -inf  ;;  %v1133_v32 = vpop.f32.mrf.mxu0 }
 0x13e   : > { %v3416_v33 = vsel %vm534_vm1, %v1133_v32, -inf }
 0x13f   : > { %v1147_v34 = vsel %vm570_vm0, %v3416_v33, -inf }
 0x144   : > { %909 = vrot.lane.b32.xlu2 %v2828_v24, %s3174_s30  ;;  %944 = vmatpush.bf16.xpose.msrb.mxu1 %v932_v26 }
 0x145   : > { %783 = vmax.xlane.f32.xlu1 %v782_v25  ;;  %v1135_v39 = vpop.f32.mrf.mxu0 }
 0x146   : > { %v3427_v40 = vsel %vm535_vm2, %v1135_v39, -inf }
 0x147   : > { %v1150_v41 = vsel %vm570_vm0, %v3427_v40, -inf }
 0x148   : > { %907 = vrot.lane.b32.xlu0 %v2827_v27, %s3174_s30 }
 0x150   : > { %1096 = vrot.lane.b32.xlu0 %v2834_v28, %s3173_s29 }
 0x16d   : > { %774 = vmax.xlane.f32.xlu2 %v773_v31 }
 0x175   : > { %1148 = vmax.xlane.f32.xlu2 %v1147_v34 }
 0x17a   : > { %616 = vmax.xlane.f32.xlu0 %v615_v38 }
 0x182   : > { %1151 = vmax.xlane.f32.xlu0 %v1150_v41 }
 0x196   : > { %831 = vrot.lane.b32.xlu0 %v2454_v45, %s3172_s17 }
 0x19f   : > { %v632_v46 = vpop.xlane.xlu2 %631 }
 0x1a0   : > { %2976 = vrcp.f32 %v632_v46 }
 0x1a1   : > { %v778_v8 = vpop.xlane.xlu1 %777 }
 0x1a2   : > { %v786_v14 = vsub.f32 %v3379_v9, %v778_v8 }
 0x1a4   : > { %v791_v19 = vmul.f32 1.442695, %v786_v14 }
 0x1a6   : > { %v2977_v49 = vpop.eup %2976 }
 0x1a7   : > { %v635_v48 = vpop.xlane.xlu0 %634  ;;  %v646_v51 = vmul.f32 %v2977_v49, %v2971_v5  ;;  %v910_v58 = vpop.permute.xlu2 %909 }
 0x1a8   : > { %2978 = vrcp.f32 %v635_v48 }
 0x1ae   : > { %v2979_v50 = vpop.eup %2978 }
 0x1af   : > { %v647_v52 = vmul.f32 %v2979_v50, %v2973_v13  ;;  %v3458_v16 = vpop.xlane.xlu1 %637 }
 0x1b1   : > { %v650_v53 = vpack.c.bf16 %v647_v52, %v646_v51  ;;  %v2449_v52 = vld [vmem:[%s3293_s25 + $0x4] sm:$0xf] }
 0x1b3   : > { %2427 = vmatmul.msk.bf16.vlgmr.msra.gmra.mxu1 %vm570_vm0, %v650_v53  ;;  %v2825_v53 = vld [vmem:[%s3293_s25 + $0x8] sm:$0xf0] }
 0x1ba   : > { %v908_v54 = vpop.permute.xlu0 %907 }
 0x1c0   : > { %780 = vmax.xlane.f32.xlu0 %v779_v56  ;;  %v2832_v56 = vld [vmem:[%s3293_s25 + $0x18] sm:$0xf0] }
 0x1c2   : > { %v1097_v57 = vpop.permute.xlu0 %1096 }
 0x1c3   : > { %2473 = vmatmul.msk.bf16.vlgmr.msrb.gmra.mxu1 %vm570_vm0, %v908_v54  ;;  %2502 = vmatmul.msk.bf16.gmra.mxu0 %vm570_vm0, %v1097_v57  ;;  %v2450_v54 = vor.u32 %v2825_v53, %v2449_v52 }
 0x1d3   : > { %2474 = vmatmul.msk.bf16.gmra.mxu1 %vm570_vm0, %v910_v58  ;;  %v2509_v58 = vld [vmem:[%s3293_s25 + $0x14] sm:$0xf] }
 0x1e0   : > { %v775_v59 = vpop.xlane.xlu2 %774 }
 0x1e1   : > { %v785_v60 = vsub.f32 %v769_v30, %v775_v59  ;;  %v784_v30 = vpop.xlane.xlu1 %783  ;;  %v2838_v59 = vld [vmem:[%s3293_s25 + $0x18] sm:$0xf0] }
 0x1e3   : > { %v789_v61 = vmul.f32 1.442695, %v785_v60  ;;  %v2510_v60 = vor.u32 %v2838_v59, %v2509_v58 }
 0x1e5   : > { %2980 = vpow2.f32 %v789_v61 }
 0x1e8   : > { %v1149_v43 = vpop.xlane.xlu2 %1148 }
 0x1e9   : > { %v1159_v47 = vsub.f32 %v3416_v33, %v1149_v43  ;;  %v2477_v43 = vld [vmem:[%s3293_s25 + $0x4] sm:$0xf] }
 0x1eb   : > { %v3442_v62 = vpop.eup %2980  ;;  %v1163_v50 = vmul.f32 1.442695, %v1159_v47 }
 0x1ec   : > { %v797_v63 = vsel %vm570_vm0, %v3442_v62, 0.0 }
 0x1ed   : > { %798 = vadd.xlane.f32.xlu1 %v797_v63  ;;  %v617_v0 = vpop.xlane.xlu0 %616 }
 0x1ee   : > { %v621_v7 = vsub.f32 %v605_v37, %v617_v0  ;;  %v788_v37 = vsub.f32 %v3397_v23, %v784_v30 }
 0x1f0   : > { %v628_v10 = vmul.f32 1.442695, %v621_v7  ;;  %v795_v41 = vmul.f32 1.442695, %v788_v37  ;;  %v2505_v37 = vld [vmem:[%s3293_s25 + $0x4] sm:$0xf] }
 0x1f2   : > { %2982 = vpow2.f32 %v628_v10 }
 0x1f3   : > { %2984 = vpow2.f32 %v791_v19 }
 0x1f5   : > { %v3446_v1 = vpop.xlane.xlu0 %1151 }
 0x1f6   : > { %v1160_v61 = vsub.f32 %v3427_v40, %v3446_v1 }
 0x1f8   : > { %v3460_v21 = vpop.eup %2982  ;;  %v1165_v63 = vmul.f32 1.442695, %v1160_v61 }
 0x1f9   : > { %v639_v42 = vsel %vm570_vm0, %v3460_v21, 0.0  ;;  %v3483_v32 = vpop.eup %2984 }
 0x1fa   : > { %v800_v39 = vsel %vm570_vm0, %v3483_v32, 0.0 }
 0x208   : > { %v832_v2 = vpop.permute.xlu0 %831 }
 0x209   : > { %847 = vmatpush.bf16.msrb.mxu3 %v832_v2 }
 0x230   : > { %v679_v3 = vpop.f32.mrf.mxu1 }
 0x231   : > { %v689_v4 = vpack.c.bf16 %v679_v3, %v679_v3 }
 0x233   : > { %694 = vst.msk [vmem:[#allocation2] sm:$0xf] %vm693_vm5, %v689_v4  ;;  %v781_v20 = vpop.xlane.xlu0 %780 }
 0x234   : > { %v787_v26 = vsub.f32 %v771_v55, %v781_v20  ;;  %v2481_v55 = vld [vmem:[%s3293_s25 + $0x14] sm:$0xf] }
 0x235   : > { %v2482_v57 = vor.u32 %v2832_v56, %v2481_v55 }
 0x236   : > { %v793_v29 = vmul.f32 1.442695, %v787_v26 }
 0x238   : > { %v681_v5 = vpop.f32.mrf.mxu1  ;;  %2986 = vpow2.f32 %v793_v29 }
 0x239   : > { %v690_v6 = vpack.c.bf16 %v681_v5, %v681_v5  ;;  %2988 = vpow2.f32 %v795_v41 }
 0x23a   : > { %2990 = vpow2.f32 %v1163_v50 }
 0x23b   : > { %695 = vst.msk [vmem:[#allocation2 + $0x4] sm:$0xf] %vm693_vm5, %v690_v6  ;;  %2992 = vpow2.f32 %v1165_v63 }
 0x23c   : > { %2994 = vrcp.f32 %v3458_v16 }
 0x23e   : > { %v3495_v44 = vpop.eup %2986 }
 0x23f   : > { %v803_v49 = vsel %vm570_vm0, %v3495_v44, 0.0  ;;  %v3509_v36 = vpop.eup %2988 }
 0x240   : > { %v946_v11 = vpop.f32.mrf.mxu1  ;;  %v1138_v12 = vpop.f32.mrf.mxu0  ;;  %v806_v17 = vsel %vm570_vm0, %v3509_v36, 0.0 }
 0x241   : > { %v3453_v13 = vsel %vm536_vm3, %v1138_v12, -inf  ;;  %v3481_v31 = vsel %vm534_vm1, %v946_v11, -inf  ;;  %v3513_v33 = vpop.eup %2990 }
 0x242   : > { %v1153_v15 = vsel %vm570_vm0, %v3453_v13, -inf  ;;  %v960_v38 = vsel %vm570_vm0, %v3481_v31, -inf  ;;  %v1171_v51 = vsel %vm570_vm0, %v3513_v33, 0.0  ;;  %v3528_v0 = vpop.eup %2992 }
 0x243   : > { %1154 = vmax.xlane.f32.xlu2 %v1153_v15  ;;  %v1174_v2 = vsel %vm570_vm0, %v3528_v0, 0.0  ;;  %v2995_v8 = vpop.eup %2994 }
 0x244   : > { %v648_v15 = vmul.f32 %v2995_v8, %v3387_v18 }
 0x248   : > { %v948_v22 = vpop.f32.mrf.mxu1  ;;  %v1140_v24 = vpop.f32.mrf.mxu0 }
 0x249   : > { %v3465_v25 = vsel %vm535_vm2, %v948_v22, -inf  ;;  %v3470_v9 = vsel %vm537_vm4, %v1140_v24, -inf }
 0x24a   : > { %v963_v27 = vsel %vm570_vm0, %v3465_v25, -inf  ;;  %v1156_v28 = vsel %vm570_vm0, %v3470_v9, -inf }
 0x24b   : > { %964 = vmax.xlane.f32.xlu1 %v963_v27  ;;  %1157 = vmax.xlane.f32.xlu0 %v1156_v28 }
 0x24c   : > { %640 = vadd.xlane.f32.xlu2 %v639_v42 }
 0x250   : > { %v951_v34 = vpop.f32.mrf.mxu1 }
 0x251   : > { %v3493_v35 = vsel %vm536_vm3, %v951_v34, -inf }
 0x252   : > { %v966_v23 = vsel %vm570_vm0, %v3493_v35, -inf }
 0x253   : > { %961 = vmax.xlane.f32.xlu0 %v960_v38  ;;  %v2837_v38 = vld [vmem:[%s3293_s25 + $0x8] sm:$0xf0] }
 0x254   : > { %801 = vadd.xlane.f32.xlu2 %v800_v39 }
 0x258   : > { %v953_v45 = vpop.f32.mrf.mxu1 }
 0x259   : > { %v3502_v46 = vsel %vm537_vm4, %v953_v45, -inf  ;;  %v2831_v45 = vld [vmem:[%s3293_s25 + $0x8] sm:$0xf0] }
 0x25a   : > { %v969_v48 = vsel %vm570_vm0, %v3502_v46, -inf }
 0x25b   : > { %970 = vmax.xlane.f32.xlu1 %v969_v48  ;;  %967 = vmax.xlane.f32.xlu0 %v966_v23 }
 0x25c   : > { %804 = vadd.xlane.f32.xlu2 %v803_v49  ;;  %v2478_v49 = vor.u32 %v2831_v45, %v2477_v43 }
 0x260   : > { %v799_v3 = vpop.xlane.xlu1 %798 }
 0x264   : > { %807 = vadd.xlane.f32.xlu2 %v806_v17 }
 0x26c   : > { %1172 = vadd.xlane.f32.xlu2 %v1171_v51 }
 0x274   : > { %829 = vrot.lane.b32.xlu1 %v2450_v54, %s3172_s17 }
 0x284   : > { %1018 = vrot.lane.b32.xlu2 %v2482_v57, %s3174_s30 }
 0x28c   : > { %1205 = vrot.lane.b32.xlu2 %v2510_v60, %s3173_s29 }
 0x29e   : > { %1175 = vadd.xlane.f32.xlu1 %v1174_v2 }
 0x2b6   : > { %v1155_v4 = vpop.xlane.xlu2 %1154 }
 0x2b7   : > { %v1161_v28 = vsub.f32 %v3453_v13, %v1155_v4 }
 0x2b9   : > { %v1167_v29 = vmul.f32 1.442695, %v1161_v28 }
 0x2be   : > { %v965_v5 = vpop.xlane.xlu1 %964  ;;  %v3533_v6 = vpop.xlane.xlu0 %1157 }
 0x2bf   : > { %v973_v7 = vsub.f32 %v3465_v25, %v965_v5  ;;  %v641_v40 = vpop.xlane.xlu2 %640  ;;  %v1162_v60 = vsub.f32 %v3470_v9, %v3533_v6 }
 0x2c0   : > { %2996 = vrcp.f32 %v641_v40 }
 0x2c1   : > { %v978_v1 = vmul.f32 1.442695, %v973_v7  ;;  %v1169_v61 = vmul.f32 1.442695, %v1162_v60 }
 0x2c3   : > { %2998 = vpow2.f32 %v978_v1 }
 0x2c6   : > { %v2997_v10 = vpop.eup %2996  ;;  %v962_v11 = vpop.xlane.xlu0 %961 }
 0x2c7   : > { %v802_v12 = vpop.xlane.xlu2 %801  ;;  %v972_v14 = vsub.f32 %v3481_v31, %v962_v11  ;;  %v649_v19 = vmul.f32 %v2997_v10, %v3460_v21 }
 0x2c9   : > { %v3539_v16 = vpop.eup %2998  ;;  %v976_v20 = vmul.f32 1.442695, %v972_v14  ;;  %v651_v22 = vpack.c.bf16 %v649_v19, %v648_v15 }
 0x2ca   : > { %v987_v24 = vsel %vm570_vm0, %v3539_v16, 0.0 }
 0x2cb   : > { %3000 = vpow2.f32 %v976_v20  ;;  %2428 = vmatmul.msk.bf16.vlgmr.msra.gmra.mxu3 %vm570_vm0, %v651_v22  ;;  %988 = vadd.xlane.f32.xlu2 %v987_v24 }
 0x2ce   : > { %v968_v25 = vpop.xlane.xlu0 %967  ;;  %v971_v13 = vpop.xlane.xlu1 %970 }
 0x2cf   : > { %v805_v26 = vpop.xlane.xlu2 %804  ;;  %v974_v27 = vsub.f32 %v3493_v35, %v968_v25  ;;  %v2506_v35 = vor.u32 %v2837_v38, %v2505_v37  ;;  %v975_v58 = vsub.f32 %v3502_v46, %v971_v13 }
 0x2d1   : > { %v3545_v18 = vpop.eup %3000  ;;  %v980_v21 = vmul.f32 1.442695, %v974_v27  ;;  %v982_v59 = vmul.f32 1.442695, %v975_v58 }
 0x2d2   : > { %v984_v42 = vsel %vm570_vm0, %v3545_v18, 0.0 }
 0x2d3   : > { %985 = vadd.xlane.f32.xlu0 %v984_v42  ;;  %3002 = vpow2.f32 %v980_v21 }
 0x2d4   : > { %3004 = vpow2.f32 %v1167_v29 }
 0x2d5   : > { %3006 = vrcp.f32 %v802_v12 }
 0x2d6   : > { %3008 = vrcp.f32 %v799_v3 }
 0x2d7   : > { %v808_v30 = vpop.xlane.xlu2 %807 }
 0x2d8   : > { %3010 = vrcp.f32 %v808_v30 }
 0x2d9   : > { %v3550_v31 = vpop.eup %3002  ;;  %3012 = vrcp.f32 %v805_v26 }
 0x2da   : > { %v990_v34 = vsel %vm570_vm0, %v3550_v31, 0.0  ;;  %v3556_v41 = vpop.eup %3004  ;;  %3014 = vpow2.f32 %v982_v59 }
 0x2db   : > { %991 = vadd.xlane.f32.xlu1 %v990_v34  ;;  %v3007_v23 = vpop.eup %3006  ;;  %v1177_v48 = vsel %vm570_vm0, %v3556_v41, 0.0  ;;  %3016 = vpow2.f32 %v1169_v61  ;;  %v2848_v61 = vld [vmem:[#allocation3 + $0x38] sm:$0xff] }
 0x2dc   : > { %v3009_v47 = vpop.eup %3008  ;;  %v814_v50 = vmul.f32 %v3007_v23, %v3483_v32  ;;  %1343 = vmatpush.bf16.msra.mxu1 %v2848_v61  ;;  %v2669_v61 = vld [vmem:[%s3978_s7 + $0xf0] sm:$0xf0] }
 0x2dd   : > { %v813_v17 = vmul.f32 %v3009_v47, %v3442_v62 }
 0x2de   : > { %v3011_v55 = vpop.eup %3010 }
 0x2df   : > { %v1173_v39 = vpop.xlane.xlu2 %1172  ;;  %v817_v53 = vpack.c.bf16 %v814_v50, %v813_v17  ;;  %v3013_v56 = vpop.eup %3012  ;;  %v816_v32 = vmul.f32 %v3011_v55, %v3509_v36 }
 0x2e0   : > { %v815_v57 = vmul.f32 %v3013_v56, %v3495_v44  ;;  %v3015_v63 = vpop.eup %3014 }
 0x2e1   : > { %v993_v2 = vsel %vm570_vm0, %v3015_v63, 0.0  ;;  %v3017_v3 = vpop.eup %3016 }
 0x2e2   : > { %v818_v62 = vpack.c.bf16 %v816_v32, %v815_v57  ;;  %v1180_v36 = vsel %vm570_vm0, %v3017_v3, 0.0 }
 0x2e3   : > { %1203 = vrot.lane.b32.xlu2 %v2506_v35, %s3173_s29  ;;  %1178 = vadd.xlane.f32.xlu1 %v1177_v48 }
 0x2e6   : > { %v830_v51 = vpop.permute.xlu1 %829 }
 0x2e7   : > { %848 = vmatpush.bf16.msrb.mxu3 %v830_v51  ;;  %1016 = vrot.lane.b32.xlu0 %v2478_v49, %s3174_s30  ;;  %v1019_v52 = vpop.permute.xlu2 %1018 }
 0x2ea   : > { %2455 = vmatmul.msk.bf16.vlgmr.msrb.gmra.mxu3 %vm570_vm0, %v817_v53 }
 0x2eb   : > { %1034 = vmatpush.bf16.msra.mxu3 %v1019_v52 }
 0x2ef   : > { %v1206_v54 = vpop.permute.xlu2 %1205 }
 0x2f0   : > { %1221 = vmatpush.bf16.msrb.mxu2 %v1206_v54 }
 0x2fa   : > { %2456 = vmatmul.msk.bf16.gmra.mxu3 %vm570_vm0, %v818_v62 }
 0x30c   : > { %994 = vadd.xlane.f32.xlu2 %v993_v2  ;;  %v2846_v2 = vld [vmem:[#allocation3 + $0x28] sm:$0xff] }
 0x311   : > { %1181 = vadd.xlane.f32.xlu0 %v1180_v36  ;;  %v1176_v44 = vpop.xlane.xlu1 %1175  ;;  %v2844_v36 = vld [vmem:[#allocation3 + $0x18] sm:$0xff] }
 0x312   : > { %3018 = vrcp.f32 %v1176_v44  ;;  %v2843_v44 = vld [vmem:[#allocation3 + $0x10] sm:$0xff] }
 0x313   : > { %3020 = vrcp.f32 %v1173_v39 }
 0x318   : > { %v3019_v4 = vpop.eup %3018 }
 0x319   : > { %v3021_v5 = vpop.eup %3020  ;;  %v1188_v7 = vmul.f32 %v3019_v4, %v3528_v0  ;;  %v2842_v4 = vld [vmem:[#allocation3 + $0x8] sm:$0xff] }
 0x31a   : > { %v1187_v9 = vmul.f32 %v3021_v5, %v3513_v33 }
 0x31c   : > { %v1191_v40 = vpack.c.bf16 %v1188_v7, %v1187_v9  ;;  %v2841_v7 = vld [vmem:[#allocation3] sm:$0xff] }
 0x33e   : > { %v989_v46 = vpop.xlane.xlu2 %988 }
 0x346   : > { %v1204_v6 = vpop.permute.xlu2 %1203  ;;  %v986_v1 = vpop.xlane.xlu0 %985 }
 0x347   : > { %1222 = vmatpush.bf16.msrb.mxu2 %v1204_v6  ;;  %3022 = vrcp.f32 %v986_v1 }
 0x348   : > { %3024 = vrcp.f32 %v989_v46 }
 0x34a   : > { %2511 = vmatmul.msk.bf16.vlgmr.msrb.gmra.mxu2 %vm570_vm0, %v1191_v40 }
 0x34d   : > { %v3023_v11 = vpop.eup %3022 }
 0x34e   : > { %v684_v8 = vpop.f32.mrf.mxu3  ;;  %v3025_v12 = vpop.eup %3024  ;;  %v1000_v15 = vmul.f32 %v3023_v11, %v3545_v18 }
 0x34f   : > { %v691_v10 = vpack.c.bf16 %v684_v8, %v684_v8  ;;  %v1001_v33 = vmul.f32 %v3025_v12, %v3539_v16  ;;  %v992_v26 = vpop.xlane.xlu1 %991 }
 0x350   : > { %3026 = vrcp.f32 %v992_v26 }
 0x351   : > { %696 = vst.msk [vmem:[#allocation2 + $0x8] sm:$0xf] %vm693_vm5, %v691_v10  ;;  %v1004_v20 = vpack.c.bf16 %v1001_v33, %v1000_v15  ;;  %v517_v33 = vld [vmem:[%s489_s14] sm:$0xff] }
 0x356   : > { %v686_v14 = vpop.f32.mrf.mxu3  ;;  %v3027_v16 = vpop.eup %3026 }
 0x357   : > { %v692_v0 = vpack.c.bf16 %v686_v14, %v686_v14  ;;  %v1179_v21 = vpop.xlane.xlu1 %1178  ;;  %v1002_v29 = vmul.f32 %v3027_v16, %v3550_v31 }
 0x359   : > { %697 = vst.msk [vmem:[#allocation2 + $0xc] sm:$0xf] %vm693_vm5, %v692_v0  ;;  %v1017_v19 = vpop.permute.xlu0 %1016  ;;  %v2966_v0 = vld [vmem:[%s3975_s4] ss:$0 sm:$0xff] }
 0x35a   : > { %1035 = vmatpush.bf16.msra.mxu3 %v1017_v19 }
 0x35d   : > { %2483 = vmatmul.msk.bf16.vlgmr.msra.gmra.mxu3 %vm570_vm0, %v1004_v20 }
 0x36d   : > { %v850_v22 = vpop.f32.mrf.mxu3 }
 0x36e   : > { %v860_v24 = vpack.c.bf16 %v850_v22, %v850_v22 }
 0x370   : > { %868 = vrot.lane.b32.xlu1 %v860_v24, %s3173_s29  ;;  %v518_v24 = vld [vmem:[%s489_s14 + $0x8] sm:$0xff] }
 0x375   : > { %v852_v25 = vpop.f32.mrf.mxu3 }
 0x376   : > { %v861_v27 = vpack.c.bf16 %v852_v25, %v852_v25 }
 0x378   : > { %870 = vrot.lane.b32.xlu1 %v861_v27, %s3173_s29 }
 0x37d   : > { %v855_v45 = vpop.f32.mrf.mxu3 }
 0x37e   : > { %v862_v54 = vpack.c.bf16 %v855_v45, %v855_v45 }
 0x37f   : > { %v995_v18 = vpop.xlane.xlu2 %994 }
 0x380   : > { %3028 = vrcp.f32 %v995_v18  ;;  %v519_v18 = vld [vmem:[%s489_s14 + $0x10] sm:$0xff] }
 0x381   : > { %3030 = vrcp.f32 %v1179_v21 }
 0x384   : > { %v1182_v28 = vpop.xlane.xlu0 %1181 }
 0x385   : > { %3032 = vrcp.f32 %v1182_v28  ;;  %v857_v31 = vpop.f32.mrf.mxu3 }
 0x386   : > { %v3029_v42 = vpop.eup %3028  ;;  %v863_v51 = vpack.c.bf16 %v857_v31, %v857_v31 }
 0x387   : > { %v1003_v30 = vmul.f32 %v3029_v42, %v3015_v63  ;;  %v3031_v34 = vpop.eup %3030  ;;  %v2847_v63 = vld [vmem:[#allocation3 + $0x30] sm:$0xff]  ;;  %v520_v42 = vld [vmem:[%s489_s14 + $0x18] sm:$0xff] }
 0x388   : > { %v1189_v13 = vmul.f32 %v3031_v34, %v3556_v41  ;;  %1344 = vmatpush.bf16.msra.mxu1 %v2847_v63  ;;  %v2675_v63 = vld [vmem:[%s3978_s7 + $0xe8] sm:$0xf] }
 0x389   : > { %v1005_v37 = vpack.c.bf16 %v1003_v30, %v1002_v29 }
 0x38b   : > { %v3033_v38 = vpop.eup %3032  ;;  %2484 = vmatmul.msk.bf16.gmra.mxu3 %vm570_vm0, %v1005_v37  ;;  %v3175_v37 = vmov 128.0  }
 0x38c   : > { %v1190_v39 = vmul.f32 %v3033_v38, %v3017_v3  ;;  %1345 = vmatpush.bf16.msra.mxu1 %v2846_v2  ;;  %v2845_v3 = vld [vmem:[#allocation3 + $0x20] sm:$0xff]  ;;  %3034 = vrcp.f32 %v3175_v37  ;;  %v2880_v2 = vld [vmem:[%s3978_s7 + $0xf4] sm:$0xf0] }
 0x38d   : > { %v2867_v37 = vld [vmem:[%s3978_s7 + $0x8c] sm:$0xf0] }
 0x38e   : > { %v1192_v35 = vpack.c.bf16 %v1190_v39, %v1189_v13 }
 0x390   : > { %2512 = vmatmul.msk.bf16.gmra.mxu2 %vm570_vm0, %v1192_v35  ;;  %1346 = vmatpush.bf16.msra.mxu1 %v2845_v3 }
 0x392   : > { %v3035_v38 = vpop.eup %3034 }
 0x393   : > { %v1377_v13 = vmul.f32 128.0, %v3035_v38  ;;  %vm1381_vm9 = vweird.f32 %v3035_v38 }
 0x394   : > { %1347 = vmatpush.bf16.msra.mxu1 %v2844_v36  ;;  %v2676_v36 = vor.u32 %v2880_v2, %v2675_v63  ;;  %v2587_v63 = vld [vmem:[%s3978_s7 + $0x40] sm:$0xf]  ;;  %v2859_v2 = vld [vmem:[%s3978_s7 + $0x4c] sm:$0xf0] }
 0x395   : > { %v1378_v39 = vsub.f32 1.0, %v1377_v13 }
 0x396   : > { %1711 = vmatpush.bf16.msra.mxu2 %v2676_v36  ;;  %v2588_v36 = vor.u32 %v2859_v2, %v2587_v63  ;;  %v2967_v63 = vld [vmem:[%s3977_s6] ss:$0 sm:$0xff] }
 0x397   : > { %v1379_v35 = vmul.f32 %v3035_v38, %v1378_v39  ;;  %v2621_v39 = vld [vmem:[%s3978_s7 + $0x90] sm:$0xf0] }
 0x398   : > { %1348 = vmatpush.bf16.msra.mxu1 %v2843_v44  ;;  %v2878_v44 = vld [vmem:[%s3978_s7 + $0xec] sm:$0xf] }
 0x39c   : > { %1349 = vmatpush.bf16.msra.mxu1 %v2842_v4 }
 0x3a0   : > { %1350 = vmatpush.bf16.msra.mxu1 %v2841_v7  ;;  %v2875_v7 = vld [vmem:[%s3978_s7 + $0xcc] sm:$0xf0] }
 0x3cd   : > { %v1224_v43 = vpop.f32.mrf.mxu2 }
 0x3ce   : > { %v1234_v23 = vpack.c.bf16 %v1224_v43, %v1224_v43  ;;  %v1380_v43 = vadd.f32 %v3035_v38, %v1379_v35  ;;  %v2627_v35 = vld [vmem:[%s3978_s7 + $0x88] sm:$0xf] }
 0x3d0   : > { %1242 = vrot.lane.b32.xlu0 %v1234_v23, %s3172_s17  ;;  %v3630_v45 = vsel %vm1381_vm9, %v3035_v38, %v1380_v43  ;;  %v2865_v38 = vld [vmem:[%s3978_s7 + $0x84] sm:$0xf]  ;;  %v2868_v43 = vld [vmem:[%s3978_s7 + $0x94] sm:$0xf0] }
 0x3d5   : > { %v1226_v47 = vpop.f32.mrf.mxu2 }
 0x3d6   : > { %v1235_v48 = vpack.c.bf16 %v1226_v47, %v1226_v47 }
 0x3d8   : > { %1244 = vrot.lane.b32.xlu1 %v1235_v48, %s3172_s17 }
 0x3e0   : > { %v1037_v49 = vpop.f32.mrf.mxu3 }
 0x3e1   : > { %v1047_v50 = vpack.c.bf16 %v1037_v49, %v1037_v49 }
 0x3e2   : > { %v869_v17 = vpop.permute.xlu1 %868 }
 0x3e3   : > { %881 = vst.msk [vmem:[#allocation2] sm:$0xf] %vm880_vm6, %v869_v17  ;;  %1055 = vrot.lane.b32.xlu2 %v1047_v50, %s3174_s30 }
 0x3e8   : > { %v1039_v41 = vpop.f32.mrf.mxu3 }
 0x3e9   : > { %v1048_v52 = vpack.c.bf16 %v1039_v41, %v1039_v41 }
 0x3ea   : > { %v871_v53 = vpop.permute.xlu1 %870 }
 0x3eb   : > { %882 = vst.msk [vmem:[#allocation2 + $0x4] sm:$0xf] %vm880_vm6, %v871_v53  ;;  %874 = vrot.lane.b32.xlu2 %v863_v51, %s3173_s29  ;;  %1057 = vrot.lane.b32.xlu1 %v1048_v52, %s3174_s30 }
 0x3f3   : > { %872 = vrot.lane.b32.xlu1 %v862_v54, %s3173_s29 }
 0x40e   : > { %v1042_v55 = vpop.f32.mrf.mxu3 }
 0x40f   : > { %v1049_v56 = vpack.c.bf16 %v1042_v55, %v1042_v55 }
 0x411   : > { %1059 = vrot.lane.b32.xlu0 %v1049_v56, %s3174_s30 }
 0x413   : > { %v1229_v32 = vpop.f32.mrf.mxu2 }
 0x414   : > { %v1236_v57 = vpack.c.bf16 %v1229_v32, %v1229_v32 }
 0x416   : > { %v1044_v62 = vpop.f32.mrf.mxu3  ;;  %1246 = vrot.lane.b32.xlu2 %v1236_v57, %s3172_s17 }
 0x417   : > { %v1050_v58 = vpack.c.bf16 %v1044_v62, %v1044_v62  ;;  %v2667_v62 = vld [vmem:[%s3978_s7 + $0xe0] sm:$0xf] }
 0x419   : > { %1061 = vrot.lane.b32.xlu1 %v1050_v58, %s3174_s30  ;;  %v2879_v58 = vld [vmem:[%s3978_s7 + $0xec] sm:$0xf0] }
 0x41b   : > { %v1231_v59 = vpop.f32.mrf.mxu2 }
 0x41c   : > { %v1237_v60 = vpack.c.bf16 %v1231_v59, %v1231_v59  ;;  %v2877_v59 = vld [vmem:[%s3978_s7 + $0xe4] sm:$0xf] }
 0x41d   : > { %v2672_v3 = vor.u32 %v2877_v59, %v2669_v61  ;;  %v2862_v59 = vld [vmem:[%s3978_s7 + $0x6c] sm:$0xf] }
 0x41e   : > { %1248 = vrot.lane.b32.xlu0 %v1237_v60, %s3172_s17  ;;  %v2668_v60 = vor.u32 %v2879_v58, %v2667_v62 }
 0x41f   : > { %1692 = vmatpush.bf16.msra.mxu0 %v2672_v3  ;;  %v2857_v3 = vld [vmem:[%s3978_s7 + $0x44] sm:$0xf] }
 0x420   : > { %1673 = vmatpush.bf16.msrb.mxu3 %v2668_v60  ;;  %v2613_v60 = vld [vmem:[%s3978_s7 + $0x78] sm:$0xf0] }
 0x421   : > { %v2616_v61 = vor.u32 %v2862_v59, %v2613_v60 }
 0x43d   : > { %v1056_v46 = vpop.permute.xlu2 %1055 }
 0x43e   : > { %1068 = vst.msk [vmem:[#allocation2] sm:$0xf] %vm1067_vm7, %v1056_v46  ;;  %v2677_v46 = vld [vmem:[%s3978_s7 + $0xf8] sm:$0xf0] }
 0x43f   : > { %v2680_v4 = vor.u32 %v2878_v44, %v2677_v46  ;;  %v2589_v44 = vld [vmem:[%s3978_s7 + $0x50] sm:$0xf0]  ;;  %v2595_v46 = vld [vmem:[%s3978_s7 + $0x48] sm:$0xf] }
 0x441   : > { %1730 = vmatpush.bf16.msrb.mxu1 %v2680_v4  ;;  %v2860_v4 = vld [vmem:[%s3978_s7 + $0x54] sm:$0xf0] }
 0x442   : > { %v1243_v5 = vpop.permute.xlu0 %1242 }
 0x443   : > { %1255 = vst.msk [vmem:[#allocation2] sm:$0xf] %vm1254_vm8, %v1243_v5  ;;  %v2651_v5 = vld [vmem:[%s3978_s7 + $0xc0] sm:$0xf] }
 0x445   : > { %v875_v9 = vpop.permute.xlu2 %874 }
 0x446   : > { %884 = vst.msk [vmem:[#allocation2 + $0xc] sm:$0xf] %vm880_vm6, %v875_v9  ;;  %v2873_v9 = vld [vmem:[%s3978_s7 + $0xc4] sm:$0xf] }
 0x44a   : > { %v1245_v6 = vpop.permute.xlu1 %1244 }
 0x45d   : > { %v1058_v40 = vpop.permute.xlu1 %1057 }
 0x45e   : > { %1069 = vst.msk [vmem:[#allocation2 + $0x4] sm:$0xf] %vm1067_vm7, %v1058_v40  ;;  %v2653_v40 = vld [vmem:[%s3978_s7 + $0xd0] sm:$0xf0] }
 0x45f   : > { %1256 = vst.msk [vmem:[#allocation2 + $0x4] sm:$0xf] %vm1254_vm8, %v1245_v6  ;;  %v2652_v6 = vor.u32 %v2875_v7, %v2651_v5  ;;  %v2592_v5 = vor.u32 %v2857_v3, %v2589_v44  ;;  %v2596_v7 = vor.u32 %v2860_v4, %v2595_v46  ;;  %v2968_v46 = vld [vmem:[%s3976_s5] ss:$0 sm:$0xff] }
 0x461   : > { %1674 = vmatpush.bf16.msrb.mxu3 %v2652_v6  ;;  %v2597_v6 = vld [vmem:[%s3978_s7 + $0x58] sm:$0xf0] }
 0x465   : > { %v873_v1 = vpop.permute.xlu1 %872 }
 0x466   : > { %883 = vst.msk [vmem:[#allocation2 + $0x8] sm:$0xf] %vm880_vm6, %v873_v1  ;;  %v2839_v8 = vld [vmem:[#allocation2] sm:$0xff]  ;;  %v2659_v1 = vld [vmem:[%s3978_s7 + $0xc8] sm:$0xf] }
 0x467   : > { %1351 = vmatmul.bf16.vlgmr.msra.gmra.mxu1 %v2839_v8  ;;  %v2876_v8 = vld [vmem:[%s3978_s7 + $0xd4] sm:$0xf0] }
 0x470   : > { %v1247_v11 = vpop.permute.xlu2 %1246 }
 0x483   : > { %v1060_v10 = vpop.permute.xlu0 %1059 }
 0x484   : > { %1070 = vst.msk [vmem:[#allocation2 + $0x8] sm:$0xf] %vm1067_vm7, %v1060_v10  ;;  %v2656_v10 = vor.u32 %v2873_v9, %v2653_v40  ;;  %v2858_v9 = vld [vmem:[%s3978_s7 + $0x4c] sm:$0xf] }
 0x485   : > { %1257 = vst.msk [vmem:[#allocation2 + $0x8] sm:$0xf] %vm1254_vm8, %v1247_v11  ;;  %v2660_v11 = vor.u32 %v2876_v8, %v2659_v1  ;;  %v2600_v40 = vor.u32 %v2858_v9, %v2597_v6  ;;  %v2571_v1 = vld [vmem:[%s3978_s7 + $0x20] sm:$0xf]  ;;  %v2855_v8 = vld [vmem:[%s3978_s7 + $0x2c] sm:$0xf0] }
 0x486   : > { %1693 = vmatpush.bf16.msra.mxu0 %v2656_v10  ;;  %v2853_v10 = vld [vmem:[%s3978_s7 + $0x24] sm:$0xf] }
 0x487   : > { %1712 = vmatpush.bf16.msra.mxu2 %v2660_v11  ;;  %v2572_v11 = vor.u32 %v2855_v8, %v2571_v1 }
 0x48b   : > { %v1062_v12 = vpop.permute.xlu1 %1061 }
 0x48c   : > { %1071 = vst.msk [vmem:[#allocation2 + $0xc] sm:$0xf] %vm1067_vm7, %v1062_v12  ;;  %v2874_v12 = vld [vmem:[%s3978_s7 + $0xcc] sm:$0xf] }
 0x490   : > { %v1249_v14 = vpop.permute.xlu0 %1248 }
 0x491   : > { %1258 = vst.msk [vmem:[#allocation2 + $0xc] sm:$0xf] %vm1254_vm8, %v1249_v14  ;;  %v2661_v14 = vld [vmem:[%s3978_s7 + $0xd8] sm:$0xf0] }
 0x498   : > { %v2840_v15 = vld [vmem:[#allocation2 + $0x8] sm:$0xff] }
 0x499   : > { %1356 = vmatmul.bf16.gmra.mxu1 %v2840_v15  ;;  %v2664_v15 = vor.u32 %v2874_v12, %v2661_v14  ;;  %v2573_v12 = vld [vmem:[%s3978_s7 + $0x30] sm:$0xf0]  ;;  %v2579_v14 = vld [vmem:[%s3978_s7 + $0x28] sm:$0xf] }
 0x49b   : > { %1731 = vmatpush.bf16.msrb.mxu1 %v2664_v15  ;;  %v2856_v15 = vld [vmem:[%s3978_s7 + $0x34] sm:$0xf0] }
 0x4e4   : > { %v1352_v19 = vpop.f32.mrf.mxu1 }
 0x4e5   : > { %v1353_v20 = vadd.f32 %v2966_v0, %v1352_v19  ;;  %v2869_v19 = vld [vmem:[%s3978_s7 + $0xa4] sm:$0xf] }
 0x4e7   : > { %v3618_v22 = vadd.f32 %v1353_v20, %v517_v33  ;;  %v2871_v33 = vld [vmem:[%s3978_s7 + $0xac] sm:$0xf0] }
 0x4e9   : > { %1368 = vadd.xlane.f32.xlu1 %v3618_v22 }
 0x4ec   : > { %v1354_v25 = vpop.f32.mrf.mxu1 }
 0x4ed   : > { %v1355_v26 = vadd.f32 %v2966_v0, %v1354_v25  ;;  %v2643_v25 = vld [vmem:[%s3978_s7 + $0xa8] sm:$0xf] }
 0x4ef   : > { %v3621_v27 = vadd.f32 %v1355_v26, %v518_v24  ;;  %v2637_v24 = vld [vmem:[%s3978_s7 + $0xb0] sm:$0xf0]  ;;  %v2872_v26 = vld [vmem:[%s3978_s7 + $0xb4] sm:$0xf0] }
 0x4f1   : > { %1370 = vadd.xlane.f32.xlu2 %v3621_v27 }
 0x516   : > { %v1357_v21 = vpop.f32.mrf.mxu1 }
 0x517   : > { %v1358_v16 = vadd.f32 %v2966_v0, %v1357_v21  ;;  %v2644_v21 = vor.u32 %v2872_v26, %v2643_v25  ;;  %v2555_v25 = vld [vmem:[%s3978_s7] sm:$0xf] }
 0x519   : > { %v3624_v28 = vadd.f32 %v1358_v16, %v519_v18  ;;  %v2640_v18 = vor.u32 %v2869_v19, %v2637_v24  ;;  %v2870_v16 = vld [vmem:[%s3978_s7 + $0xac] sm:$0xf]  ;;  %1713 = vmatpush.bf16.msra.mxu2 %v2644_v21  ;;  %v2580_v19 = vor.u32 %v2856_v15, %v2579_v14  ;;  %v2581_v24 = vld [vmem:[%s3978_s7 + $0x38] sm:$0xf0]  ;;  %v2851_v21 = vld [vmem:[%s3978_s7 + $0xc] sm:$0xf0] }
 0x51b   : > { %1372 = vadd.xlane.f32.xlu0 %v3624_v28  ;;  %1694 = vmatpush.bf16.msra.mxu0 %v2640_v18 }
 0x51e   : > { %v1359_v29 = vpop.f32.mrf.mxu1 }
 0x51f   : > { %v1360_v30 = vadd.f32 %v2966_v0, %v1359_v29  ;;  %v2635_v0 = vld [vmem:[%s3978_s7 + $0xa0] sm:$0xf] }
 0x520   : > { %v2636_v20 = vor.u32 %v2871_v33, %v2635_v0  ;;  %v2576_v33 = vor.u32 %v2853_v10, %v2573_v12 }
 0x521   : > { %v3627_v34 = vadd.f32 %v1360_v30, %v520_v42  ;;  %v2645_v42 = vld [vmem:[%s3978_s7 + $0xb8] sm:$0xf0]  ;;  %v2619_v30 = vld [vmem:[%s3978_s7 + $0x80] sm:$0xf] }
 0x522   : > { %1675 = vmatpush.bf16.msrb.mxu3 %v2636_v20  ;;  %v2648_v29 = vor.u32 %v2870_v16, %v2645_v42  ;;  %v2620_v13 = vor.u32 %v2867_v37, %v2619_v30  ;;  %v2854_v20 = vld [vmem:[%s3978_s7 + $0x2c] sm:$0xf]  ;;  %v2849_v16 = vld [vmem:[%s3978_s7 + $0x4] sm:$0xf]  ;;  %v2557_v42 = vld [vmem:[%s3978_s7 + $0x10] sm:$0xf0] }
 0x523   : > { %1374 = vadd.xlane.f32.xlu1 %v3627_v34  ;;  %v2584_v18 = vor.u32 %v2854_v20, %v2581_v24  ;;  %v2560_v30 = vor.u32 %v2849_v16, %v2557_v42  ;;  %v2563_v37 = vld [vmem:[%s3978_s7 + $0x8] sm:$0xf] }
 0x524   : > { %1732 = vmatpush.bf16.msrb.mxu1 %v2648_v29  ;;  %v2556_v29 = vor.u32 %v2851_v21, %v2555_v25 }
 0x526   : > { %1676 = vmatpush.bf16.msrb.mxu3 %v2620_v13  ;;  %v2850_v13 = vld [vmem:[%s3978_s7 + $0xc] sm:$0xf] }
 0x55c   : > { %v1369_v23 = vpop.xlane.xlu1 %1368 }
 0x55d   : > { %v1383_v47 = vmul.f32 %v3630_v45, %v1369_v23  ;;  %v2624_v23 = vor.u32 %v2865_v38, %v2621_v39  ;;  %v2852_v38 = vld [vmem:[%s3978_s7 + $0x14] sm:$0xf0] }
 0x55f   : > { %v3634_v48 = vsub.f32 %v3618_v22, %v1383_v47  ;;  %v2628_v47 = vor.u32 %v2868_v43, %v2627_v35  ;;  %1695 = vmatpush.bf16.msra.mxu0 %v2624_v23  ;;  %v2564_v35 = vor.u32 %v2852_v38, %v2563_v37  ;;  %v2565_v43 = vld [vmem:[%s3978_s7 + $0x18] sm:$0xf0] }
 0x560   : > { %v2568_v23 = vor.u32 %v2850_v13, %v2565_v43  ;;  %v2896_v13 = vld [vmem:[#allocation5 + $0x78] sm:$0xff] }
 0x561   : > { %v1391_v31 = vmul.f32 %v3634_v48, %v3634_v48  ;;  %1714 = vmatpush.bf16.msra.mxu2 %v2628_v47  ;;  %v2888_v43 = vld [vmem:[#allocation5 + $0x38] sm:$0xff] }
 0x563   : > { %1395 = vadd.xlane.f32.xlu2 %v1391_v31  ;;  %v2866_v31 = vld [vmem:[%s3978_s7 + $0x8c] sm:$0xf] }
 0x564   : > { %v1371_v49 = vpop.xlane.xlu2 %1370 }
 0x565   : > { %v1384_v50 = vmul.f32 %v3630_v45, %v1371_v49  ;;  %v2629_v49 = vld [vmem:[%s3978_s7 + $0x98] sm:$0xf0] }
 0x567   : > { %v3640_v17 = vsub.f32 %v3621_v27, %v1384_v50  ;;  %v2632_v50 = vor.u32 %v2866_v31, %v2629_v49 }
 0x569   : > { %v1392_v41 = vmul.f32 %v3640_v17, %v3640_v17  ;;  %1733 = vmatpush.bf16.msrb.mxu1 %v2632_v50 }
 0x56b   : > { %1397 = vadd.xlane.f32.xlu0 %v1392_v41  ;;  %v2603_v41 = vld [vmem:[%s3978_s7 + $0x60] sm:$0xf] }
 0x56d   : > { %1734 = vmatpush.bf16.msrb.mxu1 %v2616_v61 }
 0x571   : > { %1735 = vmatpush.bf16.msrb.mxu1 %v2600_v40 }
 0x575   : > { %1736 = vmatpush.bf16.msrb.mxu1 %v2584_v18 }
 0x579   : > { %1737 = vmatpush.bf16.msrb.mxu1 %v2568_v23  ;;  %v2904_v23 = vld [vmem:[#allocation5 + $0xb8] sm:$0xff] }
 0x58e   : > { %v1373_v51 = vpop.xlane.xlu0 %1372 }
 0x58f   : > { %v1385_v52 = vmul.f32 %v3630_v45, %v1373_v51  ;;  %v2863_v51 = vld [vmem:[%s3978_s7 + $0x6c] sm:$0xf0] }
 0x591   : > { %v3646_v53 = vsub.f32 %v3624_v28, %v1385_v52  ;;  %v2861_v52 = vld [vmem:[%s3978_s7 + $0x64] sm:$0xf] }
 0x593   : > { %v1393_v54 = vmul.f32 %v3646_v53, %v3646_v53 }
 0x595   : > { %1399 = vadd.xlane.f32.xlu1 %v1393_v54  ;;  %v2604_v54 = vor.u32 %v2863_v51, %v2603_v41 }
 0x596   : > { %v1375_v55 = vpop.xlane.xlu1 %1374 }
 0x597   : > { %v1386_v56 = vmul.f32 %v3630_v45, %v1375_v55  ;;  %v2605_v55 = vld [vmem:[%s3978_s7 + $0x70] sm:$0xf0]  ;;  %1677 = vmatpush.bf16.msrb.mxu3 %v2604_v54 }
 0x598   : > { %v2608_v62 = vor.u32 %v2861_v52, %v2605_v55 }
 0x599   : > { %v3652_v32 = vsub.f32 %v3627_v34, %v1386_v56  ;;  %v2611_v56 = vld [vmem:[%s3978_s7 + $0x68] sm:$0xf] }
 0x59a   : > { %1696 = vmatpush.bf16.msra.mxu0 %v2608_v62 }
 0x59b   : > { %v1394_v57 = vmul.f32 %v3652_v32, %v3652_v32  ;;  %1678 = vmatpush.bf16.msrb.mxu3 %v2588_v36 }
 0x59d   : > { %1401 = vadd.xlane.f32.xlu2 %v1394_v57  ;;  %v2864_v57 = vld [vmem:[%s3978_s7 + $0x74] sm:$0xf0] }
 0x59e   : > { %v2612_v58 = vor.u32 %v2864_v57, %v2611_v56  ;;  %1697 = vmatpush.bf16.msra.mxu0 %v2592_v5 }
 0x59f   : > { %1679 = vmatpush.bf16.msrb.mxu3 %v2572_v11 }
 0x5a0   : > { %1715 = vmatpush.bf16.msra.mxu2 %v2612_v58 }
 0x5a2   : > { %1698 = vmatpush.bf16.msra.mxu0 %v2576_v33 }
 0x5a3   : > { %1680 = vmatpush.bf16.msrb.mxu3 %v2556_v29 }
 0x5a4   : > { %1716 = vmatpush.bf16.msra.mxu2 %v2596_v7 }
 0x5a6   : > { %1699 = vmatpush.bf16.msra.mxu0 %v2560_v30 }
 0x5a7   : > { %2161 = vmatpush.bf16.msra.mxu3 %v2888_v43 }
 0x5a8   : > { %1717 = vmatpush.bf16.msra.mxu2 %v2580_v19 }
 0x5aa   : > { %2180 = vmatpush.bf16.msrb.mxu0 %v2896_v13 }
 0x5ac   : > { %1718 = vmatpush.bf16.msra.mxu2 %v2564_v35  ;;  %v2911_v35 = vld [vmem:[#allocation5 + $0xf0] sm:$0xff] }
 0x5b0   : > { %2199 = vmatpush.bf16.msrb.mxu2 %v2904_v23 }
 0x5d6   : > { %v1396_v0 = vpop.xlane.xlu2 %1395 }
 0x5d7   : > { %v1403_v26 = vmul.f32 %v1396_v0, %v3630_v45 }
 0x5d9   : > { %v1407_v39 = vadd.f32 1e-07, %v1403_v26 }
 0x5db   : > { %3036 = vrsqrt.f32 %v1407_v39  ;;  %vm1417_vm11 = vweird.f32 %v1407_v39 }
 0x5de   : > { %v1398_v47 = vpop.xlane.xlu0 %1397 }
 0x5df   : > { %v1404_v31 = vmul.f32 %v1398_v47, %v3630_v45  ;;  %v2910_v47 = vld [vmem:[#allocation5 + $0xe8] sm:$0xff] }
 0x5e1   : > { %v3037_v49 = vpop.eup %3036  ;;  %v1408_v50 = vadd.f32 1e-07, %v1404_v31  ;;  %v2887_v31 = vld [vmem:[#allocation5 + $0x30] sm:$0xff] }
 0x5e2   : > { %v1412_v41 = vmul.f32 %v3037_v49, %v1407_v39  ;;  %vm1418_vm10 = vweird.f32 %v3037_v49  ;;  %v2912_v39 = vld [vmem:[#allocation5 + $0xf8] sm:$0xff]  ;;  %2162 = vmatpush.bf16.msra.mxu3 %v2887_v31 }
 0x5e3   : > { %3038 = vrsqrt.f32 %v1408_v50  ;;  %vm1419_vm12 = vmor %vm1417_vm11, %vm1418_vm10  ;;  %vm1427_vm14 = vweird.f32 %v1408_v50  ;;  %2218 = vmatpush.bf16.msra.mxu1 %v2912_v39 }
 0x5e4   : > { %v1413_v51 = vmul.f32 %v3037_v49, %v1412_v41  ;;  %v2909_v41 = vld [vmem:[#allocation5 + $0xe0] sm:$0xff] }
 0x5e6   : > { %v1414_v52 = vmul.f32 0.5, %v1413_v51  ;;  %v2886_v51 = vld [vmem:[#allocation5 + $0x28] sm:$0xff] }
 0x5e7   : > { %2219 = vmatpush.bf16.msra.mxu1 %v2911_v35  ;;  %2163 = vmatpush.bf16.msra.mxu3 %v2886_v51 }
 0x5e8   : > { %v1415_v54 = vsub.f32 1.5, %v1414_v52  ;;  %v2902_v52 = vld [vmem:[#allocation5 + $0xa8] sm:$0xff] }
 0x5e9   : > { %v3039_v55 = vpop.eup %3038 }
 0x5ea   : > { %v1416_v56 = vmul.f32 %v3037_v49, %v1415_v54  ;;  %v1422_v57 = vmul.f32 %v3039_v55, %v1408_v50  ;;  %vm1428_vm13 = vweird.f32 %v3039_v55  ;;  %v2893_v50 = vld [vmem:[#allocation5 + $0x60] sm:$0xff]  ;;  %v2892_v54 = vld [vmem:[#allocation5 + $0x58] sm:$0xff] }
 0x5eb   : > { %vm1429_vm15 = vmor %vm1427_vm14, %vm1428_vm13  ;;  %2220 = vmatpush.bf16.msra.mxu1 %v2910_v47 }
 0x5ec   : > { %v1423_v62 = vmul.f32 %v3039_v55, %v1422_v57  ;;  %v1420_v58 = vsel %vm1419_vm12, %v3037_v49, %v1416_v56  ;;  %v2903_v49 = vld [vmem:[#allocation5 + $0xb0] sm:$0xff]  ;;  %v2885_v56 = vld [vmem:[#allocation5 + $0x20] sm:$0xff] }
 0x5ed   : > { %v1451_v61 = vmul.f32 %v1420_v58, %v3634_v48  ;;  %2200 = vmatpush.bf16.msrb.mxu2 %v2903_v49  ;;  %v2901_v57 = vld [vmem:[#allocation5 + $0xa0] sm:$0xff]  ;;  %2164 = vmatpush.bf16.msra.mxu3 %v2885_v56  ;;  %v2907_v58 = vld [vmem:[#allocation5 + $0xd0] sm:$0xff] }
 0x5ee   : > { %v1424_v59 = vmul.f32 0.5, %v1423_v62  ;;  %v2891_v62 = vld [vmem:[#allocation5 + $0x50] sm:$0xff] }
 0x5ef   : > { %v1458_v44 = vadd.f32 %v2967_v63, %v1451_v61  ;;  %2221 = vmatpush.bf16.msra.mxu1 %v2909_v41  ;;  %v1503_v61 = vld [vmem:[%s3979_s8] sm:$0xf] }
 0x5f0   : > { %v1425_v60 = vsub.f32 1.5, %v1424_v59  ;;  %v2884_v59 = vld [vmem:[#allocation5 + $0x18] sm:$0xff] }
 0x5f1   : > { %v1465_v5 = vmul.f32 %v2968_v46, %v1458_v44  ;;  %2201 = vmatpush.bf16.msrb.mxu2 %v2902_v52  ;;  %2165 = vmatpush.bf16.msra.mxu3 %v2884_v59  ;;  %v3865_v44 = vperm.slane %v1503_v61, 1 }
 0x5f2   : > { %v1426_v2 = vmul.f32 %v3039_v55, %v1425_v60  ;;  %v2900_v60 = vld [vmem:[#allocation5 + $0x98] sm:$0xff] }
 0x5f4   : > { %v1430_v3 = vsel %vm1429_vm15, %v3039_v55, %v1426_v2  ;;  %v2908_v55 = vld [vmem:[#allocation5 + $0xd8] sm:$0xff]  ;;  %v2906_v2 = vld [vmem:[#allocation5 + $0xc8] sm:$0xff] }
 0x5f5   : > { %v1452_v36 = vmul.f32 %v1430_v3, %v3640_v17  ;;  %2222 = vmatpush.bf16.msra.mxu1 %v2908_v55  ;;  %2202 = vmatpush.bf16.msrb.mxu2 %v2901_v57  ;;  %v2883_v3 = vld [vmem:[#allocation5 + $0x10] sm:$0xff] }
 0x5f6   : > { %2166 = vmatpush.bf16.msra.mxu3 %v2883_v3 }
 0x5f7   : > { %v1459_v4 = vadd.f32 %v2967_v63, %v1452_v36  ;;  %v2899_v36 = vld [vmem:[#allocation5 + $0x90] sm:$0xff] }
 0x5f9   : > { %v1466_v7 = vmul.f32 %v2968_v46, %v1459_v4  ;;  %2223 = vmatpush.bf16.msra.mxu1 %v2907_v58  ;;  %2203 = vmatpush.bf16.msrb.mxu2 %v2900_v60  ;;  %v2889_v4 = vld [vmem:[#allocation5 + $0x40] sm:$0xff] }
 0x5fb   : > { %v1469_v9 = vpack.c.bf16 %v1466_v7, %v1465_v5  ;;  %v2905_v5 = vld [vmem:[#allocation5 + $0xc0] sm:$0xff] }
 0x5fd   : > { %1681 = vmatmul.bf16.vlgmr.msrb.gmra.mxu3 %v1469_v9  ;;  %1700 = vmatmul.bf16.vlgmr.msra.gmra.mxu0 %v1469_v9 }
 0x5fe   : > { %1719 = vmatmul.bf16.vlgmr.msra.gmra.mxu2 %v1469_v9  ;;  %1738 = vmatmul.bf16.vlgmr.msrb.gmra.mxu1 %v1469_v9  ;;  %v2882_v9 = vld [vmem:[#allocation5 + $0x8] sm:$0xff] }
 0x5ff   : > { %2224 = vmatpush.bf16.msra.mxu1 %v2906_v2  ;;  %2204 = vmatpush.bf16.msrb.mxu2 %v2899_v36 }
 0x600   : > { %2167 = vmatpush.bf16.msra.mxu3 %v2882_v9 }
 0x603   : > { %2225 = vmatpush.bf16.msra.mxu1 %v2905_v5 }
 0x608   : > { %v1400_v48 = vpop.xlane.xlu1 %1399 }
 0x609   : > { %v1405_v6 = vmul.f32 %v1400_v48, %v3630_v45  ;;  %v2898_v48 = vld [vmem:[#allocation5 + $0x88] sm:$0xff] }
 0x60a   : > { %2205 = vmatpush.bf16.msrb.mxu2 %v2898_v48 }
 0x60b   : > { %v1409_v40 = vadd.f32 1e-07, %v1405_v6 }
 0x60d   : > { %3040 = vrsqrt.f32 %v1409_v40  ;;  %vm1437_vm1 = vweird.f32 %v1409_v40 }
 0x610   : > { %v1402_v1 = vpop.xlane.xlu2 %1401 }
 0x611   : > { %v1406_v17 = vmul.f32 %v1402_v1, %v3630_v45 }
 0x613   : > { %v3041_v8 = vpop.eup %3040  ;;  %v1410_v10 = vadd.f32 1e-07, %v1406_v17 }
 0x614   : > { %v1432_v11 = vmul.f32 %v3041_v8, %v1409_v40  ;;  %vm1438_vm0 = vweird.f32 %v3041_v8 }
 0x615   : > { %3042 = vrsqrt.f32 %v1410_v10  ;;  %vm1439_vm2 = vmor %vm1437_vm1, %vm1438_vm0  ;;  %vm1447_vm4 = vweird.f32 %v1410_v10 }
 0x616   : > { %v1433_v12 = vmul.f32 %v3041_v8, %v1432_v11  ;;  %v2897_v11 = vld [vmem:[#allocation5 + $0x80] sm:$0xff] }
 0x617   : > { %2206 = vmatpush.bf16.msrb.mxu2 %v2897_v11 }
 0x618   : > { %v1434_v14 = vmul.f32 0.5, %v1433_v12 }
 0x61a   : > { %v1435_v15 = vsub.f32 1.5, %v1434_v14  ;;  %v3881_v14 = vperm.slane %v1503_v61, 2 }
 0x61b   : > { %v3043_v0 = vpop.eup %3042 }
 0x61c   : > { %v1436_v33 = vmul.f32 %v3041_v8, %v1435_v15  ;;  %v1442_v19 = vmul.f32 %v3043_v0, %v1410_v10  ;;  %vm1448_vm3 = vweird.f32 %v3043_v0  ;;  %v2881_v10 = vld [vmem:[#allocation5] sm:$0xff] }
 0x61d   : > { %vm1449_vm5 = vmor %vm1447_vm4, %vm1448_vm3  ;;  %2168 = vmatpush.bf16.msra.mxu3 %v2881_v10 }
 0x61e   : > { %v1443_v20 = vmul.f32 %v3043_v0, %v1442_v19  ;;  %v1440_v24 = vsel %vm1439_vm2, %v3041_v8, %v1436_v33  ;;  %v3877_v8 = vperm.slane %v1503_v61, 0 }
 0x61f   : > { %v1453_v45 = vmul.f32 %v1440_v24, %v3646_v53  ;;  %v2895_v53 = vld [vmem:[#allocation5 + $0x70] sm:$0xff] }
 0x620   : > { %v1444_v25 = vmul.f32 0.5, %v1443_v20  ;;  %2181 = vmatpush.bf16.msrb.mxu0 %v2895_v53 }
 0x621   : > { %v1460_v42 = vadd.f32 %v2967_v63, %v1453_v45 }
 0x622   : > { %v1445_v26 = vsub.f32 1.5, %v1444_v25 }
 0x623   : > { %v1467_v30 = vmul.f32 %v2968_v46, %v1460_v42 }
 0x624   : > { %v1446_v18 = vmul.f32 %v3043_v0, %v1445_v26 }
 0x626   : > { %v1450_v21 = vsel %vm1449_vm5, %v3043_v0, %v1446_v18 }
 0x627   : > { %v1454_v16 = vmul.f32 %v1450_v21, %v3652_v32  ;;  %v2894_v32 = vld [vmem:[#allocation5 + $0x68] sm:$0xff] }
 0x628   : > { %2182 = vmatpush.bf16.msrb.mxu0 %v2894_v32 }
 0x629   : > { %v1461_v29 = vadd.f32 %v2967_v63, %v1454_v16  ;;  %v2890_v63 = vld [vmem:[#allocation5 + $0x48] sm:$0xff] }
 0x62b   : > { %v1468_v37 = vmul.f32 %v2968_v46, %v1461_v29  ;;  %v3867_v46 = vperm.slane %v1503_v61, 3 }
 0x62c   : > { %2183 = vmatpush.bf16.msrb.mxu0 %v2893_v50 }
 0x62d   : > { %v1470_v38 = vpack.c.bf16 %v1468_v37, %v1467_v30 }
 0x62f   : > { %1686 = vmatmul.bf16.gmra.mxu3 %v1470_v38  ;;  %1705 = vmatmul.bf16.gmra.mxu0 %v1470_v38 }
 0x630   : > { %1724 = vmatmul.bf16.gmra.mxu2 %v1470_v38  ;;  %1743 = vmatmul.bf16.gmra.mxu1 %v1470_v38 }
 0x631   : > { %2184 = vmatpush.bf16.msrb.mxu0 %v2892_v54 }
 0x635   : > { %2185 = vmatpush.bf16.msrb.mxu0 %v2891_v62 }
 0x639   : > { %2186 = vmatpush.bf16.msrb.mxu0 %v2890_v63 }
 0x63d   : > { %2187 = vmatpush.bf16.msrb.mxu0 %v2889_v4 }
 0x67a   : > { %v1701_v7 = vpop.f32.mrf.mxu0 }
 0x67b   : > { %v3870_v6 = vadd.f32 %v1701_v7, %v3865_v44  ;;  %v1739_v40 = vpop.f32.mrf.mxu1 }
 0x67c   : > { %v3873_v1 = vadd.f32 %v1739_v40, %v3867_v46 }
 0x67d   : > { %v1766_v17 = vmul.f32 %v3870_v6, %v3870_v6 }
 0x67e   : > { %v1768_v12 = vmul.f32 %v3873_v1, %v3873_v1 }
 0x67f   : > { %v1782_v15 = vmul.f32 %v1766_v17, %v3870_v6 }
 0x680   : > { %v1784_v0 = vmul.f32 %v1768_v12, %v3873_v1  ;;  %v1682_v33 = vpop.f32.mrf.mxu3 }
 0x681   : > { %v1798_v19 = vmul.f32 0.044715, %v1782_v15  ;;  %v3886_v20 = vadd.f32 %v1682_v33, %v3877_v8  ;;  %v1720_v24 = vpop.f32.mrf.mxu2  ;;  %v1750_v33 = vmul.f32 0.5, %v3870_v6 }
 0x682   : > { %v1800_v25 = vmul.f32 0.044715, %v1784_v0  ;;  %v3889_v26 = vadd.f32 %v1720_v24, %v3881_v14  ;;  %v1703_v45 = vpop.f32.mrf.mxu0 }
 0x683   : > { %v1814_v18 = vadd.f32 %v1798_v19, %v3870_v6  ;;  %v1765_v21 = vmul.f32 %v3886_v20, %v3886_v20  ;;  %v1704_v16 = vadd.f32 %v1703_v45, %v3865_v44  ;;  %v1741_v42 = vpop.f32.mrf.mxu1  ;;  %v1752_v45 = vmul.f32 0.5, %v3873_v1 }
 0x684   : > { %v1816_v29 = vadd.f32 %v1800_v25, %v3873_v1  ;;  %v1767_v30 = vmul.f32 %v3889_v26, %v3889_v26  ;;  %v1742_v37 = vadd.f32 %v1741_v42, %v3867_v46  ;;  %v1749_v6 = vmul.f32 0.5, %v3886_v20 }
 0x685   : > { %v1781_v38 = vmul.f32 %v1765_v21, %v3886_v20  ;;  %v1770_v13 = vmul.f32 %v1704_v16, %v1704_v16  ;;  %v1830_v35 = vmul.f32 0.7978846, %v1814_v18  ;;  %v1754_v19 = vmul.f32 0.5, %v1704_v16 }
 0x686   : > { %v1783_v39 = vmul.f32 %v1767_v30, %v3889_v26  ;;  %v1772_v53 = vmul.f32 %v1742_v37, %v1742_v37  ;;  %v1832_v32 = vmul.f32 0.7978846, %v1816_v29  ;;  %v1756_v18 = vmul.f32 0.5, %v1742_v37 }
 0x687   : > { %v1797_v43 = vmul.f32 0.044715, %v1781_v38  ;;  %v1786_v23 = vmul.f32 %v1770_v13, %v1704_v16  ;;  %3044 = vtanh.f32 %v1830_v35  ;;  %v1751_v1 = vmul.f32 0.5, %v3889_v26 }
 0x688   : > { %v1799_v47 = vmul.f32 0.044715, %v1783_v39  ;;  %v1788_v31 = vmul.f32 %v1772_v53, %v1742_v37  ;;  %v1684_v49 = vpop.f32.mrf.mxu3  ;;  %3046 = vtanh.f32 %v1832_v32 }
 0x689   : > { %v1813_v50 = vadd.f32 %v1797_v43, %v3886_v20  ;;  %v1802_v41 = vmul.f32 0.044715, %v1786_v23  ;;  %v1685_v51 = vadd.f32 %v1684_v49, %v3877_v8  ;;  %v1722_v52 = vpop.f32.mrf.mxu2 }
 0x68a   : > { %v1815_v54 = vadd.f32 %v1799_v47, %v3889_v26  ;;  %v1804_v55 = vmul.f32 0.044715, %v1788_v31  ;;  %v1723_v56 = vadd.f32 %v1722_v52, %v3881_v14 }
 0x68b   : > { %v1818_v57 = vadd.f32 %v1802_v41, %v1704_v16  ;;  %v1769_v62 = vmul.f32 %v1685_v51, %v1685_v51  ;;  %v1829_v60 = vmul.f32 0.7978846, %v1813_v50  ;;  %v1753_v16 = vmul.f32 0.5, %v1685_v51 }
 0x68c   : > { %v1820_v58 = vadd.f32 %v1804_v55, %v1742_v37  ;;  %v1771_v59 = vmul.f32 %v1723_v56, %v1723_v56  ;;  %v1831_v2 = vmul.f32 0.7978846, %v1815_v54  ;;  %v1755_v37 = vmul.f32 0.5, %v1723_v56 }
 0x68d   : > { %v1834_v61 = vmul.f32 0.7978846, %v1818_v57  ;;  %v1785_v63 = vmul.f32 %v1769_v62, %v1685_v51  ;;  %v3045_v7 = vpop.eup %3044 }
 0x68e   : > { %v1836_v3 = vmul.f32 0.7978846, %v1820_v58  ;;  %v1787_v36 = vmul.f32 %v1771_v59, %v1723_v56  ;;  %v3047_v48 = vpop.eup %3046  ;;  %v1862_v10 = vadd.f32 1.0, %v3045_v7 }
 0x68f   : > { %3048 = vtanh.f32 %v1834_v61  ;;  %v1801_v4 = vmul.f32 0.044715, %v1785_v63  ;;  %v1864_v15 = vadd.f32 1.0, %v3047_v48 }
 0x690   : > { %3050 = vtanh.f32 %v1836_v3  ;;  %v1803_v5 = vmul.f32 0.044715, %v1787_v36  ;;  %v1878_v29 = vmul.f32 %v1862_v10, %v1750_v33 }
 0x691   : > { %3052 = vtanh.f32 %v1829_v60  ;;  %v1817_v9 = vadd.f32 %v1801_v4, %v1685_v51  ;;  %v1880_v38 = vmul.f32 %v1864_v15, %v1752_v45 }
 0x692   : > { %3054 = vtanh.f32 %v1831_v2  ;;  %v1819_v40 = vadd.f32 %v1803_v5, %v1723_v56 }
 0x693   : > { %v1833_v17 = vmul.f32 0.7978846, %v1817_v9 }
 0x694   : > { %v1835_v11 = vmul.f32 0.7978846, %v1819_v40 }
 0x695   : > { %v3049_v12 = vpop.eup %3048  ;;  %3056 = vtanh.f32 %v1833_v17 }
 0x696   : > { %v3051_v0 = vpop.eup %3050  ;;  %v1866_v24 = vadd.f32 1.0, %v3049_v12  ;;  %3058 = vtanh.f32 %v1835_v11 }
 0x697   : > { %v3053_v25 = vpop.eup %3052  ;;  %v1868_v21 = vadd.f32 1.0, %v3051_v0 }
 0x698   : > { %v3055_v42 = vpop.eup %3054  ;;  %v1882_v30 = vmul.f32 %v1866_v24, %v1754_v19  ;;  %v1861_v39 = vadd.f32 1.0, %v3053_v25 }
 0x699   : > { %v1884_v13 = vmul.f32 %v1868_v21, %v1756_v18  ;;  %v1863_v43 = vadd.f32 1.0, %v3055_v42 }
 0x69a   : > { %v1894_v53 = vpack.c.bf16 %v1882_v30, %v1878_v29  ;;  %v1877_v49 = vmul.f32 %v1861_v39, %v1749_v6 }
 0x69b   : > { %v3057_v35 = vpop.eup %3056  ;;  %v1896_v23 = vpack.c.bf16 %v1884_v13, %v1880_v38  ;;  %v1879_v41 = vmul.f32 %v1863_v43, %v1751_v1 }
 0x69c   : > { %v3059_v32 = vpop.eup %3058  ;;  %v1865_v47 = vadd.f32 1.0, %v3057_v35  ;;  %2188 = vmatmul.bf16.vlgmr.msrb.gmra.mxu0 %v1894_v53 }
 0x69d   : > { %v1867_v31 = vadd.f32 1.0, %v3059_v32  ;;  %2226 = vmatmul.bf16.vlgmr.msra.gmra.mxu1 %v1896_v23 }
 0x69e   : > { %v1881_v50 = vmul.f32 %v1865_v47, %v1753_v16 }
 0x69f   : > { %v1883_v52 = vmul.f32 %v1867_v31, %v1755_v37 }
 0x6a0   : > { %v1893_v54 = vpack.c.bf16 %v1881_v50, %v1877_v49 }
 0x6a1   : > { %v1895_v55 = vpack.c.bf16 %v1883_v52, %v1879_v41 }
 0x6a2   : > { %2169 = vmatmul.bf16.vlgmr.msra.gmra.mxu3 %v1893_v54 }
 0x6a3   : > { %2207 = vmatmul.bf16.vlgmr.msrb.gmra.mxu2 %v1895_v55 }
 0x6ac   : > { %v1706_v57 = vpop.f32.mrf.mxu0 }
 0x6ad   : > { %v3910_v62 = vadd.f32 %v1706_v57, %v3865_v44  ;;  %v1744_v20 = vpop.f32.mrf.mxu1 }
 0x6ae   : > { %v3913_v51 = vadd.f32 %v1744_v20, %v3867_v46 }
 0x6af   : > { %v1774_v26 = vmul.f32 %v3910_v62, %v3910_v62 }
 0x6b0   : > { %v1776_v56 = vmul.f32 %v3913_v51, %v3913_v51 }
 0x6b1   : > { %v1790_v58 = vmul.f32 %v1774_v26, %v3910_v62  ;;  %v1758_v26 = vmul.f32 0.5, %v3910_v62 }
 0x6b2   : > { %v1792_v59 = vmul.f32 %v1776_v56, %v3913_v51  ;;  %v1687_v60 = vpop.f32.mrf.mxu3 }
 0x6b3   : > { %v1806_v61 = vmul.f32 0.044715, %v1790_v58  ;;  %v3922_v63 = vadd.f32 %v1687_v60, %v3877_v8  ;;  %v1725_v2 = vpop.f32.mrf.mxu2  ;;  %v1760_v60 = vmul.f32 0.5, %v3913_v51 }
 0x6b4   : > { %v1808_v3 = vmul.f32 0.044715, %v1792_v59  ;;  %v3925_v36 = vadd.f32 %v1725_v2, %v3881_v14  ;;  %v1708_v4 = vpop.f32.mrf.mxu0 }
 0x6b5   : > { %v1773_v5 = vmul.f32 %v3922_v63, %v3922_v63  ;;  %v1709_v7 = vadd.f32 %v1708_v4, %v3865_v44  ;;  %v1746_v9 = vpop.f32.mrf.mxu1  ;;  %v1822_v48 = vadd.f32 %v1806_v61, %v3910_v62  ;;  %v1757_v62 = vmul.f32 0.5, %v3922_v63 }
 0x6b6   : > { %v1775_v40 = vmul.f32 %v3925_v36, %v3925_v36  ;;  %v1747_v17 = vadd.f32 %v1746_v9, %v3867_v46  ;;  %v1824_v10 = vadd.f32 %v1808_v3, %v3913_v51  ;;  %v1759_v51 = vmul.f32 0.5, %v3925_v36 }
 0x6b7   : > { %v1789_v11 = vmul.f32 %v1773_v5, %v3922_v63  ;;  %v1778_v12 = vmul.f32 %v1709_v7, %v1709_v7  ;;  %v1838_v24 = vmul.f32 0.7978846, %v1822_v48  ;;  %v1762_v56 = vmul.f32 0.5, %v1709_v7 }
 0x6b8   : > { %v1791_v15 = vmul.f32 %v1775_v40, %v3925_v36  ;;  %v1780_v0 = vmul.f32 %v1747_v17, %v1747_v17  ;;  %v1840_v18 = vmul.f32 0.7978846, %v1824_v10  ;;  %v1764_v61 = vmul.f32 0.5, %v1747_v17 }
 0x6b9   : > { %v1805_v33 = vmul.f32 0.044715, %v1789_v11  ;;  %v1794_v19 = vmul.f32 %v1778_v12, %v1709_v7  ;;  %3060 = vtanh.f32 %v1838_v24 }
 0x6ba   : > { %v1807_v44 = vmul.f32 0.044715, %v1791_v15  ;;  %v1796_v25 = vmul.f32 %v1780_v0, %v1747_v17  ;;  %v1689_v45 = vpop.f32.mrf.mxu3  ;;  %3062 = vtanh.f32 %v1840_v18 }
 0x6bb   : > { %v1810_v21 = vmul.f32 0.044715, %v1794_v19  ;;  %v1690_v42 = vadd.f32 %v1689_v45, %v3877_v8  ;;  %v1727_v29 = vpop.f32.mrf.mxu2  ;;  %v1821_v46 = vadd.f32 %v1805_v33, %v3922_v63  ;;  %v2969_v63 = vld [vmem:[%s3981_s10] ss:$0 sm:$0xff] }
 0x6bc   : > { %v1812_v30 = vmul.f32 0.044715, %v1796_v25  ;;  %v1728_v38 = vadd.f32 %v1727_v29, %v3881_v14  ;;  %v1823_v13 = vadd.f32 %v1807_v44, %v3925_v36 }
 0x6bd   : > { %v1777_v39 = vmul.f32 %v1690_v42, %v1690_v42  ;;  %v1826_v53 = vadd.f32 %v1810_v21, %v1709_v7  ;;  %v1837_v6 = vmul.f32 0.7978846, %v1821_v46  ;;  %v1761_v7 = vmul.f32 0.5, %v1690_v42 }
 0x6be   : > { %v1779_v35 = vmul.f32 %v1728_v38, %v1728_v38  ;;  %v1828_v43 = vadd.f32 %v1812_v30, %v1747_v17  ;;  %v1839_v8 = vmul.f32 0.7978846, %v1823_v13  ;;  %v1763_v17 = vmul.f32 0.5, %v1728_v38 }
 0x6bf   : > { %v1793_v23 = vmul.f32 %v1777_v39, %v1690_v42  ;;  %v1842_v32 = vmul.f32 0.7978846, %v1826_v53  ;;  %v3061_v31 = vpop.eup %3060 }
 0x6c0   : > { %v1795_v16 = vmul.f32 %v1779_v35, %v1728_v38  ;;  %v1844_v47 = vmul.f32 0.7978846, %v1828_v43  ;;  %v3063_v49 = vpop.eup %3062  ;;  %v1870_v52 = vadd.f32 1.0, %v3061_v31 }
 0x6c1   : > { %v1809_v1 = vmul.f32 0.044715, %v1793_v23  ;;  %3064 = vtanh.f32 %v1842_v32  ;;  %v1872_v57 = vadd.f32 1.0, %v3063_v49 }
 0x6c2   : > { %v1811_v37 = vmul.f32 0.044715, %v1795_v16  ;;  %3066 = vtanh.f32 %v1844_v47  ;;  %v1886_v4 = vmul.f32 %v1870_v52, %v1758_v26 }
 0x6c3   : > { %v1825_v14 = vadd.f32 %v1809_v1, %v1690_v42  ;;  %3068 = vtanh.f32 %v1837_v6  ;;  %v1888_v9 = vmul.f32 %v1872_v57, %v1760_v60 }
 0x6c4   : > { %v1827_v50 = vadd.f32 %v1811_v37, %v1728_v38  ;;  %3070 = vtanh.f32 %v1839_v8 }
 0x6c5   : > { %v1841_v41 = vmul.f32 0.7978846, %v1825_v14 }
 0x6c6   : > { %v1843_v54 = vmul.f32 0.7978846, %v1827_v50 }
 0x6c7   : > { %v3065_v55 = vpop.eup %3064  ;;  %3072 = vtanh.f32 %v1841_v41 }
 0x6c8   : > { %v3067_v20 = vpop.eup %3066  ;;  %v1874_v58 = vadd.f32 1.0, %v3065_v55  ;;  %3074 = vtanh.f32 %v1843_v54 }
 0x6c9   : > { %v3069_v59 = vpop.eup %3068  ;;  %v1876_v2 = vadd.f32 1.0, %v3067_v20 }
 0x6ca   : > { %v3071_v3 = vpop.eup %3070  ;;  %v1890_v5 = vmul.f32 %v1874_v58, %v1762_v56  ;;  %v1869_v10 = vadd.f32 1.0, %v3069_v59 }
 0x6cb   : > { %v1892_v48 = vmul.f32 %v1876_v2, %v1764_v61  ;;  %v1871_v15 = vadd.f32 1.0, %v3071_v3 }
 0x6cc   : > { %v1898_v40 = vpack.c.bf16 %v1890_v5, %v1886_v4  ;;  %v1885_v24 = vmul.f32 %v1869_v10, %v1757_v62 }
 0x6cd   : > { %v3073_v11 = vpop.eup %3072  ;;  %v1900_v12 = vpack.c.bf16 %v1892_v48, %v1888_v9  ;;  %v1887_v25 = vmul.f32 %v1871_v15, %v1759_v51 }
 0x6ce   : > { %v3075_v0 = vpop.eup %3074  ;;  %2193 = vmatmul.bf16.gmra.mxu0 %v1898_v40  ;;  %v1873_v33 = vadd.f32 1.0, %v3073_v11 }
 0x6cf   : > { %2231 = vmatmul.bf16.gmra.mxu1 %v1900_v12  ;;  %v1875_v19 = vadd.f32 1.0, %v3075_v0 }
 0x6d0   : > { %v1889_v44 = vmul.f32 %v1873_v33, %v1761_v7 }
 0x6d1   : > { %v1891_v45 = vmul.f32 %v1875_v19, %v1763_v17 }
 0x6d2   : > { %v1897_v18 = vpack.c.bf16 %v1889_v44, %v1885_v24 }
 0x6d3   : > { %v1899_v21 = vpack.c.bf16 %v1891_v45, %v1887_v25 }
 0x6d4   : > { %2174 = vmatmul.bf16.gmra.mxu3 %v1897_v18 }
 0x6d5   : > { %2212 = vmatmul.bf16.gmra.mxu2 %v1899_v21 }
 0x719   : > { %v2189_v42 = vpop.f32.mrf.mxu0 }
 0x71a   : > { %v2227_v38 = vpop.f32.mrf.mxu1 }
 0x721   : > { %v2191_v23 = vpop.f32.mrf.mxu0 }
 0x722   : > { %v2229_v47 = vpop.f32.mrf.mxu1 }
 0x725   : > { %v2170_v29 = vpop.f32.mrf.mxu3 }
 0x726   : > { %v2171_v46 = vadd.f32 %v2969_v63, %v2170_v29  ;;  %v2208_v30 = vpop.f32.mrf.mxu2 }
 0x728   : > { %v2190_v36 = vadd.f32 %v2189_v42, %v2171_v46 }
 0x72a   : > { %v2209_v13 = vadd.f32 %v2208_v30, %v2190_v36 }
 0x72c   : > { %v2228_v39 = vadd.f32 %v2227_v38, %v2209_v13 }
 0x72d   : > { %v2172_v53 = vpop.f32.mrf.mxu3 }
 0x72e   : > { %v2237_v35 = vadd.f32 %v2228_v39, %v3618_v22  ;;  %v2173_v43 = vadd.f32 %v2969_v63, %v2172_v53  ;;  %v2210_v6 = vpop.f32.mrf.mxu2 }
 0x730   : > { %2241 = vst [vmem:[%s3952_s23] sm:$0xff] %v2237_v35  ;;  %v2192_v32 = vadd.f32 %v2191_v23, %v2173_v43 }
 0x732   : > { %v2211_v16 = vadd.f32 %v2210_v6, %v2192_v32 }
 0x734   : > { %v2230_v8 = vadd.f32 %v2229_v47, %v2211_v16 }
 0x736   : > { %v2238_v1 = vadd.f32 %v2230_v8, %v3621_v27 }
 0x738   : > { %2242 = vst [vmem:[%s3952_s23 + $0x8] sm:$0xff] %v2238_v1 }
 0x74b   : > { %v2194_v37 = vpop.f32.mrf.mxu0 }
 0x74c   : > { %v2232_v41 = vpop.f32.mrf.mxu1 }
 0x753   : > { %v2196_v20 = vpop.f32.mrf.mxu0 }
 0x754   : > { %v2234_v27 = vpop.f32.mrf.mxu1 }
 0x757   : > { %v2175_v31 = vpop.f32.mrf.mxu3 }
 0x758   : > { %v2176_v14 = vadd.f32 %v2969_v63, %v2175_v31  ;;  %v2213_v49 = vpop.f32.mrf.mxu2 }
 0x75a   : > { %v2195_v50 = vadd.f32 %v2194_v37, %v2176_v14 }
 0x75c   : > { %v2214_v22 = vadd.f32 %v2213_v49, %v2195_v50 }
 0x75e   : > { %v2233_v52 = vadd.f32 %v2232_v41, %v2214_v22 }
 0x75f   : > { %v2177_v54 = vpop.f32.mrf.mxu3 }
 0x760   : > { %v2239_v55 = vadd.f32 %v2233_v52, %v3624_v28  ;;  %v2178_v57 = vadd.f32 %v2969_v63, %v2177_v54  ;;  %v2215_v56 = vpop.f32.mrf.mxu2 }
 0x762   : > { %2243 = vst [vmem:[%s3952_s23 + $0x10] sm:$0xff] %v2239_v55  ;;  %v2197_v26 = vadd.f32 %v2196_v20, %v2178_v57 }
 0x764   : > { %v2216_v58 = vadd.f32 %v2215_v56, %v2197_v26 }
 0x766   : > { %v2235_v59 = vadd.f32 %v2234_v27, %v2216_v58 }
 0x768   : > { %v2240_v60 = vadd.f32 %v2235_v59, %v3627_v34 }
 0x76a   : > { %2244 = vst [vmem:[%s3952_s23 + $0x18] sm:$0xff] %v2240_v60 }
 0x76b PF: > { %s23_s19 = sadd.s32 1, %s3166_s19   ;;  %s3985_s17 = smov %s3162_s18 }
 0x76c   : > { %p20_p8 = scmp.ge.s32.totalorder %s23_s19, 4   ;;  %s3986_s18 = smov %s3988_s21 }
 0x76e   :  { %22 = sbr.rel (!%p20_p8) target bundleno = 3 (0x3), region = 109 }
 0x773   :  { %2275 = vsyncpa [#allocation4], 1 }
 0x774   :  { %2277 = vsyncpa [#allocation4 + $0x1], 1 }
 0x775   :  { %2278 = vsyncpa [#allocation6], 1 }

</bundles_post_ra>
